<compile_context>
chip_gen: v7x
topology: tpu7x:2x2x1
jax: 0.10.0
libtpu: 0.0.40
codegen_flags: <defaults>
</compile_context>

<pallas_src>
import functools

import jax
import jax.numpy as jnp
from jax.experimental import pallas as pl
from jax.experimental.pallas import tpu as pltpu

NEG_SLOPE = 0.01  # nn.LeakyReLU() default


def _leaky_relu(x):
    return jnp.where(x > 0, x, NEG_SLOPE * x)


def _round_up(n, m):
    return ((n + m - 1) // m) * m


def grace_mlp_kernel(x_ref,
                     w1_ref, b1_ref,
                     w2_ref, b2_ref,
                     w5_ref, b5_ref,
                     w3_ref, b3_ref,
                     w4_ref, b4_ref,
                     o_ref):
    """One batch tile of the MLP.

    Weights (bf16) have constant block indices so they are VMEM-resident across
    all grid steps.  MXU inputs are bf16; accumulation, bias-add and LeakyReLU
    are f32.
    """
    x = x_ref[...]  # bf16 (TILE_B, in)

    def dense(h_bf16, w_ref, b_ref):
        return jnp.dot(h_bf16, w_ref[...],
                       preferred_element_type=jnp.float32) + b_ref[...]

    h = _leaky_relu(dense(x, w1_ref, b1_ref))
    # Dropout(0.1) is identity at inference time (training-mode RNG masking not
    # implemented here on purpose).
    h = _leaky_relu(dense(h.astype(jnp.bfloat16), w2_ref, b2_ref))
    h = _leaky_relu(dense(h.astype(jnp.bfloat16), w5_ref, b5_ref))
    h = _leaky_relu(dense(h.astype(jnp.bfloat16), w3_ref, b3_ref))
    out = dense(h.astype(jnp.bfloat16), w4_ref, b4_ref)

    o_ref[...] = out.astype(o_ref.dtype)


@functools.partial(jax.jit, static_argnames=("out_dim", "tile_b"))
def grace_forward(x, params, out_dim=26, tile_b=256):
    """params: dict of pre-transposed (in, out) bf16 weights and (1, out) f32
    biases; fc4 weight/bias are zero-padded to 128 output lanes."""
    B, in_dim = x.shape
    padded_out = params["w4"].shape[1]

    # Batch tiling: sublane-friendly tile, whole (padded) batch if it is small.
    tb = min(tile_b, _round_up(B, 16))
    b_padded = _round_up(B, tb)

    xp = x.astype(jnp.bfloat16)
    if b_padded != B:
        xp = jnp.pad(xp, ((0, b_padded - B), (0, 0)))

    weight_names = ("w1", "b1", "w2", "b2", "w5", "b5", "w3", "b3", "w4", "b4")
    weight_ops = tuple(params[n] for n in weight_names)

    x_spec = pl.BlockSpec((tb, in_dim), lambda i: (i, 0))
    # Constant block index -> each weight/bias is DMA'd once and stays resident
    # in VMEM for every batch tile (no per-tile re-fetch).
    w_specs = [pl.BlockSpec(p.shape, lambda i: (0, 0)) for p in weight_ops]
    out_spec = pl.BlockSpec((tb, padded_out), lambda i: (i, 0))

    y_padded = pl.pallas_call(
        grace_mlp_kernel,
        out_shape=jax.ShapeDtypeStruct((b_padded, padded_out), jnp.float32),
        grid=(b_padded // tb,),
        in_specs=[x_spec] + w_specs,
        out_specs=out_spec,
        compiler_params=pltpu.CompilerParams(
            # Batch tiles are independent -> shard across TCs on v7x megacore.
            dimension_semantics=("parallel",)),
    )(xp, *weight_ops)

    return y_padded[:B, :out_dim]


def init_params(key, input_size=512, out_dim=26, padded_out=128):
    """Deterministic synthetic parameters.  PyTorch Linear stores (out, in); we
    keep the transposed (in, out) layout the kernel consumes.  Weights are bf16
    (MXU-native, halves HBM traffic); biases stay f32."""
    layer_dims = {
        "1": (input_size, 1024),
        "2": (1024, 512),
        "5": (512, 256),
        "3": (256, 128),
        "4": (128, out_dim),
    }
    params = {}
    for name, (din, dout) in layer_dims.items():
        key, kw, kb = jax.random.split(key, 3)
        bound = 1.0 / jnp.sqrt(din)
        w = jax.random.uniform(kw, (din, dout), jnp.float32, -bound, bound)
        b = jax.random.uniform(kb, (1, dout), jnp.float32, -bound, bound)
        if name == "4":
            # Pad final layer out-dim to a lane-dense 128 with zeros so output
            # stores are unmasked full-lane vst (sliced back to 26 outside).
            w = jnp.pad(w, ((0, 0), (0, padded_out - dout)))
            b = jnp.pad(b, ((0, 0), (0, padded_out - dout)))
        params[f"w{name}"] = w.astype(jnp.bfloat16)
        params[f"b{name}"] = b  # f32
    return params


def reference_forward(x, params, out_dim=26):
    """Pure-JAX reference with identical dtype semantics (bf16 MXU inputs,
    f32 accumulation / bias / activation; inference-mode dropout)."""
    def dense(h, w, b):
        return jnp.dot(h.astype(jnp.bfloat16), w,
                       preferred_element_type=jnp.float32) + b

    h = _leaky_relu(dense(x, params["w1"], params["b1"]))
    h = _leaky_relu(dense(h, params["w2"], params["b2"]))
    h = _leaky_relu(dense(h, params["w5"], params["b5"]))
    h = _leaky_relu(dense(h, params["w3"], params["b3"]))
    y = dense(h, params["w4"], params["b4"])
    return y[:, :out_dim]


if __name__ == "__main__":
    key = jax.random.PRNGKey(0)
    key, kx = jax.random.split(key)

    B = 8
    INPUT_SIZE = 512  # feature_type='face_embed'
    OUT_DIM = 26

    x = jax.random.normal(kx, (B, INPUT_SIZE), jnp.float32)
    params = init_params(key, input_size=INPUT_SIZE, out_dim=OUT_DIM)

    y = grace_forward(x, params, out_dim=OUT_DIM)
    y = jax.block_until_ready(y)

    y_ref = reference_forward(x, params, out_dim=OUT_DIM)
    assert y.shape == (B, OUT_DIM), y.shape
    assert jnp.allclose(y, y_ref, atol=1e-2, rtol=1e-2), "mismatch vs reference"

    print("KERNEL_OK")
</pallas_src>

<mosaic_0001>
module attributes {stable_mosaic.version = 11 : i64} {
  func.func @grace_mlp_kernel(%arg0: i32, %arg1: memref<16x512xbf16, #tpu.memory_space<vmem>>, %arg2: memref<512x1024xbf16, #tpu.memory_space<vmem>>, %arg3: memref<1x1024xf32, #tpu.memory_space<vmem>>, %arg4: memref<1024x512xbf16, #tpu.memory_space<vmem>>, %arg5: memref<1x512xf32, #tpu.memory_space<vmem>>, %arg6: memref<512x256xbf16, #tpu.memory_space<vmem>>, %arg7: memref<1x256xf32, #tpu.memory_space<vmem>>, %arg8: memref<256x128xbf16, #tpu.memory_space<vmem>>, %arg9: memref<1x128xf32, #tpu.memory_space<vmem>>, %arg10: memref<128x128xbf16, #tpu.memory_space<vmem>>, %arg11: memref<1x128xf32, #tpu.memory_space<vmem>>, %arg12: memref<16x128xf32, #tpu.memory_space<vmem>>) attributes {dimension_semantics = [#tpu.dimension_semantics<parallel>], iteration_bounds = array<i64: 1>, scalar_prefetch = 0 : i64, scratch_operands = 0 : i64, tpu.core_type = #tpu.core_type<tc>, window_params = [{transform_indices = @transform_0, window_bounds = array<i64: 16, 512>}, {pipeline_mode = #tpu.pipeline_mode<synchronous>, transform_indices = @transform_1, window_bounds = array<i64: 512, 1024>}, {pipeline_mode = #tpu.pipeline_mode<synchronous>, transform_indices = @transform_2, window_bounds = array<i64: 1, 1024>}, {pipeline_mode = #tpu.pipeline_mode<synchronous>, transform_indices = @transform_3, window_bounds = array<i64: 1024, 512>}, {pipeline_mode = #tpu.pipeline_mode<synchronous>, transform_indices = @transform_4, window_bounds = array<i64: 1, 512>}, {pipeline_mode = #tpu.pipeline_mode<synchronous>, transform_indices = @transform_5, window_bounds = array<i64: 512, 256>}, {pipeline_mode = #tpu.pipeline_mode<synchronous>, transform_indices = @transform_6, window_bounds = array<i64: 1, 256>}, {pipeline_mode = #tpu.pipeline_mode<synchronous>, transform_indices = @transform_7, window_bounds = array<i64: 256, 128>}, {pipeline_mode = #tpu.pipeline_mode<synchronous>, transform_indices = @transform_8, window_bounds = array<i64: 1, 128>}, {pipeline_mode = #tpu.pipeline_mode<synchronous>, transform_indices = @transform_9, window_bounds = array<i64: 128, 128>}, {pipeline_mode = #tpu.pipeline_mode<synchronous>, transform_indices = @transform_10, window_bounds = array<i64: 1, 128>}, {transform_indices = @transform_11, window_bounds = array<i64: 16, 128>}]} {
    %c0 = arith.constant 0 : index
    %c0_0 = arith.constant 0 : index
    %0 = vector.load %arg1[%c0, %c0_0] : memref<16x512xbf16, #tpu.memory_space<vmem>>, vector<16x512xbf16>
    %c0_1 = arith.constant 0 : index
    %c0_2 = arith.constant 0 : index
    %1 = vector.load %arg2[%c0_1, %c0_2] : memref<512x1024xbf16, #tpu.memory_space<vmem>>, vector<512x1024xbf16>
    %cst = arith.constant dense<0.000000e+00> : vector<16x1024xf32>
    %2 = tpu.matmul %0, %1, %cst {dimension_numbers = #tpu.dot_dimension_numbers<[1], [0], [0], [1], [0, 0, 1, 1], [], []>} : vector<16x512xbf16>, vector<512x1024xbf16>, vector<16x1024xf32> -> vector<16x1024xf32>
    %c0_3 = arith.constant 0 : index
    %c0_4 = arith.constant 0 : index
    %3 = vector.load %arg3[%c0_3, %c0_4] : memref<1x1024xf32, #tpu.memory_space<vmem>>, vector<1x1024xf32>
    %4 = vector.broadcast %3 : vector<1x1024xf32> to vector<16x1024xf32>
    %5 = arith.addf %2, %4 : vector<16x1024xf32>
    %cst_5 = arith.constant 0.000000e+00 : f32
    %6 = vector.broadcast %cst_5 : f32 to vector<16x1024xf32>
    %7 = arith.cmpf ogt, %5, %6 : vector<16x1024xf32>
    %cst_6 = arith.constant 0.00999999977 : f32
    %8 = vector.broadcast %cst_6 : f32 to vector<16x1024xf32>
    %9 = arith.mulf %8, %5 : vector<16x1024xf32>
    %10 = arith.select %7, %5, %9 : vector<16x1024xi1>, vector<16x1024xf32>
    %11 = arith.truncf %10 : vector<16x1024xf32> to vector<16x1024xbf16>
    %c0_7 = arith.constant 0 : index
    %c0_8 = arith.constant 0 : index
    %12 = vector.load %arg4[%c0_7, %c0_8] : memref<1024x512xbf16, #tpu.memory_space<vmem>>, vector<1024x512xbf16>
    %cst_9 = arith.constant dense<0.000000e+00> : vector<16x512xf32>
    %13 = tpu.matmul %11, %12, %cst_9 {dimension_numbers = #tpu.dot_dimension_numbers<[1], [0], [0], [1], [0, 0, 1, 1], [], []>} : vector<16x1024xbf16>, vector<1024x512xbf16>, vector<16x512xf32> -> vector<16x512xf32>
    %c0_10 = arith.constant 0 : index
    %c0_11 = arith.constant 0 : index
    %14 = vector.load %arg5[%c0_10, %c0_11] : memref<1x512xf32, #tpu.memory_space<vmem>>, vector<1x512xf32>
    %15 = vector.broadcast %14 : vector<1x512xf32> to vector<16x512xf32>
    %16 = arith.addf %13, %15 : vector<16x512xf32>
    %cst_12 = arith.constant 0.000000e+00 : f32
    %17 = vector.broadcast %cst_12 : f32 to vector<16x512xf32>
    %18 = arith.cmpf ogt, %16, %17 : vector<16x512xf32>
    %cst_13 = arith.constant 0.00999999977 : f32
    %19 = vector.broadcast %cst_13 : f32 to vector<16x512xf32>
    %20 = arith.mulf %19, %16 : vector<16x512xf32>
    %21 = arith.select %18, %16, %20 : vector<16x512xi1>, vector<16x512xf32>
    %22 = arith.truncf %21 : vector<16x512xf32> to vector<16x512xbf16>
    %c0_14 = arith.constant 0 : index
    %c0_15 = arith.constant 0 : index
    %23 = vector.load %arg6[%c0_14, %c0_15] : memref<512x256xbf16, #tpu.memory_space<vmem>>, vector<512x256xbf16>
    %cst_16 = arith.constant dense<0.000000e+00> : vector<16x256xf32>
    %24 = tpu.matmul %22, %23, %cst_16 {dimension_numbers = #tpu.dot_dimension_numbers<[1], [0], [0], [1], [0, 0, 1, 1], [], []>} : vector<16x512xbf16>, vector<512x256xbf16>, vector<16x256xf32> -> vector<16x256xf32>
    %c0_17 = arith.constant 0 : index
    %c0_18 = arith.constant 0 : index
    %25 = vector.load %arg7[%c0_17, %c0_18] : memref<1x256xf32, #tpu.memory_space<vmem>>, vector<1x256xf32>
    %26 = vector.broadcast %25 : vector<1x256xf32> to vector<16x256xf32>
    %27 = arith.addf %24, %26 : vector<16x256xf32>
    %cst_19 = arith.constant 0.000000e+00 : f32
    %28 = vector.broadcast %cst_19 : f32 to vector<16x256xf32>
    %29 = arith.cmpf ogt, %27, %28 : vector<16x256xf32>
    %cst_20 = arith.constant 0.00999999977 : f32
    %30 = vector.broadcast %cst_20 : f32 to vector<16x256xf32>
    %31 = arith.mulf %30, %27 : vector<16x256xf32>
    %32 = arith.select %29, %27, %31 : vector<16x256xi1>, vector<16x256xf32>
    %33 = arith.truncf %32 : vector<16x256xf32> to vector<16x256xbf16>
    %c0_21 = arith.constant 0 : index
    %c0_22 = arith.constant 0 : index
    %34 = vector.load %arg8[%c0_21, %c0_22] : memref<256x128xbf16, #tpu.memory_space<vmem>>, vector<256x128xbf16>
    %cst_23 = arith.constant dense<0.000000e+00> : vector<16x128xf32>
    %35 = tpu.matmul %33, %34, %cst_23 {dimension_numbers = #tpu.dot_dimension_numbers<[1], [0], [0], [1], [0, 0, 1, 1], [], []>} : vector<16x256xbf16>, vector<256x128xbf16>, vector<16x128xf32> -> vector<16x128xf32>
    %c0_24 = arith.constant 0 : index
    %c0_25 = arith.constant 0 : index
    %36 = vector.load %arg9[%c0_24, %c0_25] : memref<1x128xf32, #tpu.memory_space<vmem>>, vector<1x128xf32>
    %37 = vector.broadcast %36 : vector<1x128xf32> to vector<16x128xf32>
    %38 = arith.addf %35, %37 : vector<16x128xf32>
    %cst_26 = arith.constant 0.000000e+00 : f32
    %39 = vector.broadcast %cst_26 : f32 to vector<16x128xf32>
    %40 = arith.cmpf ogt, %38, %39 : vector<16x128xf32>
    %cst_27 = arith.constant 0.00999999977 : f32
    %41 = vector.broadcast %cst_27 : f32 to vector<16x128xf32>
    %42 = arith.mulf %41, %38 : vector<16x128xf32>
    %43 = arith.select %40, %38, %42 : vector<16x128xi1>, vector<16x128xf32>
    %44 = arith.truncf %43 : vector<16x128xf32> to vector<16x128xbf16>
    %c0_28 = arith.constant 0 : index
    %c0_29 = arith.constant 0 : index
    %45 = vector.load %arg10[%c0_28, %c0_29] : memref<128x128xbf16, #tpu.memory_space<vmem>>, vector<128x128xbf16>
    %cst_30 = arith.constant dense<0.000000e+00> : vector<16x128xf32>
    %46 = tpu.matmul %44, %45, %cst_30 {dimension_numbers = #tpu.dot_dimension_numbers<[1], [0], [0], [1], [0, 0, 1, 1], [], []>} : vector<16x128xbf16>, vector<128x128xbf16>, vector<16x128xf32> -> vector<16x128xf32>
    %c0_31 = arith.constant 0 : index
    %c0_32 = arith.constant 0 : index
    %47 = vector.load %arg11[%c0_31, %c0_32] : memref<1x128xf32, #tpu.memory_space<vmem>>, vector<1x128xf32>
    %48 = vector.broadcast %47 : vector<1x128xf32> to vector<16x128xf32>
    %49 = arith.addf %46, %48 : vector<16x128xf32>
    %c0_33 = arith.constant 0 : index
    %c0_34 = arith.constant 0 : index
    %50 = vector.load %arg12[%c0_33, %c0_34] : memref<16x128xf32, #tpu.memory_space<vmem>>, vector<16x128xf32>
    tpu.vector_store %arg12[%c0_33, %c0_34], %49 {strides = array<i32>} : memref<16x128xf32, #tpu.memory_space<vmem>>, vector<16x128xf32>,
    return
  }
  func.func @transform_0(%arg0: i32) -> (i32, i32) {
    %c0_i32 = arith.constant 0 : i32
    %c0_i32_0 = arith.constant 0 : i32
    return %arg0, %c0_i32 : i32, i32
  }
  func.func @transform_1(%arg0: i32) -> (i32, i32) {
    %c0_i32 = arith.constant 0 : i32
    %c0_i32_0 = arith.constant 0 : i32
    %c0_i32_1 = arith.constant 0 : i32
    return %c0_i32, %c0_i32_0 : i32, i32
  }
  func.func @transform_2(%arg0: i32) -> (i32, i32) {
    %c0_i32 = arith.constant 0 : i32
    %c0_i32_0 = arith.constant 0 : i32
    %c0_i32_1 = arith.constant 0 : i32
    return %c0_i32, %c0_i32_0 : i32, i32
  }
  func.func @transform_3(%arg0: i32) -> (i32, i32) {
    %c0_i32 = arith.constant 0 : i32
    %c0_i32_0 = arith.constant 0 : i32
    %c0_i32_1 = arith.constant 0 : i32
    return %c0_i32, %c0_i32_0 : i32, i32
  }
  func.func @transform_4(%arg0: i32) -> (i32, i32) {
    %c0_i32 = arith.constant 0 : i32
    %c0_i32_0 = arith.constant 0 : i32
    %c0_i32_1 = arith.constant 0 : i32
    return %c0_i32, %c0_i32_0 : i32, i32
  }
  func.func @transform_5(%arg0: i32) -> (i32, i32) {
    %c0_i32 = arith.constant 0 : i32
    %c0_i32_0 = arith.constant 0 : i32
    %c0_i32_1 = arith.constant 0 : i32
    return %c0_i32, %c0_i32_0 : i32, i32
  }
  func.func @transform_6(%arg0: i32) -> (i32, i32) {
    %c0_i32 = arith.constant 0 : i32
    %c0_i32_0 = arith.constant 0 : i32
    %c0_i32_1 = arith.constant 0 : i32
    return %c0_i32, %c0_i32_0 : i32, i32
  }
  func.func @transform_7(%arg0: i32) -> (i32, i32) {
    %c0_i32 = arith.constant 0 : i32
    %c0_i32_0 = arith.constant 0 : i32
    %c0_i32_1 = arith.constant 0 : i32
    return %c0_i32, %c0_i32_0 : i32, i32
  }
  func.func @transform_8(%arg0: i32) -> (i32, i32) {
    %c0_i32 = arith.constant 0 : i32
    %c0_i32_0 = arith.constant 0 : i32
    %c0_i32_1 = arith.constant 0 : i32
    return %c0_i32, %c0_i32_0 : i32, i32
  }
  func.func @transform_9(%arg0: i32) -> (i32, i32) {
    %c0_i32 = arith.constant 0 : i32
    %c0_i32_0 = arith.constant 0 : i32
    %c0_i32_1 = arith.constant 0 : i32
    return %c0_i32, %c0_i32_0 : i32, i32
  }
  func.func @transform_10(%arg0: i32) -> (i32, i32) {
    %c0_i32 = arith.constant 0 : i32
    %c0_i32_0 = arith.constant 0 : i32
    %c0_i32_1 = arith.constant 0 : i32
    return %c0_i32, %c0_i32_0 : i32, i32
  }
  func.func @transform_11(%arg0: i32) -> (i32, i32) {
    %c0_i32 = arith.constant 0 : i32
    %c0_i32_0 = arith.constant 0 : i32
    return %arg0, %c0_i32 : i32, i32
  }
}

</mosaic_0001>

<bundles_post_ra>
// kernel: grace_forward.1
= control target key start
LH: loop header
LB: loop body
LE: loop exit
PB: predicated region body
PF: predicated region fallthrough
CT: control target
= control target key end

     0   :  { %16 = vsyncpa [#allocation3], 0  ;;  %s6434_s0 = inlined_call_operand.vmem [shape: bf16[16,512], index: 0, kind: input, shape index: {}]   ;;  %s6435_s1 = inlined_call_operand.hbm [shape: bf16[512,1024], index: 1, kind: input, shape index: {}]   ;;  %s6436_s2 = inlined_call_operand.vmem [shape: f32[1,1024], index: 2, kind: input, shape index: {}]   ;;  %s6437_s3 = inlined_call_operand.hbm [shape: bf16[1024,512], index: 3, kind: input, shape index: {}]   ;;  %s6438_s4 = inlined_call_operand.vmem [shape: f32[1,512], index: 4, kind: input, shape index: {}]   ;;  %s6439_s5 = inlined_call_operand.hbm [shape: bf16[512,256], index: 5, kind: input, shape index: {}]   ;;  %s6440_s6 = inlined_call_operand.vmem [shape: f32[1,256], index: 6, kind: input, shape index: {}]   ;;  %s6441_s7 = inlined_call_operand.hbm [shape: bf16[256,128], index: 7, kind: input, shape index: {}]   ;;  %s6442_s8 = inlined_call_operand.vmem [shape: f32[1,128], index: 8, kind: input, shape index: {}]   ;;  %s6443_s9 = inlined_call_operand.vmem [shape: bf16[128,128], index: 9, kind: input, shape index: {}]   ;;  %s6444_s10 = inlined_call_operand.vmem [shape: f32[1,128], index: 10, kind: input, shape index: {}]   ;;  %s6445_s11 = inlined_call_operand.vmem [shape: f32[16,128], index: 11, kind: output, shape index: {}]  }
   0x1   :  { %17 = vsyncpa [#allocation5], 0 }
   0x2   :  { %18 = vsyncpa [#allocation8], 0  ;;  %s6176_s17 = smov [#allocation4]   ;;  %s6082_s21 = scalar_lea.hbm %s6437_s3, 32768 }
   0x3   :  { %s40_s18 = sshll.u32 %s6176_s17, 4  ;;  %p6083_p0 = scmp.ne.s32.totalorder %s6437_s3, %s6082_s21  ;;  %s41_s18 = int_to_ptr.vmem [resolvable:$true] %s40_s18 }
   0x4   :  { %p6086_p1 = scmp.lt.u32.totalorder %s6082_s21, %s6437_s3 }
   0x6   :  { %p6088_p2 = pnand %p6086_p1, %p6083_p0 }
   0x8   :  { %6091 = shalt.err (!%p6088_p2)
}
   0x9   :  { %s6092_s26 = scalar_lea.vmem %s41_s18, 32768  ;;  %p6097_p4 = scmp.lt.s32.totalorder %s41_s18, %s41_s18 }
   0xa   :  { %p6093_p3 = scmp.ne.s32.totalorder %s41_s18, %s6092_s26  ;;  %p6098_p5 = scmp.lt.s32.totalorder %s6092_s26, %s6092_s26 }
   0xc   :  { %p6099_p6 = por %p6098_p5, %p6097_p4 }
   0xe   :  { %p6100_p7 = pnand %p6099_p6, %p6093_p3 }
  0x10   :  { %6103 = shalt.err (!%p6100_p7)
}
  0x11   :  { %s6177_s27 = smov 256   ;;  %s6178_s28 = smov 16  }
  0x12   :  { %46 = dma.hbm_to_vmem [thread:$0]  %s6437_s3, 32768, %s41_s18, [#allocation5], %s6177_s27, %s6177_s27, %s6178_s28  }
  0x13   :  { %s6179_s12 = smov [#allocation2]   ;;  %s6104_s16 = scalar_lea.hbm %s6435_s1, 32768 }
  0x14   :  { %s26_s13 = sshll.u32 %s6179_s12, 4  ;;  %p6105_p8 = scmp.ne.s32.totalorder %s6435_s1, %s6104_s16  ;;  %s27_s13 = int_to_ptr.vmem [resolvable:$true] %s26_s13 }
  0x15   :  { %p6108_p9 = scmp.lt.u32.totalorder %s6104_s16, %s6435_s1 }
  0x17   :  { %p6110_p10 = pnand %p6108_p9, %p6105_p8 }
  0x19   :  { %6113 = shalt.err (!%p6110_p10)
}
  0x1a   :  { %s6114_s22 = scalar_lea.vmem %s27_s13, 32768  ;;  %p6119_p12 = scmp.lt.s32.totalorder %s27_s13, %s27_s13 }
  0x1b   :  { %p6115_p11 = scmp.ne.s32.totalorder %s27_s13, %s6114_s22  ;;  %p6120_p13 = scmp.lt.s32.totalorder %s6114_s22, %s6114_s22 }
  0x1d   :  { %p6121_p0 = por %p6120_p13, %p6119_p12 }
  0x1f   :  { %p6122_p1 = pnand %p6121_p0, %p6115_p11 }
  0x21   :  { %6125 = shalt.err (!%p6122_p1)
}
  0x22   :  { %s6180_s3 = smov 512   ;;  %s6181_s18 = smov 32  }
  0x23   :  { %32 = dma.hbm_to_vmem [thread:$0]  %s6435_s1, 32768, %s27_s13, [#allocation3], %s6180_s3, %s6180_s3, %s6181_s18  }
  0x24   :  { %s6182_s25 = smov [#allocation6]   ;;  %s6126_s29 = scalar_lea.hbm %s6439_s5, 8192 }
  0x25   :  { %s54_s26 = sshll.u32 %s6182_s25, 4  ;;  %p6127_p2 = scmp.ne.s32.totalorder %s6439_s5, %s6126_s29  ;;  %s55_s26 = int_to_ptr.vmem [resolvable:$true] %s54_s26 }
  0x26   :  { %p6130_p3 = scmp.lt.u32.totalorder %s6126_s29, %s6439_s5 }
  0x28   :  { %p6132_p4 = pnand %p6130_p3, %p6127_p2 }
  0x2a   :  { %6135 = shalt.err (!%p6132_p4)
}
  0x2b   :  { %s6136_s16 = scalar_lea.vmem %s55_s26, 8192  ;;  %p6141_p6 = scmp.lt.s32.totalorder %s55_s26, %s55_s26 }
  0x2c   :  { %p6137_p5 = scmp.ne.s32.totalorder %s55_s26, %s6136_s16  ;;  %p6142_p7 = scmp.lt.s32.totalorder %s6136_s16, %s6136_s16 }
  0x2e   :  { %p6143_p8 = por %p6142_p7, %p6141_p6 }
  0x30   :  { %p6144_p9 = pnand %p6143_p8, %p6137_p5 }
  0x32   :  { %6147 = shalt.err (!%p6144_p9)
}
  0x33   :  { %s6183_s1 = smov 128   ;;  %s6184_s13 = smov 8  }
  0x34   :  { %60 = dma.hbm_to_vmem [thread:$0]  %s6439_s5, 8192, %s55_s26, [#allocation5], %s6183_s1, %s6183_s1, %s6184_s13  }
  0x35   :  { %s6185_s20 = smov [#allocation7]   ;;  %s6148_s18 = scalar_lea.hbm %s6441_s7, 2048 }
  0x36   :  { %s68_s21 = sshll.u32 %s6185_s20, 4  ;;  %p6149_p10 = scmp.ne.s32.totalorder %s6441_s7, %s6148_s18  ;;  %s69_s21 = int_to_ptr.vmem [resolvable:$true] %s68_s21 }
  0x37   :  { %p6152_p11 = scmp.lt.u32.totalorder %s6148_s18, %s6441_s7 }
  0x39   :  { %p6154_p12 = pnand %p6152_p11, %p6149_p10 }
  0x3b   :  { %6157 = shalt.err (!%p6154_p12)
}
  0x3c   :  { %s6158_s28 = scalar_lea.vmem %s69_s21, 2048  ;;  %p6163_p0 = scmp.lt.s32.totalorder %s69_s21, %s69_s21 }
  0x3d   :  { %p6159_p13 = scmp.ne.s32.totalorder %s69_s21, %s6158_s28  ;;  %p6164_p1 = scmp.lt.s32.totalorder %s6158_s28, %s6158_s28 }
  0x3f   :  { %p6165_p2 = por %p6164_p1, %p6163_p0 }
  0x41   :  { %p6166_p3 = pnand %p6165_p2, %p6159_p13 }
  0x43   :  { %6169 = shalt.err (!%p6166_p3)
}
  0x44   :  { %s6186_s5 = smov 64   ;;  %s6187_s26 = smov 4  }
  0x45   :  { %74 = dma.hbm_to_vmem [thread:$0]  %s6441_s7, 2048, %s69_s21, [#allocation8], %s6186_s5, %s6186_s5, %s6187_s26  }
  0x46   :  { %6170 = dma.done.wait [#allocation3], 32768  }
  0x47   :  { %6171 = vsyncadd [#allocation3], 4294934528 }
  0x48   :  { %6172 = dma.done.wait [#allocation5], 40960  }
  0x49   :  { %6173 = vsyncadd [#allocation5], 4294926336 }
  0x4a   :  { %6174 = dma.done.wait [#allocation8], 2048  }
  0x4b   :  { %6175 = vsyncadd [#allocation8], 4294965248  ;;  %v98_v0 = vld [vmem:[#allocation2] sm:$0xff]  ;;  %v99_v2 = vld [vmem:[#allocation2 + $0x8] sm:$0xff] }
  0x4c   :  { %v102_v1 = vld [vmem:[#allocation2 + $0x20] sm:$0xff]  ;;  %v103_v4 = vld [vmem:[#allocation2 + $0x28] sm:$0xff] }
  0x4d   :  { %v4831_v3 = vcombine.high %v98_v0, %v102_v1  ;;  %v4830_v5 = vcombine.low %v98_v0, %v102_v1  ;;  %v106_v6 = vld [vmem:[#allocation2 + $0x40] sm:$0xff]  ;;  %v4833_v8 = vcombine.high %v99_v2, %v103_v4  ;;  %v4832_v9 = vcombine.low %v99_v2, %v103_v4  ;;  %v107_v11 = vld [vmem:[#allocation2 + $0x48] sm:$0xff] }
  0x4e   :  { %v110_v7 = vld [vmem:[#allocation2 + $0x60] sm:$0xff]  ;;  %v111_v12 = vld [vmem:[#allocation2 + $0x68] sm:$0xff] }
  0x4f   :  { %v4839_v10 = vcombine.high %v106_v6, %v110_v7  ;;  %v114_v13 = vld [vmem:[#allocation2 + $0x80] sm:$0xff]  ;;  %1696 = vmatprep.subr.bf16.mxu0 %v4831_v3  ;;  %v4841_v14 = vcombine.high %v107_v11, %v111_v12  ;;  %v115_v16 = vld [vmem:[#allocation2 + $0x88] sm:$0xff]  ;;  %1782 = vmatprep.subr.bf16.mxu1 %v4833_v8  ;;  %v4838_v18 = vcombine.low %v106_v6, %v110_v7 }
  0x50   :  { %v118_v15 = vld [vmem:[#allocation2 + $0xa0] sm:$0xff]  ;;  %v119_v17 = vld [vmem:[#allocation2 + $0xa8] sm:$0xff]  ;;  %1697 = vmatpush1.bf16.msra.mxu0 %v4830_v5  ;;  %1783 = vmatpush1.bf16.msra.mxu1 %v4832_v9  ;;  %v4840_v19 = vcombine.low %v107_v11, %v111_v12 }
  0x51   :  { %1698 = vmatprep.subr.bf16.mxu0 %v4839_v10  ;;  %v4847_v20 = vcombine.high %v114_v13, %v118_v15  ;;  %1784 = vmatprep.subr.bf16.mxu1 %v4841_v14  ;;  %v4849_v21 = vcombine.high %v115_v16, %v119_v17  ;;  %v122_v22 = vld [vmem:[#allocation2 + $0xc0] sm:$0xff]  ;;  %v123_v24 = vld [vmem:[#allocation2 + $0xc8] sm:$0xff]  ;;  %v4846_v26 = vcombine.low %v114_v13, %v118_v15 }
  0x52   :  { %v126_v23 = vld [vmem:[#allocation2 + $0xe0] sm:$0xff]  ;;  %v127_v25 = vld [vmem:[#allocation2 + $0xe8] sm:$0xff]  ;;  %v4848_v27 = vcombine.low %v115_v16, %v119_v17 }
  0x53   :  { %v4855_v28 = vcombine.high %v122_v22, %v126_v23  ;;  %v4857_v29 = vcombine.high %v123_v24, %v127_v25  ;;  %v130_v30 = vld [vmem:[#allocation2 + $0x100] sm:$0xff]  ;;  %v131_v32 = vld [vmem:[#allocation2 + $0x108] sm:$0xff]  ;;  %v4854_v34 = vcombine.low %v122_v22, %v126_v23  ;;  %v4856_v35 = vcombine.low %v123_v24, %v127_v25 }
  0x54   :  { %1699 = vmatpush1.bf16.msra.mxu0 %v4838_v18  ;;  %1785 = vmatpush1.bf16.msra.mxu1 %v4840_v19  ;;  %v134_v31 = vld [vmem:[#allocation2 + $0x120] sm:$0xff]  ;;  %v135_v33 = vld [vmem:[#allocation2 + $0x128] sm:$0xff] }
  0x55   :  { %1700 = vmatprep.subr.bf16.mxu0 %v4847_v20  ;;  %1786 = vmatprep.subr.bf16.mxu1 %v4849_v21  ;;  %v4863_v36 = vcombine.high %v130_v30, %v134_v31  ;;  %v4865_v37 = vcombine.high %v131_v32, %v135_v33  ;;  %v138_v38 = vld [vmem:[#allocation2 + $0x140] sm:$0xff]  ;;  %v139_v40 = vld [vmem:[#allocation2 + $0x148] sm:$0xff]  ;;  %v4862_v42 = vcombine.low %v130_v30, %v134_v31 }
  0x56   :  { %v142_v39 = vld [vmem:[#allocation2 + $0x160] sm:$0xff]  ;;  %v143_v41 = vld [vmem:[#allocation2 + $0x168] sm:$0xff]  ;;  %v4864_v43 = vcombine.low %v131_v32, %v135_v33 }
  0x57   :  { %v4871_v44 = vcombine.high %v138_v38, %v142_v39  ;;  %v4873_v45 = vcombine.high %v139_v40, %v143_v41  ;;  %v146_v46 = vld [vmem:[#allocation2 + $0x180] sm:$0xff]  ;;  %v147_v48 = vld [vmem:[#allocation2 + $0x188] sm:$0xff]  ;;  %v4870_v50 = vcombine.low %v138_v38, %v142_v39  ;;  %v4872_v51 = vcombine.low %v139_v40, %v143_v41 }
  0x58   :  { %1701 = vmatpush1.bf16.msra.mxu0 %v4846_v26  ;;  %1787 = vmatpush1.bf16.msra.mxu1 %v4848_v27  ;;  %v150_v47 = vld [vmem:[#allocation2 + $0x1a0] sm:$0xff]  ;;  %v151_v49 = vld [vmem:[#allocation2 + $0x1a8] sm:$0xff] }
  0x59   :  { %1702 = vmatprep.subr.bf16.mxu0 %v4855_v28  ;;  %1788 = vmatprep.subr.bf16.mxu1 %v4857_v29  ;;  %v4879_v52 = vcombine.high %v146_v46, %v150_v47  ;;  %v4881_v53 = vcombine.high %v147_v48, %v151_v49  ;;  %v154_v54 = vld [vmem:[#allocation2 + $0x1c0] sm:$0xff]  ;;  %v155_v57 = vld [vmem:[#allocation2 + $0x1c8] sm:$0xff]  ;;  %v4878_v59 = vcombine.low %v146_v46, %v150_v47 }
  0x5a   :  { %v158_v55 = vld [vmem:[#allocation2 + $0x1e0] sm:$0xff]  ;;  %v159_v58 = vld [vmem:[#allocation2 + $0x1e8] sm:$0xff]  ;;  %v4880_v60 = vcombine.low %v147_v48, %v151_v49 }
  0x5b   :  { %v6301_v56 = vld [vmem:[%s6434_s0 + $0x4] ss:$16 sps:$4 sm:$0xff]   ;;  %v4887_v61 = vcombine.high %v154_v54, %v158_v55  ;;  %v4889_v62 = vcombine.high %v155_v57, %v159_v58  ;;  %v163_v1 = vld [vmem:[#allocation2 + $0x208] sm:$0xff]  ;;  %v4886_v3 = vcombine.low %v154_v54, %v158_v55  ;;  %v4888_v4 = vcombine.low %v155_v57, %v159_v58 }
  0x5c   :  { %1703 = vmatpush1.bf16.msra.mxu0 %v4854_v34  ;;  %1789 = vmatpush1.bf16.msra.mxu1 %v4856_v35  ;;  %v162_v63 = vld [vmem:[#allocation2 + $0x200] sm:$0xff]  ;;  %v167_v2 = vld [vmem:[#allocation2 + $0x228] sm:$0xff] }
  0x5d   :  { %1704 = vmatprep.subr.bf16.mxu0 %v4863_v36  ;;  %1790 = vmatprep.subr.bf16.mxu1 %v4865_v37  ;;  %v166_v0 = vld [vmem:[#allocation2 + $0x220] sm:$0xff]  ;;  %v4897_v6 = vcombine.high %v163_v1, %v167_v2  ;;  %v171_v9 = vld [vmem:[#allocation2 + $0x248] sm:$0xff]  ;;  %v4896_v12 = vcombine.low %v163_v1, %v167_v2 }
  0x5e   :  { %1728 = vmatprep.mubr.bf16.mxu0 %v6301_v56  ;;  %1814 = vmatprep.mubr.bf16.mxu1 %v6301_v56  ;;  %v4895_v5 = vcombine.high %v162_v63, %v166_v0  ;;  %v170_v7 = vld [vmem:[#allocation2 + $0x240] sm:$0xff]  ;;  %v175_v10 = vld [vmem:[#allocation2 + $0x268] sm:$0xff]  ;;  %v4894_v11 = vcombine.low %v162_v63, %v166_v0 }
  0x5f   :  { %v174_v8 = vld [vmem:[#allocation2 + $0x260] sm:$0xff]  ;;  %v4905_v14 = vcombine.high %v171_v9, %v175_v10  ;;  %v179_v17 = vld [vmem:[#allocation2 + $0x288] sm:$0xff]  ;;  %v4904_v20 = vcombine.low %v171_v9, %v175_v10 }
  0x60   :  { %1705 = vmatpush1.bf16.msra.mxu0 %v4862_v42  ;;  %1791 = vmatpush1.bf16.msra.mxu1 %v4864_v43  ;;  %v4903_v13 = vcombine.high %v170_v7, %v174_v8  ;;  %v178_v15 = vld [vmem:[#allocation2 + $0x280] sm:$0xff]  ;;  %v183_v18 = vld [vmem:[#allocation2 + $0x2a8] sm:$0xff]  ;;  %v4902_v19 = vcombine.low %v170_v7, %v174_v8 }
  0x61   :  { %1706 = vmatprep.subr.bf16.mxu0 %v4871_v44  ;;  %1792 = vmatprep.subr.bf16.mxu1 %v4873_v45  ;;  %v182_v16 = vld [vmem:[#allocation2 + $0x2a0] sm:$0xff]  ;;  %v4913_v22 = vcombine.high %v179_v17, %v183_v18  ;;  %v187_v25 = vld [vmem:[#allocation2 + $0x2c8] sm:$0xff]  ;;  %v4912_v28 = vcombine.low %v179_v17, %v183_v18 }
  0x62   :  { %v4911_v21 = vcombine.high %v178_v15, %v182_v16  ;;  %v186_v23 = vld [vmem:[#allocation2 + $0x2c0] sm:$0xff]  ;;  %v191_v26 = vld [vmem:[#allocation2 + $0x2e8] sm:$0xff]  ;;  %v4910_v27 = vcombine.low %v178_v15, %v182_v16 }
  0x63   :  { %v190_v24 = vld [vmem:[#allocation2 + $0x2e0] sm:$0xff]  ;;  %v4921_v30 = vcombine.high %v187_v25, %v191_v26  ;;  %v195_v33 = vld [vmem:[#allocation2 + $0x308] sm:$0xff]  ;;  %v4920_v36 = vcombine.low %v187_v25, %v191_v26 }
  0x64   :  { %1707 = vmatpush1.bf16.msra.mxu0 %v4870_v50  ;;  %1793 = vmatpush1.bf16.msra.mxu1 %v4872_v51  ;;  %v4919_v29 = vcombine.high %v186_v23, %v190_v24  ;;  %v194_v31 = vld [vmem:[#allocation2 + $0x300] sm:$0xff]  ;;  %v199_v34 = vld [vmem:[#allocation2 + $0x328] sm:$0xff]  ;;  %v4918_v35 = vcombine.low %v186_v23, %v190_v24 }
  0x65   :  { %1708 = vmatprep.subr.bf16.mxu0 %v4879_v52  ;;  %1794 = vmatprep.subr.bf16.mxu1 %v4881_v53  ;;  %v198_v32 = vld [vmem:[#allocation2 + $0x320] sm:$0xff]  ;;  %v4929_v38 = vcombine.high %v195_v33, %v199_v34  ;;  %v203_v41 = vld [vmem:[#allocation2 + $0x348] sm:$0xff]  ;;  %v4928_v44 = vcombine.low %v195_v33, %v199_v34 }
  0x66   :  { %v4927_v37 = vcombine.high %v194_v31, %v198_v32  ;;  %v202_v39 = vld [vmem:[#allocation2 + $0x340] sm:$0xff]  ;;  %v207_v42 = vld [vmem:[#allocation2 + $0x368] sm:$0xff]  ;;  %v4926_v43 = vcombine.low %v194_v31, %v198_v32 }
  0x67   :  { %v206_v40 = vld [vmem:[#allocation2 + $0x360] sm:$0xff]  ;;  %v4937_v46 = vcombine.high %v203_v41, %v207_v42  ;;  %v211_v49 = vld [vmem:[#allocation2 + $0x388] sm:$0xff]  ;;  %v4936_v52 = vcombine.low %v203_v41, %v207_v42 }
  0x68   :  { %1709 = vmatpush1.bf16.msra.mxu0 %v4878_v59  ;;  %1795 = vmatpush1.bf16.msra.mxu1 %v4880_v60  ;;  %v4935_v45 = vcombine.high %v202_v39, %v206_v40  ;;  %v210_v47 = vld [vmem:[#allocation2 + $0x380] sm:$0xff]  ;;  %v215_v50 = vld [vmem:[#allocation2 + $0x3a8] sm:$0xff]  ;;  %v4934_v51 = vcombine.low %v202_v39, %v206_v40 }
  0x69   :  { %1710 = vmatprep.subr.bf16.mxu0 %v4887_v61  ;;  %1796 = vmatprep.subr.bf16.mxu1 %v4889_v62  ;;  %v214_v48 = vld [vmem:[#allocation2 + $0x3a0] sm:$0xff]  ;;  %v4945_v54 = vcombine.high %v211_v49, %v215_v50  ;;  %v219_v58 = vld [vmem:[#allocation2 + $0x3c8] sm:$0xff]  ;;  %v4944_v61 = vcombine.low %v211_v49, %v215_v50 }
  0x6a   :  { %v4943_v53 = vcombine.high %v210_v47, %v214_v48  ;;  %v218_v55 = vld [vmem:[#allocation2 + $0x3c0] sm:$0xff]  ;;  %v223_v59 = vld [vmem:[#allocation2 + $0x3e8] sm:$0xff]  ;;  %v4942_v60 = vcombine.low %v210_v47, %v214_v48 }
  0x6b   :  { %v222_v57 = vld [vmem:[#allocation2 + $0x3e0] sm:$0xff]  ;;  %v4953_v63 = vcombine.high %v219_v58, %v223_v59  ;;  %v227_v2 = vld [vmem:[#allocation2 + $0x408] sm:$0xff] }
  0x6c   :  { %1711 = vmatpush1.bf16.msra.mxu0 %v4886_v3  ;;  %1797 = vmatpush1.bf16.msra.mxu1 %v4888_v4  ;;  %v4951_v62 = vcombine.high %v218_v55, %v222_v57  ;;  %v226_v0 = vld [vmem:[#allocation2 + $0x400] sm:$0xff]  ;;  %v231_v3 = vld [vmem:[#allocation2 + $0x428] sm:$0xff]  ;;  %v4950_v4 = vcombine.low %v218_v55, %v222_v57 }
  0x6d   :  { %1712 = vmatprep.subr.bf16.mxu0 %v4895_v5  ;;  %1798 = vmatprep.subr.bf16.mxu1 %v4897_v6  ;;  %v230_v1 = vld [vmem:[#allocation2 + $0x420] sm:$0xff]  ;;  %v4952_v5 = vcombine.low %v219_v58, %v223_v59  ;;  %v4961_v7 = vcombine.high %v227_v2, %v231_v3 }
  0x6e   :  { %v4959_v6 = vcombine.high %v226_v0, %v230_v1  ;;  %v234_v8 = vld [vmem:[#allocation2 + $0x440] sm:$0xff] }
  0x6f   :  { %v238_v9 = vld [vmem:[#allocation2 + $0x460] sm:$0xff] }
  0x70   :  { %1713 = vmatpush1.bf16.msra.mxu0 %v4894_v11  ;;  %1799 = vmatpush1.bf16.msra.mxu1 %v4896_v12  ;;  %v5571_v10 = vld [vmem:[%s6434_s0] ss:$16 sps:$4 sm:$0xff]   ;;  %v235_v11 = vld [vmem:[#allocation2 + $0x448] sm:$0xff]  ;;  %v4967_v15 = vcombine.high %v234_v8, %v238_v9 }
  0x71   :  { %1714 = vmatprep.subr.bf16.mxu0 %v4903_v13  ;;  %1800 = vmatprep.subr.bf16.mxu1 %v4905_v14  ;;  %v239_v12 = vld [vmem:[#allocation2 + $0x468] sm:$0xff]  ;;  %v4958_v13 = vcombine.low %v226_v0, %v230_v1  ;;  %v4960_v14 = vcombine.low %v227_v2, %v231_v3  ;;  %v242_v17 = vld [vmem:[#allocation2 + $0x480] sm:$0xff] }
  0x72   :  { %v4969_v16 = vcombine.high %v235_v11, %v239_v12  ;;  %v246_v18 = vld [vmem:[#allocation2 + $0x4a0] sm:$0xff]  ;;  %v4968_v23 = vcombine.low %v235_v11, %v239_v12  ;;  %v299_v12 = vld [vmem:[#allocation2 + $0x648] sm:$0xff] }
  0x73   :  { %v4975_v24 = vcombine.high %v242_v17, %v246_v18  ;;  %v250_v25 = vld [vmem:[#allocation2 + $0x4c0] sm:$0xff] }
  0x74   :  { %1715 = vmatpush1.bf16.msra.mxu0 %v4902_v19  ;;  %1801 = vmatpush1.bf16.msra.mxu1 %v4904_v20  ;;  %v5572_v19 = vld [vmem:[%s6434_s0 + $0xc] ss:$16 sps:$4 sm:$0xff]   ;;  %v254_v26 = vld [vmem:[#allocation2 + $0x4e0] sm:$0xff] }
  0x75   :  { %1716 = vmatprep.subr.bf16.mxu0 %v4911_v21  ;;  %1802 = vmatprep.subr.bf16.mxu1 %v4913_v22  ;;  %v243_v20 = vld [vmem:[#allocation2 + $0x488] sm:$0xff]  ;;  %v4966_v22 = vcombine.low %v234_v8, %v238_v9  ;;  %v4983_v32 = vcombine.high %v250_v25, %v254_v26  ;;  %v258_v33 = vld [vmem:[#allocation2 + $0x500] sm:$0xff] }
  0x76   :  { %v247_v21 = vld [vmem:[#allocation2 + $0x4a8] sm:$0xff]  ;;  %v262_v34 = vld [vmem:[#allocation2 + $0x520] sm:$0xff] }
  0x77   :  { %v4976_v31 = vcombine.low %v243_v20, %v247_v21  ;;  %v4991_v40 = vcombine.high %v258_v33, %v262_v34  ;;  %v266_v41 = vld [vmem:[#allocation2 + $0x540] sm:$0xff] }
  0x78   :  { %1717 = vmatpush1.bf16.msra.mxu0 %v4910_v27  ;;  %1803 = vmatpush1.bf16.msra.mxu1 %v4912_v28  ;;  %v251_v27 = vld [vmem:[#allocation2 + $0x4c8] sm:$0xff]  ;;  %v4977_v28 = vcombine.high %v243_v20, %v247_v21  ;;  %v270_v42 = vld [vmem:[#allocation2 + $0x560] sm:$0xff] }
  0x79   :  { %1718 = vmatprep.subr.bf16.mxu0 %v4919_v29  ;;  %1804 = vmatprep.subr.bf16.mxu1 %v4921_v30  ;;  %v255_v29 = vld [vmem:[#allocation2 + $0x4e8] sm:$0xff]  ;;  %v4974_v30 = vcombine.low %v242_v17, %v246_v18  ;;  %v4999_v48 = vcombine.high %v266_v41, %v270_v42  ;;  %v274_v49 = vld [vmem:[#allocation2 + $0x580] sm:$0xff] }
  0x7a   :  { %v4984_v39 = vcombine.low %v251_v27, %v255_v29  ;;  %v278_v50 = vld [vmem:[#allocation2 + $0x5a0] sm:$0xff]  ;;  %v307_v20 = vld [vmem:[#allocation2 + $0x688] sm:$0xff] }
  0x7b   :  { %v5007_v57 = vcombine.high %v274_v49, %v278_v50  ;;  %v282_v58 = vld [vmem:[#allocation2 + $0x5c0] sm:$0xff] }
  0x7c   :  { %1719 = vmatpush1.bf16.msra.mxu0 %v4918_v35  ;;  %1805 = vmatpush1.bf16.msra.mxu1 %v4920_v36  ;;  %v259_v35 = vld [vmem:[#allocation2 + $0x508] sm:$0xff]  ;;  %v4985_v36 = vcombine.high %v251_v27, %v255_v29  ;;  %v286_v59 = vld [vmem:[#allocation2 + $0x5e0] sm:$0xff] }
  0x7d   :  { %1720 = vmatprep.subr.bf16.mxu0 %v4927_v37  ;;  %1806 = vmatprep.subr.bf16.mxu1 %v4929_v38  ;;  %v263_v37 = vld [vmem:[#allocation2 + $0x528] sm:$0xff]  ;;  %v4982_v38 = vcombine.low %v250_v25, %v254_v26  ;;  %v5015_v1 = vcombine.high %v282_v58, %v286_v59  ;;  %v290_v2 = vld [vmem:[#allocation2 + $0x600] sm:$0xff] }
  0x7e   :  { %v4992_v47 = vcombine.low %v259_v35, %v263_v37  ;;  %v294_v3 = vld [vmem:[#allocation2 + $0x620] sm:$0xff] }
  0x7f   :  { %v5023_v9 = vcombine.high %v290_v2, %v294_v3  ;;  %v302_v11 = vld [vmem:[#allocation2 + $0x660] sm:$0xff] }
  0x80   :  { %1721 = vmatpush1.bf16.msra.mxu0 %v4926_v43  ;;  %1807 = vmatpush1.bf16.msra.mxu1 %v4928_v44  ;;  %v267_v43 = vld [vmem:[#allocation2 + $0x548] sm:$0xff]  ;;  %v4993_v44 = vcombine.high %v259_v35, %v263_v37  ;;  %v306_v18 = vld [vmem:[#allocation2 + $0x680] sm:$0xff] }
  0x81   :  { %1722 = vmatprep.subr.bf16.mxu0 %v4935_v45  ;;  %1808 = vmatprep.subr.bf16.mxu1 %v4937_v46  ;;  %v271_v45 = vld [vmem:[#allocation2 + $0x568] sm:$0xff]  ;;  %v4990_v46 = vcombine.low %v258_v33, %v262_v34  ;;  %v314_v26 = vld [vmem:[#allocation2 + $0x6c0] sm:$0xff] }
  0x82   :  { %v5000_v55 = vcombine.low %v267_v43, %v271_v45  ;;  %v318_v27 = vld [vmem:[#allocation2 + $0x6e0] sm:$0xff] }
  0x83   :  { %v5047_v33 = vcombine.high %v314_v26, %v318_v27  ;;  %v322_v34 = vld [vmem:[#allocation2 + $0x700] sm:$0xff] }
  0x84   :  { %1723 = vmatpush1.bf16.msra.mxu0 %v4934_v51  ;;  %1809 = vmatpush1.bf16.msra.mxu1 %v4936_v52  ;;  %v275_v51 = vld [vmem:[#allocation2 + $0x588] sm:$0xff]  ;;  %v5001_v52 = vcombine.high %v267_v43, %v271_v45  ;;  %v326_v35 = vld [vmem:[#allocation2 + $0x720] sm:$0xff] }
  0x85   :  { %1724 = vmatprep.subr.bf16.mxu0 %v4943_v53  ;;  %1810 = vmatprep.subr.bf16.mxu1 %v4945_v54  ;;  %v279_v53 = vld [vmem:[#allocation2 + $0x5a8] sm:$0xff]  ;;  %v4998_v54 = vcombine.low %v266_v41, %v270_v42  ;;  %v5055_v41 = vcombine.high %v322_v34, %v326_v35  ;;  %v330_v42 = vld [vmem:[#allocation2 + $0x740] sm:$0xff] }
  0x86   :  { %v5008_v0 = vcombine.low %v275_v51, %v279_v53  ;;  %v334_v43 = vld [vmem:[#allocation2 + $0x760] sm:$0xff] }
  0x88   :  { %1725 = vmatpush1.bf16.msra.mxu0 %v4942_v60  ;;  %1811 = vmatpush1.bf16.msra.mxu1 %v4944_v61  ;;  %v283_v60 = vld [vmem:[#allocation2 + $0x5c8] sm:$0xff]  ;;  %v5009_v61 = vcombine.high %v275_v51, %v279_v53  ;;  %v342_v51 = vld [vmem:[#allocation2 + $0x7a0] sm:$0xff] }
  0x89   :  { %1726 = vmatprep.subr.bf16.mxu0 %v4951_v62  ;;  %1812 = vmatprep.subr.bf16.mxu1 %v4953_v63  ;;  %v287_v62 = vld [vmem:[#allocation2 + $0x5e8] sm:$0xff]  ;;  %v5006_v63 = vcombine.low %v274_v49, %v278_v50  ;;  %v5063_v49 = vcombine.high %v330_v42, %v334_v43  ;;  %v338_v50 = vld [vmem:[#allocation2 + $0x780] sm:$0xff] }
  0x8a   :  { %v5016_v8 = vcombine.low %v283_v60, %v287_v62 }
  0x8c   :  { %1727 = vmatpush1.bf16.msra.mxu0 %v4950_v4  ;;  %1813 = vmatpush1.bf16.msra.mxu1 %v4952_v5  ;;  %v291_v4 = vld [vmem:[#allocation2 + $0x608] sm:$0xff]  ;;  %v5017_v5 = vcombine.high %v283_v60, %v287_v62  ;;  %v350_v60 = vld [vmem:[#allocation2 + $0x7e0] sm:$0xff] }
  0x8d   :  { %1739 = vmatprep.subr.bf16.mxu0 %v4959_v6  ;;  %1825 = vmatprep.subr.bf16.mxu1 %v4961_v7  ;;  %v295_v6 = vld [vmem:[#allocation2 + $0x628] sm:$0xff]  ;;  %v5014_v7 = vcombine.low %v282_v58, %v286_v59  ;;  %v5071_v58 = vcombine.high %v338_v50, %v342_v51  ;;  %v346_v59 = vld [vmem:[#allocation2 + $0x7c0] sm:$0xff] }
  0x8f   :  { %1729 = vmatmul.mubr.bf16.vlgmr.msra.gmra.mrb[0].mxu0 %v5571_v10  ;;  %1815 = vmatmul.mubr.bf16.vlgmr.msra.gmra.mrb[0].mxu1 %v5571_v10  ;;  %v298_v10 = vld [vmem:[#allocation2 + $0x640] sm:$0xff] }
  0x90   :  { %1740 = vmatpush1.bf16.msra.mxu0 %v4958_v13  ;;  %1826 = vmatpush1.bf16.msra.mxu1 %v4960_v14  ;;  %v5025_v13 = vcombine.high %v291_v4, %v295_v6  ;;  %v303_v14 = vld [vmem:[#allocation2 + $0x668] sm:$0xff]  ;;  %v5031_v17 = vcombine.high %v298_v10, %v302_v11 }
  0x91   :  { %1741 = vmatprep.subr.bf16.mxu0 %v4967_v15  ;;  %1827 = vmatprep.subr.bf16.mxu1 %v4969_v16  ;;  %v5022_v15 = vcombine.low %v290_v2, %v294_v3  ;;  %v5024_v16 = vcombine.low %v291_v4, %v295_v6  ;;  %v5033_v21 = vcombine.high %v299_v12, %v303_v14  ;;  %v100_v3 = vld [vmem:[#allocation2 + $0x10] sm:$0xff] }
  0x92   :  { %1771 = vmatprep.mubr.bf16.mxu0 %v5572_v19  ;;  %1857 = vmatprep.mubr.bf16.mxu1 %v5572_v19  ;;  %v310_v19 = vld [vmem:[#allocation2 + $0x6a0] sm:$0xff]  ;;  %v5079_v2 = vcombine.high %v346_v59, %v350_v60  ;;  %v104_v4 = vld [vmem:[#allocation2 + $0x30] sm:$0xff] }
  0x93   :  { %v5039_v25 = vcombine.high %v306_v18, %v310_v19 }
  0x94   :  { %1742 = vmatpush1.bf16.msra.mxu0 %v4966_v22  ;;  %1828 = vmatpush1.bf16.msra.mxu1 %v4968_v23  ;;  %v311_v22 = vld [vmem:[#allocation2 + $0x6a8] sm:$0xff]  ;;  %v5030_v23 = vcombine.low %v298_v10, %v302_v11  ;;  %v4835_v11 = vcombine.high %v100_v3, %v104_v4 }
  0x95   :  { %1743 = vmatprep.subr.bf16.mxu0 %v4975_v24  ;;  %1829 = vmatprep.subr.bf16.mxu1 %v4977_v28  ;;  %v5032_v24 = vcombine.low %v299_v12, %v303_v14  ;;  %v315_v28 = vld [vmem:[#allocation2 + $0x6c8] sm:$0xff]  ;;  %v5041_v29 = vcombine.high %v307_v20, %v311_v22  ;;  %v108_v12 = vld [vmem:[#allocation2 + $0x50] sm:$0xff]  ;;  %v109_v14 = vld [vmem:[#allocation2 + $0x58] sm:$0xff] }
  0x96   :  { %v5574_v10 = vld [vmem:[%s6434_s0 + $0x8] ss:$16 sps:$4 sm:$0xff]  }
  0x98   :  { %1744 = vmatpush1.bf16.msra.mxu0 %v4974_v30  ;;  %1830 = vmatpush1.bf16.msra.mxu1 %v4976_v31  ;;  %v319_v30 = vld [vmem:[#allocation2 + $0x6e8] sm:$0xff]  ;;  %v5038_v31 = vcombine.low %v306_v18, %v310_v19  ;;  %v116_v18 = vld [vmem:[#allocation2 + $0x90] sm:$0xff] }
  0x99   :  { %1745 = vmatprep.subr.bf16.mxu0 %v4983_v32  ;;  %1831 = vmatprep.subr.bf16.mxu1 %v4985_v36  ;;  %v5040_v32 = vcombine.low %v307_v20, %v311_v22  ;;  %v323_v36 = vld [vmem:[#allocation2 + $0x708] sm:$0xff]  ;;  %v5049_v37 = vcombine.high %v315_v28, %v319_v30  ;;  %v120_v19 = vld [vmem:[#allocation2 + $0xb0] sm:$0xff]  ;;  %v117_v22 = vld [vmem:[#allocation2 + $0x98] sm:$0xff] }
  0x9c   :  { %1746 = vmatpush1.bf16.msra.mxu0 %v4982_v38  ;;  %1832 = vmatpush1.bf16.msra.mxu1 %v4984_v39  ;;  %v327_v38 = vld [vmem:[#allocation2 + $0x728] sm:$0xff]  ;;  %v5046_v39 = vcombine.low %v314_v26, %v318_v27  ;;  %v4851_v27 = vcombine.high %v116_v18, %v120_v19 }
  0x9d   :  { %1747 = vmatprep.subr.bf16.mxu0 %v4991_v40  ;;  %1833 = vmatprep.subr.bf16.mxu1 %v4993_v44  ;;  %v5048_v40 = vcombine.low %v315_v28, %v319_v30  ;;  %v331_v44 = vld [vmem:[#allocation2 + $0x748] sm:$0xff]  ;;  %v5057_v45 = vcombine.high %v323_v36, %v327_v38  ;;  %v124_v28 = vld [vmem:[#allocation2 + $0xd0] sm:$0xff] }
  0xa0   :  { %1748 = vmatpush1.bf16.msra.mxu0 %v4990_v46  ;;  %1834 = vmatpush1.bf16.msra.mxu1 %v4992_v47  ;;  %v335_v46 = vld [vmem:[#allocation2 + $0x768] sm:$0xff]  ;;  %v5054_v47 = vcombine.low %v322_v34, %v326_v35 }
  0xa1   :  { %1749 = vmatprep.subr.bf16.mxu0 %v4999_v48  ;;  %1835 = vmatprep.subr.bf16.mxu1 %v5001_v52  ;;  %v5056_v48 = vcombine.low %v323_v36, %v327_v38  ;;  %v339_v52 = vld [vmem:[#allocation2 + $0x788] sm:$0xff]  ;;  %v5065_v53 = vcombine.high %v331_v44, %v335_v46  ;;  %v132_v36 = vld [vmem:[#allocation2 + $0x110] sm:$0xff]  ;;  %v133_v38 = vld [vmem:[#allocation2 + $0x118] sm:$0xff] }
  0xa4   :  { %1750 = vmatpush1.bf16.msra.mxu0 %v4998_v54  ;;  %1836 = vmatpush1.bf16.msra.mxu1 %v5000_v55  ;;  %v343_v54 = vld [vmem:[#allocation2 + $0x7a8] sm:$0xff]  ;;  %v5062_v55 = vcombine.low %v330_v42, %v334_v43 }
  0xa5   :  { %1751 = vmatprep.subr.bf16.mxu0 %v5007_v57  ;;  %1837 = vmatprep.subr.bf16.mxu1 %v5009_v61  ;;  %v5064_v57 = vcombine.low %v331_v44, %v335_v46  ;;  %v347_v61 = vld [vmem:[#allocation2 + $0x7c8] sm:$0xff]  ;;  %v5073_v62 = vcombine.high %v339_v52, %v343_v54  ;;  %v140_v44 = vld [vmem:[#allocation2 + $0x150] sm:$0xff] }
  0xa8   :  { %1752 = vmatpush1.bf16.msra.mxu0 %v5006_v63  ;;  %1838 = vmatpush1.bf16.msra.mxu1 %v5008_v0  ;;  %v351_v63 = vld [vmem:[#allocation2 + $0x7e8] sm:$0xff]  ;;  %v5070_v0 = vcombine.low %v338_v50, %v342_v51  ;;  %v148_v51 = vld [vmem:[#allocation2 + $0x190] sm:$0xff] }
  0xa9   :  { %1753 = vmatprep.subr.bf16.mxu0 %v5015_v1  ;;  %1839 = vmatprep.subr.bf16.mxu1 %v5017_v5  ;;  %v5072_v1 = vcombine.low %v339_v52, %v343_v54  ;;  %v101_v5 = vld [vmem:[#allocation2 + $0x18] sm:$0xff]  ;;  %v5081_v6 = vcombine.high %v347_v61, %v351_v63  ;;  %v152_v52 = vld [vmem:[#allocation2 + $0x1b0] sm:$0xff] }
  0xac   :  { %1754 = vmatpush1.bf16.msra.mxu0 %v5014_v7  ;;  %1840 = vmatpush1.bf16.msra.mxu1 %v5016_v8  ;;  %v105_v7 = vld [vmem:[#allocation2 + $0x38] sm:$0xff]  ;;  %v5078_v8 = vcombine.low %v346_v59, %v350_v60  ;;  %v4883_v59 = vcombine.high %v148_v51, %v152_v52  ;;  %v156_v60 = vld [vmem:[#allocation2 + $0x1d0] sm:$0xff] }
  0xad   :  { %1755 = vmatprep.subr.bf16.mxu0 %v5023_v9  ;;  %1841 = vmatprep.subr.bf16.mxu1 %v5025_v13  ;;  %v5080_v9 = vcombine.low %v347_v61, %v351_v63  ;;  %v112_v13 = vld [vmem:[#allocation2 + $0x70] sm:$0xff]  ;;  %v4836_v20 = vcombine.low %v101_v5, %v105_v7 }
  0xae   :  { %v160_v61 = vld [vmem:[#allocation2 + $0x1f0] sm:$0xff] }
  0xb0   :  { %1756 = vmatpush1.bf16.msra.mxu0 %v5022_v15  ;;  %1842 = vmatpush1.bf16.msra.mxu1 %v5024_v16  ;;  %v4837_v15 = vcombine.high %v101_v5, %v105_v7  ;;  %v113_v16 = vld [vmem:[#allocation2 + $0x78] sm:$0xff]  ;;  %v168_v5 = vld [vmem:[#allocation2 + $0x230] sm:$0xff] }
  0xb1   :  { %1757 = vmatprep.subr.bf16.mxu0 %v5031_v17  ;;  %1843 = vmatprep.subr.bf16.mxu1 %v5033_v21  ;;  %v4834_v17 = vcombine.low %v100_v3, %v104_v4  ;;  %v4843_v21 = vcombine.high %v108_v12, %v112_v13  ;;  %v4844_v26 = vcombine.low %v109_v14, %v113_v16  ;;  %v164_v4 = vld [vmem:[#allocation2 + $0x210] sm:$0xff] }
  0xb2   :  { %v4891_v3 = vcombine.high %v156_v60, %v160_v61 }
  0xb4   :  { %1758 = vmatpush1.bf16.msra.mxu0 %v5030_v23  ;;  %1844 = vmatpush1.bf16.msra.mxu1 %v5032_v24  ;;  %v121_v23 = vld [vmem:[#allocation2 + $0xb8] sm:$0xff]  ;;  %v4845_v24 = vcombine.high %v109_v14, %v113_v16 }
  0xb5   :  { %1759 = vmatprep.subr.bf16.mxu0 %v5039_v25  ;;  %1845 = vmatprep.subr.bf16.mxu1 %v5041_v29  ;;  %v4842_v25 = vcombine.low %v108_v12, %v112_v13  ;;  %v128_v29 = vld [vmem:[#allocation2 + $0xf0] sm:$0xff]  ;;  %v4853_v30 = vcombine.high %v117_v22, %v121_v23  ;;  %v4852_v34 = vcombine.low %v117_v22, %v121_v23  ;;  %v173_v14 = vld [vmem:[#allocation2 + $0x258] sm:$0xff] }
  0xb6   :  { %v4859_v35 = vcombine.high %v124_v28, %v128_v29  ;;  %v172_v12 = vld [vmem:[#allocation2 + $0x250] sm:$0xff]  ;;  %v177_v16 = vld [vmem:[#allocation2 + $0x278] sm:$0xff] }
  0xb7   :  { %v176_v13 = vld [vmem:[#allocation2 + $0x270] sm:$0xff]  ;;  %v181_v22 = vld [vmem:[#allocation2 + $0x298] sm:$0xff]  ;;  %v4909_v23 = vcombine.high %v173_v14, %v177_v16 }
  0xb8   :  { %1760 = vmatpush1.bf16.msra.mxu0 %v5038_v31  ;;  %1846 = vmatpush1.bf16.msra.mxu1 %v5040_v32  ;;  %v125_v31 = vld [vmem:[#allocation2 + $0xd8] sm:$0xff] }
  0xb9   :  { %1761 = vmatprep.subr.bf16.mxu0 %v5047_v33  ;;  %1847 = vmatprep.subr.bf16.mxu1 %v5049_v37  ;;  %v129_v32 = vld [vmem:[#allocation2 + $0xf8] sm:$0xff]  ;;  %v4850_v33 = vcombine.low %v116_v18, %v120_v19  ;;  %v136_v37 = vld [vmem:[#allocation2 + $0x130] sm:$0xff]  ;;  %v4907_v19 = vcombine.high %v172_v12, %v176_v13 }
  0xba   :  { %v4860_v42 = vcombine.low %v125_v31, %v129_v32  ;;  %v4867_v43 = vcombine.high %v132_v36, %v136_v37 }
  0xbc   :  { %1762 = vmatpush1.bf16.msra.mxu0 %v5046_v39  ;;  %1848 = vmatpush1.bf16.msra.mxu1 %v5048_v40  ;;  %v4861_v39 = vcombine.high %v125_v31, %v129_v32  ;;  %v137_v40 = vld [vmem:[#allocation2 + $0x138] sm:$0xff] }
  0xbd   :  { %1763 = vmatprep.subr.bf16.mxu0 %v5055_v41  ;;  %1849 = vmatprep.subr.bf16.mxu1 %v5057_v45  ;;  %v4858_v41 = vcombine.low %v124_v28, %v128_v29  ;;  %v141_v45 = vld [vmem:[#allocation2 + $0x158] sm:$0xff]  ;;  %v4869_v46 = vcombine.high %v133_v38, %v137_v40  ;;  %v188_v28 = vld [vmem:[#allocation2 + $0x2d0] sm:$0xff] }
  0xbe   :  { %v192_v29 = vld [vmem:[#allocation2 + $0x2f0] sm:$0xff]  ;;  %v193_v32 = vld [vmem:[#allocation2 + $0x2f8] sm:$0xff] }
  0xc0   :  { %1764 = vmatpush1.bf16.msra.mxu0 %v5054_v47  ;;  %1850 = vmatpush1.bf16.msra.mxu1 %v5056_v48  ;;  %v145_v47 = vld [vmem:[#allocation2 + $0x178] sm:$0xff]  ;;  %v4866_v48 = vcombine.low %v132_v36, %v136_v37  ;;  %v196_v36 = vld [vmem:[#allocation2 + $0x310] sm:$0xff] }
  0xc1   :  { %1765 = vmatprep.subr.bf16.mxu0 %v5063_v49  ;;  %1851 = vmatprep.subr.bf16.mxu1 %v5065_v53  ;;  %v4868_v49 = vcombine.low %v133_v38, %v137_v40  ;;  %v149_v53 = vld [vmem:[#allocation2 + $0x198] sm:$0xff]  ;;  %v4877_v54 = vcombine.high %v141_v45, %v145_v47  ;;  %v200_v37 = vld [vmem:[#allocation2 + $0x330] sm:$0xff] }
  0xc2   :  { %v197_v38 = vld [vmem:[#allocation2 + $0x318] sm:$0xff] }
  0xc3   :  { %v201_v40 = vld [vmem:[#allocation2 + $0x338] sm:$0xff] }
  0xc4   :  { %1766 = vmatpush1.bf16.msra.mxu0 %v5062_v55  ;;  %1852 = vmatpush1.bf16.msra.mxu1 %v5064_v57  ;;  %v153_v55 = vld [vmem:[#allocation2 + $0x1b8] sm:$0xff] }
  0xc5   :  { %1767 = vmatprep.subr.bf16.mxu0 %v5071_v58  ;;  %1853 = vmatprep.subr.bf16.mxu1 %v5073_v62  ;;  %v4876_v58 = vcombine.low %v141_v45, %v145_v47  ;;  %v157_v62 = vld [vmem:[#allocation2 + $0x1d8] sm:$0xff]  ;;  %v4885_v63 = vcombine.high %v149_v53, %v153_v55 }
  0xc6   :  { %v205_v45 = vld [vmem:[#allocation2 + $0x358] sm:$0xff] }
  0xc7   :  { %v209_v47 = vld [vmem:[#allocation2 + $0x378] sm:$0xff] }
  0xc8   :  { %1768 = vmatpush1.bf16.msra.mxu0 %v5070_v0  ;;  %1854 = vmatpush1.bf16.msra.mxu1 %v5072_v1  ;;  %v161_v0 = vld [vmem:[#allocation2 + $0x1f8] sm:$0xff]  ;;  %v4882_v1 = vcombine.low %v148_v51, %v152_v52  ;;  %v212_v51 = vld [vmem:[#allocation2 + $0x390] sm:$0xff] }
  0xc9   :  { %1769 = vmatprep.subr.bf16.mxu0 %v5079_v2  ;;  %1855 = vmatprep.subr.bf16.mxu1 %v5081_v6  ;;  %v4884_v2 = vcombine.low %v149_v53, %v153_v55  ;;  %v165_v6 = vld [vmem:[#allocation2 + $0x218] sm:$0xff]  ;;  %v4893_v7 = vcombine.high %v157_v62, %v161_v0  ;;  %v216_v52 = vld [vmem:[#allocation2 + $0x3b0] sm:$0xff] }
  0xca   :  { %v213_v53 = vld [vmem:[#allocation2 + $0x398] sm:$0xff] }
  0xcb   :  { %v217_v55 = vld [vmem:[#allocation2 + $0x3b8] sm:$0xff] }
  0xcc   :  { %1770 = vmatpush1.bf16.msra.mxu0 %v5078_v8  ;;  %1856 = vmatpush1.bf16.msra.mxu1 %v5080_v9  ;;  %v169_v8 = vld [vmem:[#allocation2 + $0x238] sm:$0xff]  ;;  %v4890_v9 = vcombine.low %v156_v60, %v160_v61  ;;  %v220_v60 = vld [vmem:[#allocation2 + $0x3d0] sm:$0xff] }
  0xcd   :  { %1868 = vmatprep.subr.bf16.mxu0 %v4835_v11  ;;  %1954 = vmatprep.subr.bf16.mxu1 %v4837_v15  ;;  %v4899_v11 = vcombine.high %v164_v4, %v168_v5  ;;  %v4901_v15 = vcombine.high %v165_v6, %v169_v8  ;;  %v4900_v18 = vcombine.low %v165_v6, %v169_v8  ;;  %v224_v61 = vld [vmem:[#allocation2 + $0x3f0] sm:$0xff]  ;;  %v229_v6 = vld [vmem:[#allocation2 + $0x418] sm:$0xff] }
  0xcf   :  { %1772 = vmatmul.mubr.bf16.vlgmr.msra.gmra.mrb[0].mxu0 %v5574_v10  ;;  %1858 = vmatmul.mubr.bf16.vlgmr.msra.gmra.mrb[0].mxu1 %v5574_v10  ;;  %v4892_v10 = vcombine.low %v157_v62, %v161_v0  ;;  %v4949_v62 = vcombine.high %v213_v53, %v217_v55  ;;  %v225_v0 = vld [vmem:[#allocation2 + $0x3f8] sm:$0xff] }
  0xd0   :  { %1869 = vmatpush1.bf16.msra.mxu0 %v4834_v17  ;;  %1955 = vmatpush1.bf16.msra.mxu1 %v4836_v20  ;;  %v4898_v17 = vcombine.low %v164_v4, %v168_v5  ;;  %v180_v20 = vld [vmem:[#allocation2 + $0x290] sm:$0xff]  ;;  %v4948_v4 = vcombine.low %v213_v53, %v217_v55  ;;  %v4955_v5 = vcombine.high %v220_v60, %v224_v61  ;;  %v277_v55 = vld [vmem:[#allocation2 + $0x598] sm:$0xff] }
  0xd1   :  { %1870 = vmatprep.subr.bf16.mxu0 %v4843_v21  ;;  %1956 = vmatprep.subr.bf16.mxu1 %v4845_v24  ;;  %v184_v21 = vld [vmem:[#allocation2 + $0x2b0] sm:$0xff]  ;;  %v185_v24 = vld [vmem:[#allocation2 + $0x2b8] sm:$0xff] }
  0xd2   :  { %1900 = vmatprep.mubr.bf16.mxu0 %v6301_v56  ;;  %1986 = vmatprep.mubr.bf16.mxu1 %v6301_v56  ;;  %v144_v56 = vld [vmem:[#allocation2 + $0x170] sm:$0xff]  ;;  %v4917_v31 = vcombine.high %v181_v22, %v185_v24 }
  0xd3   :  { %v4875_v50 = vcombine.high %v140_v44, %v144_v56  ;;  %v4874_v57 = vcombine.low %v140_v44, %v144_v56  ;;  %v204_v44 = vld [vmem:[#allocation2 + $0x350] sm:$0xff] }
  0xd4   :  { %1871 = vmatpush1.bf16.msra.mxu0 %v4842_v25  ;;  %1957 = vmatpush1.bf16.msra.mxu1 %v4844_v26  ;;  %v4906_v25 = vcombine.low %v172_v12, %v176_v13  ;;  %v4908_v26 = vcombine.low %v173_v14, %v177_v16  ;;  %v208_v56 = vld [vmem:[#allocation2 + $0x370] sm:$0xff]  ;;  %v237_v14 = vld [vmem:[#allocation2 + $0x458] sm:$0xff] }
  0xd5   :  { %1872 = vmatprep.subr.bf16.mxu0 %v4851_v27  ;;  %1958 = vmatprep.subr.bf16.mxu1 %v4853_v30  ;;  %v4915_v27 = vcombine.high %v180_v20, %v184_v21  ;;  %v189_v30 = vld [vmem:[#allocation2 + $0x2d8] sm:$0xff] }
  0xd8   :  { %1873 = vmatpush1.bf16.msra.mxu0 %v4850_v33  ;;  %1959 = vmatpush1.bf16.msra.mxu1 %v4852_v34  ;;  %v4914_v33 = vcombine.low %v180_v20, %v184_v21  ;;  %v4916_v34 = vcombine.low %v181_v22, %v185_v24  ;;  %v245_v22 = vld [vmem:[#allocation2 + $0x498] sm:$0xff] }
  0xd9   :  { %1874 = vmatprep.subr.bf16.mxu0 %v4859_v35  ;;  %1960 = vmatprep.subr.bf16.mxu1 %v4861_v39  ;;  %v4923_v35 = vcombine.high %v188_v28, %v192_v29  ;;  %v4925_v39 = vcombine.high %v189_v30, %v193_v32 }
  0xdc   :  { %1875 = vmatpush1.bf16.msra.mxu0 %v4858_v41  ;;  %1961 = vmatpush1.bf16.msra.mxu1 %v4860_v42  ;;  %v4922_v41 = vcombine.low %v188_v28, %v192_v29  ;;  %v4924_v42 = vcombine.low %v189_v30, %v193_v32  ;;  %v256_v28 = vld [vmem:[#allocation2 + $0x4f0] sm:$0xff]  ;;  %v257_v32 = vld [vmem:[#allocation2 + $0x4f8] sm:$0xff] }
  0xdd   :  { %1876 = vmatprep.subr.bf16.mxu0 %v4867_v43  ;;  %1962 = vmatprep.subr.bf16.mxu1 %v4869_v46  ;;  %v4931_v43 = vcombine.high %v196_v36, %v200_v37  ;;  %v4933_v46 = vcombine.high %v197_v38, %v201_v40 }
  0xe0   :  { %1877 = vmatpush1.bf16.msra.mxu0 %v4866_v48  ;;  %1963 = vmatpush1.bf16.msra.mxu1 %v4868_v49  ;;  %v4930_v48 = vcombine.low %v196_v36, %v200_v37  ;;  %v4932_v49 = vcombine.low %v197_v38, %v201_v40  ;;  %v260_v36 = vld [vmem:[#allocation2 + $0x510] sm:$0xff]  ;;  %v261_v40 = vld [vmem:[#allocation2 + $0x518] sm:$0xff] }
  0xe1   :  { %1878 = vmatprep.subr.bf16.mxu0 %v4875_v50  ;;  %1964 = vmatprep.subr.bf16.mxu1 %v4877_v54  ;;  %v4939_v50 = vcombine.high %v204_v44, %v208_v56  ;;  %v4941_v54 = vcombine.high %v205_v45, %v209_v47  ;;  %v264_v37 = vld [vmem:[#allocation2 + $0x530] sm:$0xff] }
  0xe4   :  { %1879 = vmatpush1.bf16.msra.mxu0 %v4874_v57  ;;  %1965 = vmatpush1.bf16.msra.mxu1 %v4876_v58  ;;  %v4938_v57 = vcombine.low %v204_v44, %v208_v56  ;;  %v4940_v58 = vcombine.low %v205_v45, %v209_v47  ;;  %v268_v44 = vld [vmem:[#allocation2 + $0x550] sm:$0xff]  ;;  %v269_v47 = vld [vmem:[#allocation2 + $0x558] sm:$0xff] }
  0xe5   :  { %1880 = vmatprep.subr.bf16.mxu0 %v4883_v59  ;;  %1966 = vmatprep.subr.bf16.mxu1 %v4885_v63  ;;  %v4947_v59 = vcombine.high %v212_v51, %v216_v52  ;;  %v221_v63 = vld [vmem:[#allocation2 + $0x3d8] sm:$0xff]  ;;  %v272_v56 = vld [vmem:[#allocation2 + $0x570] sm:$0xff] }
  0xe6   :  { %v4957_v8 = vcombine.high %v221_v63, %v225_v0  ;;  %v4956_v12 = vcombine.low %v221_v63, %v225_v0  ;;  %v285_v0 = vld [vmem:[#allocation2 + $0x5d8] sm:$0xff] }
  0xe8   :  { %1881 = vmatpush1.bf16.msra.mxu0 %v4882_v1  ;;  %1967 = vmatpush1.bf16.msra.mxu1 %v4884_v2  ;;  %v4946_v1 = vcombine.low %v212_v51, %v216_v52  ;;  %v228_v2 = vld [vmem:[#allocation2 + $0x410] sm:$0xff] }
  0xe9   :  { %1882 = vmatprep.subr.bf16.mxu0 %v4891_v3  ;;  %1968 = vmatprep.subr.bf16.mxu1 %v4893_v7  ;;  %v232_v3 = vld [vmem:[#allocation2 + $0x430] sm:$0xff]  ;;  %v233_v7 = vld [vmem:[#allocation2 + $0x438] sm:$0xff] }
  0xea   :  { %v4963_v13 = vcombine.high %v228_v2, %v232_v3  ;;  %v4965_v16 = vcombine.high %v229_v6, %v233_v7  ;;  %v4964_v20 = vcombine.low %v229_v6, %v233_v7  ;;  %v276_v51 = vld [vmem:[#allocation2 + $0x590] sm:$0xff] }
  0xeb   :  { %v280_v52 = vld [vmem:[#allocation2 + $0x5b0] sm:$0xff] }
  0xec   :  { %1883 = vmatpush1.bf16.msra.mxu0 %v4890_v9  ;;  %1969 = vmatpush1.bf16.msra.mxu1 %v4892_v10  ;;  %v4954_v9 = vcombine.low %v220_v60, %v224_v61  ;;  %v236_v10 = vld [vmem:[#allocation2 + $0x450] sm:$0xff]  ;;  %v5011_v63 = vcombine.high %v276_v51, %v280_v52 }
  0xed   :  { %1884 = vmatprep.subr.bf16.mxu0 %v4899_v11  ;;  %1970 = vmatprep.subr.bf16.mxu1 %v4901_v15  ;;  %v240_v11 = vld [vmem:[#allocation2 + $0x470] sm:$0xff]  ;;  %v241_v15 = vld [vmem:[#allocation2 + $0x478] sm:$0xff] }
  0xee   :  { %v4971_v21 = vcombine.high %v236_v10, %v240_v11  ;;  %v4973_v24 = vcombine.high %v237_v14, %v241_v15  ;;  %v4972_v29 = vcombine.low %v237_v14, %v241_v15  ;;  %v284_v60 = vld [vmem:[#allocation2 + $0x5d0] sm:$0xff] }
  0xef   :  { %v288_v61 = vld [vmem:[#allocation2 + $0x5f0] sm:$0xff] }
  0xf0   :  { %1885 = vmatpush1.bf16.msra.mxu0 %v4898_v17  ;;  %1971 = vmatpush1.bf16.msra.mxu1 %v4900_v18  ;;  %v4962_v17 = vcombine.low %v228_v2, %v232_v3  ;;  %v244_v18 = vld [vmem:[#allocation2 + $0x490] sm:$0xff]  ;;  %v5010_v3 = vcombine.low %v276_v51, %v280_v52 }
  0xf1   :  { %1886 = vmatprep.subr.bf16.mxu0 %v4907_v19  ;;  %1972 = vmatprep.subr.bf16.mxu1 %v4909_v23  ;;  %v248_v19 = vld [vmem:[#allocation2 + $0x4b0] sm:$0xff]  ;;  %v249_v23 = vld [vmem:[#allocation2 + $0x4b8] sm:$0xff] }
  0xf2   :  { %v4979_v30 = vcombine.high %v244_v18, %v248_v19  ;;  %v4980_v38 = vcombine.low %v245_v22, %v249_v23  ;;  %v292_v7 = vld [vmem:[#allocation2 + $0x610] sm:$0xff] }
  0xf3   :  { %v300_v15 = vld [vmem:[#allocation2 + $0x650] sm:$0xff] }
  0xf4   :  { %1887 = vmatpush1.bf16.msra.mxu0 %v4906_v25  ;;  %1973 = vmatpush1.bf16.msra.mxu1 %v4908_v26  ;;  %v6079_v25 = vld [vmem:[%s6434_s0] ss:$16 sps:$4 sm:$0xff]   ;;  %v4970_v26 = vcombine.low %v236_v10, %v240_v11  ;;  %v297_v10 = vld [vmem:[#allocation2 + $0x638] sm:$0xff]  ;;  %v5018_v11 = vcombine.low %v284_v60, %v288_v61 }
  0xf5   :  { %1888 = vmatprep.subr.bf16.mxu0 %v4915_v27  ;;  %1974 = vmatprep.subr.bf16.mxu1 %v4917_v31  ;;  %v252_v27 = vld [vmem:[#allocation2 + $0x4d0] sm:$0xff]  ;;  %v253_v31 = vld [vmem:[#allocation2 + $0x4d8] sm:$0xff] }
  0xf6   :  { %v4988_v45 = vcombine.low %v253_v31, %v257_v32 }
  0xf8   :  { %1889 = vmatpush1.bf16.msra.mxu0 %v4914_v33  ;;  %1975 = vmatpush1.bf16.msra.mxu1 %v4916_v34  ;;  %v4981_v33 = vcombine.high %v245_v22, %v249_v23  ;;  %v6080_v34 = vld [vmem:[%s6434_s0 + $0xc] ss:$16 sps:$4 sm:$0xff]   ;;  %v308_v23 = vld [vmem:[#allocation2 + $0x690] sm:$0xff] }
  0xf9   :  { %1890 = vmatprep.subr.bf16.mxu0 %v4923_v35  ;;  %1976 = vmatprep.subr.bf16.mxu1 %v4925_v39  ;;  %v4978_v35 = vcombine.low %v244_v18, %v248_v19  ;;  %v4987_v39 = vcombine.high %v252_v27, %v256_v28  ;;  %v305_v18 = vld [vmem:[#allocation2 + $0x678] sm:$0xff] }
  0xfc   :  { %1891 = vmatpush1.bf16.msra.mxu0 %v4922_v41  ;;  %1977 = vmatpush1.bf16.msra.mxu1 %v4924_v42  ;;  %v265_v41 = vld [vmem:[#allocation2 + $0x538] sm:$0xff]  ;;  %v4989_v42 = vcombine.high %v253_v31, %v257_v32 }
  0xfd   :  { %1892 = vmatprep.subr.bf16.mxu0 %v4931_v43  ;;  %1978 = vmatprep.subr.bf16.mxu1 %v4933_v46  ;;  %v4986_v43 = vcombine.low %v252_v27, %v256_v28  ;;  %v4995_v46 = vcombine.high %v260_v36, %v264_v37  ;;  %v4996_v53 = vcombine.low %v261_v40, %v265_v41  ;;  %v316_v28 = vld [vmem:[#allocation2 + $0x6d0] sm:$0xff] }
 0x100   :  { %1893 = vmatpush1.bf16.msra.mxu0 %v4930_v48  ;;  %1979 = vmatpush1.bf16.msra.mxu1 %v4932_v49  ;;  %v273_v48 = vld [vmem:[#allocation2 + $0x578] sm:$0xff]  ;;  %v4997_v49 = vcombine.high %v261_v40, %v265_v41  ;;  %v328_v40 = vld [vmem:[#allocation2 + $0x730] sm:$0xff] }
 0x101   :  { %1894 = vmatprep.subr.bf16.mxu0 %v4939_v50  ;;  %1980 = vmatprep.subr.bf16.mxu1 %v4941_v54  ;;  %v4994_v50 = vcombine.low %v260_v36, %v264_v37  ;;  %v5003_v54 = vcombine.high %v268_v44, %v272_v56  ;;  %v325_v41 = vld [vmem:[#allocation2 + $0x718] sm:$0xff] }
 0x104   :  { %1895 = vmatpush1.bf16.msra.mxu0 %v4938_v57  ;;  %1981 = vmatpush1.bf16.msra.mxu1 %v4940_v58  ;;  %v281_v57 = vld [vmem:[#allocation2 + $0x5b8] sm:$0xff]  ;;  %v5005_v58 = vcombine.high %v269_v47, %v273_v48 }
 0x105   :  { %1896 = vmatprep.subr.bf16.mxu0 %v4947_v59  ;;  %1982 = vmatprep.subr.bf16.mxu1 %v4949_v62  ;;  %v5002_v59 = vcombine.low %v268_v44, %v272_v56  ;;  %v5004_v62 = vcombine.low %v269_v47, %v273_v48  ;;  %v5013_v2 = vcombine.high %v277_v55, %v281_v57  ;;  %v336_v47 = vld [vmem:[#allocation2 + $0x770] sm:$0xff]  ;;  %v333_v48 = vld [vmem:[#allocation2 + $0x758] sm:$0xff] }
 0x108   :  { %1897 = vmatpush1.bf16.msra.mxu0 %v4946_v1  ;;  %1983 = vmatpush1.bf16.msra.mxu1 %v4948_v4  ;;  %v289_v1 = vld [vmem:[#allocation2 + $0x5f8] sm:$0xff]  ;;  %v5012_v4 = vcombine.low %v277_v55, %v281_v57  ;;  %v344_v55 = vld [vmem:[#allocation2 + $0x7b0] sm:$0xff] }
 0x109   :  { %1898 = vmatprep.subr.bf16.mxu0 %v4955_v5  ;;  %1984 = vmatprep.subr.bf16.mxu1 %v4957_v8  ;;  %v5019_v5 = vcombine.high %v284_v60, %v288_v61  ;;  %v5021_v6 = vcombine.high %v285_v0, %v289_v1  ;;  %v296_v8 = vld [vmem:[#allocation2 + $0x630] sm:$0xff]  ;;  %v341_v57 = vld [vmem:[#allocation2 + $0x798] sm:$0xff] }
 0x10a   :  { %v5026_v19 = vcombine.low %v292_v7, %v296_v8 }
 0x10c   :  { %1899 = vmatpush1.bf16.msra.mxu0 %v4954_v9  ;;  %1985 = vmatpush1.bf16.msra.mxu1 %v4956_v12  ;;  %v293_v9 = vld [vmem:[#allocation2 + $0x618] sm:$0xff]  ;;  %v5020_v12 = vcombine.low %v285_v0, %v289_v1  ;;  %v352_v0 = vld [vmem:[#allocation2 + $0x7f0] sm:$0xff] }
 0x10d   :  { %1911 = vmatprep.subr.bf16.mxu0 %v4963_v13  ;;  %1997 = vmatprep.subr.bf16.mxu1 %v4965_v16  ;;  %v5027_v13 = vcombine.high %v292_v7, %v296_v8  ;;  %v5029_v14 = vcombine.high %v293_v9, %v297_v10  ;;  %v304_v16 = vld [vmem:[#allocation2 + $0x670] sm:$0xff]  ;;  %v349_v1 = vld [vmem:[#allocation2 + $0x7d8] sm:$0xff] }
 0x10e   :  { %v5034_v27 = vcombine.low %v300_v15, %v304_v16 }
 0x10f   :  { %1901 = vmatmul.mubr.bf16.vlgmr.msra.gmra.mrb[4].mxu0 %v6079_v25  ;;  %1987 = vmatmul.mubr.bf16.vlgmr.msra.gmra.mrb[4].mxu1 %v6079_v25  ;;  %v309_v25 = vld [vmem:[#allocation2 + $0x698] sm:$0xff] }
 0x110   :  { %1912 = vmatpush1.bf16.msra.mxu0 %v4962_v17  ;;  %1998 = vmatpush1.bf16.msra.mxu1 %v4964_v20  ;;  %v301_v17 = vld [vmem:[#allocation2 + $0x658] sm:$0xff]  ;;  %v5028_v20 = vcombine.low %v293_v9, %v297_v10  ;;  %v5577_v9 = vld [vmem:[#allocation4 + $0x4] ss:$16 sps:$4 sm:$0xff]  }
 0x111   :  { %1913 = vmatprep.subr.bf16.mxu0 %v4971_v21  ;;  %1999 = vmatprep.subr.bf16.mxu1 %v4973_v24  ;;  %v5035_v21 = vcombine.high %v300_v15, %v304_v16  ;;  %v5037_v22 = vcombine.high %v301_v17, %v305_v18  ;;  %v312_v24 = vld [vmem:[#allocation2 + $0x6b0] sm:$0xff]  ;;  %v5580_v10 = vld [vmem:[#allocation4 + $0xc] ss:$16 sps:$4 sm:$0xff]   ;;  %v6081_v15 = vld [vmem:[%s6434_s0 + $0x8] ss:$16 sps:$4 sm:$0xff]  }
 0x112   :  { %1943 = vmatprep.mubr.bf16.mxu0 %v6080_v34  ;;  %2029 = vmatprep.mubr.bf16.mxu1 %v6080_v34  ;;  %v5043_v31 = vcombine.high %v308_v23, %v312_v24  ;;  %v321_v34 = vld [vmem:[#allocation2 + $0x6f8] sm:$0xff]  ;;  %v5581_v16 = vld [vmem:[#allocation4 + $0x20] ss:$16 sps:$4 sm:$0xff]  }
 0x114   :  { %1914 = vmatpush1.bf16.msra.mxu0 %v4970_v26  ;;  %2000 = vmatpush1.bf16.msra.mxu1 %v4972_v29  ;;  %v313_v26 = vld [vmem:[#allocation2 + $0x6b8] sm:$0xff]  ;;  %v320_v29 = vld [vmem:[#allocation2 + $0x6f0] sm:$0xff] }
 0x115   :  { %1915 = vmatprep.subr.bf16.mxu0 %v4979_v30  ;;  %2001 = vmatprep.subr.bf16.mxu1 %v4981_v33  ;;  %v5036_v30 = vcombine.low %v301_v17, %v305_v18  ;;  %v5045_v32 = vcombine.high %v309_v25, %v313_v26  ;;  %v317_v33 = vld [vmem:[#allocation2 + $0x6d8] sm:$0xff]  ;;  %v5044_v36 = vcombine.low %v309_v25, %v313_v26  ;;  %v5589_v18 = vld [vmem:[#allocation4 + $0x44] ss:$16 sps:$4 sm:$0xff]  }
 0x116   :  { %v5051_v37 = vcombine.high %v316_v28, %v320_v29  ;;  %v5052_v44 = vcombine.low %v317_v33, %v321_v34  ;;  %v5584_v17 = vld [vmem:[#allocation4 + $0x28] ss:$16 sps:$4 sm:$0xff]   ;;  %v5601_v26 = vld [vmem:[#allocation4 + $0x84] ss:$16 sps:$4 sm:$0xff]  }
 0x117   :  { %v5596_v25 = vld [vmem:[#allocation4 + $0x68] ss:$16 sps:$4 sm:$0xff]  }
 0x118   :  { %1916 = vmatpush1.bf16.msra.mxu0 %v4978_v35  ;;  %2002 = vmatpush1.bf16.msra.mxu1 %v4980_v38  ;;  %v5042_v35 = vcombine.low %v308_v23, %v312_v24  ;;  %v5053_v38 = vcombine.high %v317_v33, %v321_v34  ;;  %v5598_v23 = vld [vmem:[#allocation4 + $0x6c] ss:$16 sps:$4 sm:$0xff]   ;;  %v5593_v24 = vld [vmem:[#allocation4 + $0x60] ss:$16 sps:$4 sm:$0xff]   ;;  %v5608_v33 = vld [vmem:[#allocation4 + $0xa8] ss:$16 sps:$4 sm:$0xff]  }
 0x119   :  { %1917 = vmatprep.subr.bf16.mxu0 %v4987_v39  ;;  %2003 = vmatprep.subr.bf16.mxu1 %v4989_v42  ;;  %v324_v39 = vld [vmem:[#allocation2 + $0x710] sm:$0xff]  ;;  %v329_v42 = vld [vmem:[#allocation2 + $0x738] sm:$0xff] }
 0x11a   :  { %v5059_v56 = vcombine.high %v324_v39, %v328_v40  ;;  %v5060_v51 = vcombine.low %v325_v41, %v329_v42  ;;  %v5613_v34 = vld [vmem:[#allocation4 + $0xc4] ss:$16 sps:$4 sm:$0xff]  }
 0x11c   :  { %1918 = vmatpush1.bf16.msra.mxu0 %v4986_v43  ;;  %2004 = vmatpush1.bf16.msra.mxu1 %v4988_v45  ;;  %v5050_v43 = vcombine.low %v316_v28, %v320_v29  ;;  %v5061_v45 = vcombine.high %v325_v41, %v329_v42  ;;  %v5599_v28 = vld [vmem:[#allocation4 + $0x80] ss:$16 sps:$4 sm:$0xff]   ;;  %v5602_v29 = vld [vmem:[#allocation4 + $0x88] ss:$16 sps:$4 sm:$0xff]   ;;  %v5625_v42 = vld [vmem:[#allocation4 + $0x104] ss:$16 sps:$4 sm:$0xff]  }
 0x11d   :  { %1919 = vmatprep.subr.bf16.mxu0 %v4995_v46  ;;  %2005 = vmatprep.subr.bf16.mxu1 %v4997_v49  ;;  %v332_v46 = vld [vmem:[#allocation2 + $0x750] sm:$0xff]  ;;  %v337_v49 = vld [vmem:[#allocation2 + $0x778] sm:$0xff] }
 0x11e   :  { %v5067_v52 = vcombine.high %v332_v46, %v336_v47  ;;  %v5068_v60 = vcombine.low %v333_v48, %v337_v49  ;;  %v5620_v41 = vld [vmem:[#allocation4 + $0xe8] ss:$16 sps:$4 sm:$0xff]  }
 0x120   :  { %1920 = vmatpush1.bf16.msra.mxu0 %v4994_v50  ;;  %2006 = vmatpush1.bf16.msra.mxu1 %v4996_v53  ;;  %v5058_v50 = vcombine.low %v324_v39, %v328_v40  ;;  %v5069_v53 = vcombine.high %v333_v48, %v337_v49  ;;  %v5622_v39 = vld [vmem:[#allocation4 + $0xec] ss:$16 sps:$4 sm:$0xff]   ;;  %v5617_v40 = vld [vmem:[#allocation4 + $0xe0] ss:$16 sps:$4 sm:$0xff]   ;;  %v5632_v48 = vld [vmem:[#allocation4 + $0x128] ss:$16 sps:$4 sm:$0xff]  }
 0x121   :  { %1921 = vmatprep.subr.bf16.mxu0 %v5003_v54  ;;  %2007 = vmatprep.subr.bf16.mxu1 %v5005_v58  ;;  %v340_v54 = vld [vmem:[#allocation2 + $0x790] sm:$0xff]  ;;  %v345_v58 = vld [vmem:[#allocation2 + $0x7b8] sm:$0xff] }
 0x122   :  { %v5075_v61 = vcombine.high %v340_v54, %v344_v55  ;;  %v5637_v49 = vld [vmem:[#allocation4 + $0x144] ss:$16 sps:$4 sm:$0xff]  }
 0x124   :  { %1922 = vmatpush1.bf16.msra.mxu0 %v5002_v59  ;;  %2008 = vmatpush1.bf16.msra.mxu1 %v5004_v62  ;;  %v5066_v59 = vcombine.low %v332_v46, %v336_v47  ;;  %v5077_v62 = vcombine.high %v341_v57, %v345_v58  ;;  %v5634_v46 = vld [vmem:[#allocation4 + $0x12c] ss:$16 sps:$4 sm:$0xff]   ;;  %v5629_v47 = vld [vmem:[#allocation4 + $0x120] ss:$16 sps:$4 sm:$0xff]  }
 0x125   :  { %1923 = vmatprep.subr.bf16.mxu0 %v5011_v63  ;;  %2009 = vmatprep.subr.bf16.mxu1 %v5013_v2  ;;  %v348_v63 = vld [vmem:[#allocation2 + $0x7d0] sm:$0xff]  ;;  %v353_v2 = vld [vmem:[#allocation2 + $0x7f8] sm:$0xff] }
 0x126   :  { %v5082_v7 = vcombine.low %v348_v63, %v352_v0  ;;  %v5084_v8 = vcombine.low %v349_v1, %v353_v2 }
 0x128   :  { %1924 = vmatpush1.bf16.msra.mxu0 %v5010_v3  ;;  %2010 = vmatpush1.bf16.msra.mxu1 %v5012_v4  ;;  %v5074_v3 = vcombine.low %v340_v54, %v344_v55  ;;  %v5076_v4 = vcombine.low %v341_v57, %v345_v58  ;;  %v5646_v54 = vld [vmem:[#allocation4 + $0x16c] ss:$16 sps:$4 sm:$0xff]   ;;  %v5641_v55 = vld [vmem:[#allocation4 + $0x160] ss:$16 sps:$4 sm:$0xff]   ;;  %v5644_v57 = vld [vmem:[#allocation4 + $0x168] ss:$16 sps:$4 sm:$0xff]  }
 0x129   :  { %1925 = vmatprep.subr.bf16.mxu0 %v5019_v5  ;;  %2011 = vmatprep.subr.bf16.mxu1 %v5021_v6  ;;  %v5083_v5 = vcombine.high %v348_v63, %v352_v0  ;;  %v5085_v6 = vcombine.high %v349_v1, %v353_v2  ;;  %v5649_v58 = vld [vmem:[#allocation4 + $0x184] ss:$16 sps:$4 sm:$0xff]   ;;  %v5658_v63 = vld [vmem:[#allocation4 + $0x1ac] ss:$16 sps:$4 sm:$0xff]   ;;  %v5653_v0 = vld [vmem:[#allocation4 + $0x1a0] ss:$16 sps:$4 sm:$0xff]  }
 0x12a   :  { %v5656_v1 = vld [vmem:[#allocation4 + $0x1a8] ss:$16 sps:$4 sm:$0xff]   ;;  %v5661_v2 = vld [vmem:[#allocation4 + $0x1c4] ss:$16 sps:$4 sm:$0xff]  }
 0x12c   :  { %1926 = vmatpush1.bf16.msra.mxu0 %v5018_v11  ;;  %2012 = vmatpush1.bf16.msra.mxu1 %v5020_v12  ;;  %v5575_v11 = vld [vmem:[#allocation4] ss:$16 sps:$4 sm:$0xff]   ;;  %v5578_v12 = vld [vmem:[#allocation4 + $0x8] ss:$16 sps:$4 sm:$0xff]  }
 0x12d   :  { %1927 = vmatprep.subr.bf16.mxu0 %v5027_v13  ;;  %2013 = vmatprep.subr.bf16.mxu1 %v5029_v14  ;;  %v5583_v13 = vld [vmem:[#allocation4 + $0x24] ss:$16 sps:$4 sm:$0xff]   ;;  %v5586_v14 = vld [vmem:[#allocation4 + $0x2c] ss:$16 sps:$4 sm:$0xff]  }
 0x130   :  { %1928 = vmatpush1.bf16.msra.mxu0 %v5026_v19  ;;  %2014 = vmatpush1.bf16.msra.mxu1 %v5028_v20  ;;  %v5592_v19 = vld [vmem:[#allocation4 + $0x4c] ss:$16 sps:$4 sm:$0xff]   ;;  %v5587_v20 = vld [vmem:[#allocation4 + $0x40] ss:$16 sps:$4 sm:$0xff]  }
 0x131   :  { %1929 = vmatprep.subr.bf16.mxu0 %v5035_v21  ;;  %2015 = vmatprep.subr.bf16.mxu1 %v5037_v22  ;;  %v5590_v21 = vld [vmem:[#allocation4 + $0x48] ss:$16 sps:$4 sm:$0xff]   ;;  %v5595_v22 = vld [vmem:[#allocation4 + $0x64] ss:$16 sps:$4 sm:$0xff]  }
 0x134   :  { %1930 = vmatpush1.bf16.msra.mxu0 %v5034_v27  ;;  %2016 = vmatpush1.bf16.msra.mxu1 %v5036_v30  ;;  %v5604_v27 = vld [vmem:[#allocation4 + $0x8c] ss:$16 sps:$4 sm:$0xff]   ;;  %v5607_v30 = vld [vmem:[#allocation4 + $0xa4] ss:$16 sps:$4 sm:$0xff]  }
 0x135   :  { %1931 = vmatprep.subr.bf16.mxu0 %v5043_v31  ;;  %2017 = vmatprep.subr.bf16.mxu1 %v5045_v32  ;;  %v5610_v31 = vld [vmem:[#allocation4 + $0xac] ss:$16 sps:$4 sm:$0xff]   ;;  %v5605_v32 = vld [vmem:[#allocation4 + $0xa0] ss:$16 sps:$4 sm:$0xff]  }
 0x138   :  { %1932 = vmatpush1.bf16.msra.mxu0 %v5042_v35  ;;  %2018 = vmatpush1.bf16.msra.mxu1 %v5044_v36  ;;  %v5616_v35 = vld [vmem:[#allocation4 + $0xcc] ss:$16 sps:$4 sm:$0xff]   ;;  %v5611_v36 = vld [vmem:[#allocation4 + $0xc0] ss:$16 sps:$4 sm:$0xff]  }
 0x139   :  { %1933 = vmatprep.subr.bf16.mxu0 %v5051_v37  ;;  %2019 = vmatprep.subr.bf16.mxu1 %v5053_v38  ;;  %v5614_v37 = vld [vmem:[#allocation4 + $0xc8] ss:$16 sps:$4 sm:$0xff]   ;;  %v5619_v38 = vld [vmem:[#allocation4 + $0xe4] ss:$16 sps:$4 sm:$0xff]  }
 0x13c   :  { %1934 = vmatpush1.bf16.msra.mxu0 %v5050_v43  ;;  %2020 = vmatpush1.bf16.msra.mxu1 %v5052_v44  ;;  %v5628_v43 = vld [vmem:[#allocation4 + $0x10c] ss:$16 sps:$4 sm:$0xff]   ;;  %v5623_v44 = vld [vmem:[#allocation4 + $0x100] ss:$16 sps:$4 sm:$0xff]  }
 0x13d   :  { %1935 = vmatprep.subr.bf16.mxu0 %v5059_v56  ;;  %2021 = vmatprep.subr.bf16.mxu1 %v5061_v45  ;;  %v5626_v56 = vld [vmem:[#allocation4 + $0x108] ss:$16 sps:$4 sm:$0xff]   ;;  %v5631_v45 = vld [vmem:[#allocation4 + $0x124] ss:$16 sps:$4 sm:$0xff]  }
 0x140   :  { %1936 = vmatpush1.bf16.msra.mxu0 %v5058_v50  ;;  %2022 = vmatpush1.bf16.msra.mxu1 %v5060_v51  ;;  %v5640_v50 = vld [vmem:[#allocation4 + $0x14c] ss:$16 sps:$4 sm:$0xff]   ;;  %v5635_v51 = vld [vmem:[#allocation4 + $0x140] ss:$16 sps:$4 sm:$0xff]  }
 0x141   :  { %1937 = vmatprep.subr.bf16.mxu0 %v5067_v52  ;;  %2023 = vmatprep.subr.bf16.mxu1 %v5069_v53  ;;  %v5638_v52 = vld [vmem:[#allocation4 + $0x148] ss:$16 sps:$4 sm:$0xff]   ;;  %v5643_v53 = vld [vmem:[#allocation4 + $0x164] ss:$16 sps:$4 sm:$0xff]  }
 0x144   :  { %1938 = vmatpush1.bf16.msra.mxu0 %v5066_v59  ;;  %2024 = vmatpush1.bf16.msra.mxu1 %v5068_v60  ;;  %v5652_v59 = vld [vmem:[#allocation4 + $0x18c] ss:$16 sps:$4 sm:$0xff]   ;;  %v5647_v60 = vld [vmem:[#allocation4 + $0x180] ss:$16 sps:$4 sm:$0xff]  }
 0x145   :  { %1939 = vmatprep.subr.bf16.mxu0 %v5075_v61  ;;  %2025 = vmatprep.subr.bf16.mxu1 %v5077_v62  ;;  %v5650_v61 = vld [vmem:[#allocation4 + $0x188] ss:$16 sps:$4 sm:$0xff]   ;;  %v5655_v62 = vld [vmem:[#allocation4 + $0x1a4] ss:$16 sps:$4 sm:$0xff]  }
 0x148   :  { %1940 = vmatpush1.bf16.msra.mxu0 %v5074_v3  ;;  %2026 = vmatpush1.bf16.msra.mxu1 %v5076_v4  ;;  %v5664_v3 = vld [vmem:[#allocation4 + $0x1cc] ss:$16 sps:$4 sm:$0xff]   ;;  %v5659_v4 = vld [vmem:[#allocation4 + $0x1c0] ss:$16 sps:$4 sm:$0xff]  }
 0x149   :  { %1941 = vmatprep.subr.bf16.mxu0 %v5083_v5  ;;  %2027 = vmatprep.subr.bf16.mxu1 %v5085_v6  ;;  %v5662_v5 = vld [vmem:[#allocation4 + $0x1c8] ss:$16 sps:$4 sm:$0xff]   ;;  %v5667_v6 = vld [vmem:[#allocation4 + $0x1e4] ss:$16 sps:$4 sm:$0xff]  }
 0x14c   :  { %1942 = vmatpush1.bf16.msra.mxu0 %v5082_v7  ;;  %2028 = vmatpush1.bf16.msra.mxu1 %v5084_v8  ;;  %v5670_v7 = vld [vmem:[#allocation4 + $0x1ec] ss:$16 sps:$4 sm:$0xff]   ;;  %v5665_v8 = vld [vmem:[#allocation4 + $0x1e0] ss:$16 sps:$4 sm:$0xff]  }
 0x14d   :  { %3654 = vmatprep.subr.bf16.mxu0 %v5577_v9  ;;  %3826 = vmatprep.subr.bf16.mxu1 %v5580_v10  ;;  %v5668_v9 = vld [vmem:[#allocation4 + $0x1e8] ss:$16 sps:$4 sm:$0xff]   ;;  %v5673_v10 = vld [vmem:[#allocation4 + $0x204] ss:$16 sps:$4 sm:$0xff]  }
 0x14f   :  { %1944 = vmatmul.mubr.bf16.vlgmr.msra.gmra.mrb[4].mxu0 %v6081_v15  ;;  %2030 = vmatmul.mubr.bf16.vlgmr.msra.gmra.mrb[4].mxu1 %v6081_v15  ;;  %v6333_v15 = vld [vmem:[%s6436_s2] sm:$0xff] }
 0x150   :  { %3655 = vmatpush1.bf16.msra.mxu0 %v5575_v11  ;;  %3827 = vmatpush1.bf16.msra.mxu1 %v5578_v12  ;;  %v5676_v11 = vld [vmem:[#allocation4 + $0x20c] ss:$16 sps:$4 sm:$0xff]   ;;  %v356_v12 = vlaneseq }
 0x151   :  { %3656 = vmatprep.subr.bf16.mxu0 %v5583_v13  ;;  %3828 = vmatprep.subr.bf16.mxu1 %v5586_v14 }
 0x152   :  { %v6325_v13 = vshrl.u32 %v356_v12, 7  ;;  %v5698_v12 = vld [vmem:[#allocation4 + $0x288] ss:$16 sps:$4 sm:$0xff]  }
 0x154   :  { %3657 = vmatpush1.bf16.msra.mxu0 %v5581_v16  ;;  %3829 = vmatpush1.bf16.msra.mxu1 %v5584_v17  ;;  %v6328_v14 = vsub.s32 0, %v6325_v13  ;;  %v366_v16 = vsub.s32 2, %v6325_v13  ;;  %v6337_v17 = vsub.s32 1, %v6325_v13 }
 0x155   :  { %3658 = vmatprep.subr.bf16.mxu0 %v5589_v18  ;;  %3830 = vmatprep.subr.bf16.mxu1 %v5592_v19  ;;  %v370_v18 = vsub.s32 3, %v6325_v13 }
 0x156   :  { %v359_v19 = vrot.slane %v6333_v15, %v6328_v14 }
 0x158   :  { %3659 = vmatpush1.bf16.msra.mxu0 %v5587_v20  ;;  %3831 = vmatpush1.bf16.msra.mxu1 %v5590_v21  ;;  %v367_v20 = vrot.slane %v6333_v15, %v366_v16  ;;  %v363_v21 = vrot.slane %v6333_v15, %v6337_v17 }
 0x159   :  { %3660 = vmatprep.subr.bf16.mxu0 %v5595_v22  ;;  %3832 = vmatprep.subr.bf16.mxu1 %v5598_v23  ;;  %v371_v22 = vrot.slane %v6333_v15, %v370_v18 }
 0x15c   :  { %3661 = vmatpush1.bf16.msra.mxu0 %v5593_v24  ;;  %3833 = vmatpush1.bf16.msra.mxu1 %v5596_v25 }
 0x15d   :  { %3662 = vmatprep.subr.bf16.mxu0 %v5601_v26  ;;  %3834 = vmatprep.subr.bf16.mxu1 %v5604_v27 }
 0x160   :  { %3663 = vmatpush1.bf16.msra.mxu0 %v5599_v28  ;;  %3835 = vmatpush1.bf16.msra.mxu1 %v5602_v29 }
 0x161   :  { %3664 = vmatprep.subr.bf16.mxu0 %v5607_v30  ;;  %3836 = vmatprep.subr.bf16.mxu1 %v5610_v31 }
 0x164   :  { %3665 = vmatpush1.bf16.msra.mxu0 %v5605_v32  ;;  %3837 = vmatpush1.bf16.msra.mxu1 %v5608_v33 }
 0x165   :  { %3666 = vmatprep.subr.bf16.mxu0 %v5613_v34  ;;  %3838 = vmatprep.subr.bf16.mxu1 %v5616_v35 }
 0x168   :  { %3667 = vmatpush1.bf16.msra.mxu0 %v5611_v36  ;;  %3839 = vmatpush1.bf16.msra.mxu1 %v5614_v37 }
 0x169   :  { %3668 = vmatprep.subr.bf16.mxu0 %v5619_v38  ;;  %3840 = vmatprep.subr.bf16.mxu1 %v5622_v39 }
 0x16c   :  { %3669 = vmatpush1.bf16.msra.mxu0 %v5617_v40  ;;  %3841 = vmatpush1.bf16.msra.mxu1 %v5620_v41 }
 0x16d   :  { %3670 = vmatprep.subr.bf16.mxu0 %v5625_v42  ;;  %3842 = vmatprep.subr.bf16.mxu1 %v5628_v43 }
 0x170   :  { %3671 = vmatpush1.bf16.msra.mxu0 %v5623_v44  ;;  %3843 = vmatpush1.bf16.msra.mxu1 %v5626_v56 }
 0x171   :  { %3672 = vmatprep.subr.bf16.mxu0 %v5631_v45  ;;  %3844 = vmatprep.subr.bf16.mxu1 %v5634_v46 }
 0x174   :  { %3673 = vmatpush1.bf16.msra.mxu0 %v5629_v47  ;;  %3845 = vmatpush1.bf16.msra.mxu1 %v5632_v48 }
 0x175   :  { %3674 = vmatprep.subr.bf16.mxu0 %v5637_v49  ;;  %3846 = vmatprep.subr.bf16.mxu1 %v5640_v50 }
 0x178   :  { %3675 = vmatpush1.bf16.msra.mxu0 %v5635_v51  ;;  %3847 = vmatpush1.bf16.msra.mxu1 %v5638_v52 }
 0x179   :  { %3676 = vmatprep.subr.bf16.mxu0 %v5643_v53  ;;  %3848 = vmatprep.subr.bf16.mxu1 %v5646_v54 }
 0x17c   :  { %3677 = vmatpush1.bf16.msra.mxu0 %v5641_v55  ;;  %3849 = vmatpush1.bf16.msra.mxu1 %v5644_v57 }
 0x17d   :  { %3678 = vmatprep.subr.bf16.mxu0 %v5649_v58  ;;  %3850 = vmatprep.subr.bf16.mxu1 %v5652_v59  ;;  %v5671_v58 = vld [vmem:[#allocation4 + $0x200] ss:$16 sps:$4 sm:$0xff]   ;;  %v5674_v59 = vld [vmem:[#allocation4 + $0x208] ss:$16 sps:$4 sm:$0xff]  }
 0x180   :  { %3679 = vmatpush1.bf16.msra.mxu0 %v5647_v60  ;;  %3851 = vmatpush1.bf16.msra.mxu1 %v5650_v61  ;;  %v5679_v61 = vld [vmem:[#allocation4 + $0x224] ss:$16 sps:$4 sm:$0xff]  }
 0x181   :  { %3680 = vmatprep.subr.bf16.mxu0 %v5655_v62  ;;  %3852 = vmatprep.subr.bf16.mxu1 %v5658_v63  ;;  %v5682_v62 = vld [vmem:[#allocation4 + $0x22c] ss:$16 sps:$4 sm:$0xff]   ;;  %v5677_v63 = vld [vmem:[#allocation4 + $0x220] ss:$16 sps:$4 sm:$0xff]  }
 0x184   :  { %3681 = vmatpush1.bf16.msra.mxu0 %v5653_v0  ;;  %3853 = vmatpush1.bf16.msra.mxu1 %v5656_v1  ;;  %v5680_v0 = vld [vmem:[#allocation4 + $0x228] ss:$16 sps:$4 sm:$0xff]   ;;  %v5685_v1 = vld [vmem:[#allocation4 + $0x244] ss:$16 sps:$4 sm:$0xff]  }
 0x185   :  { %3682 = vmatprep.subr.bf16.mxu0 %v5661_v2  ;;  %3854 = vmatprep.subr.bf16.mxu1 %v5664_v3  ;;  %v5688_v2 = vld [vmem:[#allocation4 + $0x24c] ss:$16 sps:$4 sm:$0xff]   ;;  %v5683_v3 = vld [vmem:[#allocation4 + $0x240] ss:$16 sps:$4 sm:$0xff]  }
 0x188   :  { %3683 = vmatpush1.bf16.msra.mxu0 %v5659_v4  ;;  %3855 = vmatpush1.bf16.msra.mxu1 %v5662_v5  ;;  %v5686_v4 = vld [vmem:[#allocation4 + $0x248] ss:$16 sps:$4 sm:$0xff]   ;;  %v5691_v5 = vld [vmem:[#allocation4 + $0x264] ss:$16 sps:$4 sm:$0xff]  }
 0x189   :  { %3684 = vmatprep.subr.bf16.mxu0 %v5667_v6  ;;  %3856 = vmatprep.subr.bf16.mxu1 %v5670_v7  ;;  %v5694_v6 = vld [vmem:[#allocation4 + $0x26c] ss:$16 sps:$4 sm:$0xff]   ;;  %v5689_v7 = vld [vmem:[#allocation4 + $0x260] ss:$16 sps:$4 sm:$0xff]  }
 0x18c   :  { %3685 = vmatpush1.bf16.msra.mxu0 %v5665_v8  ;;  %3857 = vmatpush1.bf16.msra.mxu1 %v5668_v9  ;;  %v5692_v8 = vld [vmem:[#allocation4 + $0x268] ss:$16 sps:$4 sm:$0xff]   ;;  %v5697_v9 = vld [vmem:[#allocation4 + $0x284] ss:$16 sps:$4 sm:$0xff]  }
 0x18d   :  { %3697 = vmatprep.subr.bf16.mxu0 %v5673_v10  ;;  %3869 = vmatprep.subr.bf16.mxu1 %v5676_v11  ;;  %v5700_v10 = vld [vmem:[#allocation4 + $0x28c] ss:$16 sps:$4 sm:$0xff]   ;;  %v5695_v11 = vld [vmem:[#allocation4 + $0x280] ss:$16 sps:$4 sm:$0xff]  }
 0x1a2   :  { %v1773_v23 = vpop.f32.mrb[0].mxu0  ;;  %v1859_v25 = vpop.f32.mrb[0].mxu1 }
 0x1a3   :  { %v5483_v24 = vadd.f32 %v1773_v23, %v359_v19  ;;  %v1775_v26 = vpop.f32.mrb[1].mxu0  ;;  %v5487_v27 = vadd.f32 %v1859_v25, %v367_v20  ;;  %v1861_v29 = vpop.f32.mrb[1].mxu1  ;;  %v5709_v23 = vld [vmem:[#allocation4 + $0x2c4] ss:$16 sps:$4 sm:$0xff]   ;;  %v5707_v25 = vld [vmem:[#allocation4 + $0x2c0] ss:$16 sps:$4 sm:$0xff]  }
 0x1a4   :  { %v5484_v28 = vadd.f32 %v1775_v26, %v363_v21  ;;  %v1777_v30 = vpop.f32.mrb[2].mxu0  ;;  %v5488_v32 = vadd.f32 %v1861_v29, %v371_v22  ;;  %v1863_v34 = vpop.f32.mrb[2].mxu1  ;;  %v5710_v26 = vld [vmem:[#allocation4 + $0x2c8] ss:$16 sps:$4 sm:$0xff]   ;;  %v5713_v29 = vld [vmem:[#allocation4 + $0x2e0] ss:$16 sps:$4 sm:$0xff]  }
 0x1a5   :  { %v2056_v31 = vmul.f32 0.01, %v5483_v24  ;;  %v5485_v33 = vadd.f32 %v1777_v30, %v359_v19  ;;  %v1779_v35 = vpop.f32.mrb[3].mxu0  ;;  %vm2040_vm0 = vcmp.gt.f32.partialorder %v5483_v24, 0.0  ;;  %vm2042_vm1 = vcmp.gt.f32.partialorder %v5487_v27, 0.0  ;;  %v1865_v37 = vpop.f32.mrb[3].mxu1 }
 0x1a6   :  { %v2058_v36 = vmul.f32 0.01, %v5487_v27  ;;  %vm2041_vm2 = vcmp.gt.f32.partialorder %v5484_v28, 0.0  ;;  %v2057_v38 = vmul.f32 0.01, %v5484_v28  ;;  %v5489_v40 = vadd.f32 %v1863_v34, %v367_v20 }
 0x1a7   :  { %vm2048_vm3 = vcmp.gt.f32.partialorder %v5485_v33, 0.0  ;;  %v2064_v39 = vmul.f32 0.01, %v5485_v33  ;;  %v5486_v41 = vadd.f32 %v1779_v35, %v363_v21  ;;  %v2072_v42 = vsel %vm2040_vm0, %v5483_v24, %v2056_v31  ;;  %v5703_v19 = vld [vmem:[#allocation4 + $0x2a4] ss:$16 sps:$4 sm:$0xff]  }
 0x1a8   :  { %vm2043_vm4 = vcmp.gt.f32.partialorder %v5488_v32, 0.0  ;;  %v2059_v43 = vmul.f32 0.01, %v5488_v32  ;;  %v5490_v44 = vadd.f32 %v1865_v37, %v371_v22  ;;  %vm2050_vm5 = vcmp.gt.f32.partialorder %v5489_v40, 0.0  ;;  %v5706_v20 = vld [vmem:[#allocation4 + $0x2ac] ss:$16 sps:$4 sm:$0xff]  }
 0x1a9   :  { %v2080_v56 = vsel %vm2048_vm3, %v5485_v33, %v2064_v39  ;;  %v2066_v45 = vmul.f32 0.01, %v5489_v40  ;;  %vm2049_vm6 = vcmp.gt.f32.partialorder %v5486_v41, 0.0  ;;  %v2065_v47 = vmul.f32 0.01, %v5486_v41 }
 0x1aa   :  { %v2088_v46 = vpack.c.bf16 %v2080_v56, %v2072_v42  ;;  %vm2051_vm7 = vcmp.gt.f32.partialorder %v5490_v44, 0.0  ;;  %v2067_v48 = vmul.f32 0.01, %v5490_v44  ;;  %v2074_v49 = vsel %vm2042_vm1, %v5487_v27, %v2058_v36  ;;  %v5701_v21 = vld [vmem:[#allocation4 + $0x2a0] ss:$16 sps:$4 sm:$0xff]  }
 0x1ab   :  { %v2082_v50 = vsel %vm2050_vm5, %v5489_v40, %v2066_v45  ;;  %v2073_v51 = vsel %vm2041_vm2, %v5484_v28, %v2057_v38  ;;  %v2081_v53 = vsel %vm2049_vm6, %v5486_v41, %v2065_v47  ;;  %v2075_v54 = vsel %vm2043_vm4, %v5488_v32, %v2059_v43  ;;  %v5704_v22 = vld [vmem:[#allocation4 + $0x2a8] ss:$16 sps:$4 sm:$0xff]   ;;  %v5712_v24 = vld [vmem:[#allocation4 + $0x2cc] ss:$16 sps:$4 sm:$0xff]   ;;  %v5715_v27 = vld [vmem:[#allocation4 + $0x2e4] ss:$16 sps:$4 sm:$0xff]  }
 0x1ac   :  { %v6352_v52 = vpack.c.bf16 %v2082_v50, %v2074_v49  ;;  %v2083_v55 = vsel %vm2051_vm7, %v5490_v44, %v2067_v48  ;;  %v2089_v57 = vpack.c.bf16 %v2081_v53, %v2073_v51  ;;  %v5718_v28 = vld [vmem:[#allocation4 + $0x2ec] ss:$16 sps:$4 sm:$0xff]   ;;  %v5716_v30 = vld [vmem:[#allocation4 + $0x2e8] ss:$16 sps:$4 sm:$0xff]   ;;  %v5721_v31 = vld [vmem:[#allocation4 + $0x304] ss:$16 sps:$4 sm:$0xff]  }
 0x1ad   :  { %v2091_v60 = vpack.c.bf16 %v2083_v55, %v2075_v54  ;;  %v5724_v32 = vld [vmem:[#allocation4 + $0x30c] ss:$16 sps:$4 sm:$0xff]   ;;  %v5719_v33 = vld [vmem:[#allocation4 + $0x300] ss:$16 sps:$4 sm:$0xff]   ;;  %v5722_v34 = vld [vmem:[#allocation4 + $0x308] ss:$16 sps:$4 sm:$0xff]  }
 0x1ae   :  { %3686 = vmatprep.mubr.bf16.mxu0 %v2089_v57  ;;  %3858 = vmatprep.mubr.bf16.mxu1 %v2089_v57  ;;  %v5727_v35 = vld [vmem:[#allocation4 + $0x324] ss:$16 sps:$4 sm:$0xff]   ;;  %v5730_v36 = vld [vmem:[#allocation4 + $0x32c] ss:$16 sps:$4 sm:$0xff]   ;;  %v5725_v37 = vld [vmem:[#allocation4 + $0x320] ss:$16 sps:$4 sm:$0xff]  }
 0x1af   :  { %3687 = vmatmul.mubr.bf16.vlgmr.msra.gmra.mrb[8].mxu0 %v2088_v46  ;;  %3859 = vmatmul.mubr.bf16.vlgmr.msra.gmra.mrb[8].mxu1 %v2088_v46  ;;  %v5728_v38 = vld [vmem:[#allocation4 + $0x328] ss:$16 sps:$4 sm:$0xff]   ;;  %v5733_v39 = vld [vmem:[#allocation4 + $0x344] ss:$16 sps:$4 sm:$0xff]   ;;  %v5736_v40 = vld [vmem:[#allocation4 + $0x34c] ss:$16 sps:$4 sm:$0xff]  }
 0x1b0   :  { %3698 = vmatpush1.bf16.msra.mxu0 %v5671_v58  ;;  %3870 = vmatpush1.bf16.msra.mxu1 %v5674_v59  ;;  %v5731_v41 = vld [vmem:[#allocation4 + $0x340] ss:$16 sps:$4 sm:$0xff]   ;;  %v5734_v42 = vld [vmem:[#allocation4 + $0x348] ss:$16 sps:$4 sm:$0xff]   ;;  %v5739_v43 = vld [vmem:[#allocation4 + $0x364] ss:$16 sps:$4 sm:$0xff]  }
 0x1b1   :  { %3729 = vmatprep.mubr.bf16.mxu0 %v2091_v60  ;;  %3901 = vmatprep.mubr.bf16.mxu1 %v2091_v60  ;;  %v5742_v44 = vld [vmem:[#allocation4 + $0x36c] ss:$16 sps:$4 sm:$0xff]   ;;  %v5737_v56 = vld [vmem:[#allocation4 + $0x360] ss:$16 sps:$4 sm:$0xff]   ;;  %v5740_v45 = vld [vmem:[#allocation4 + $0x368] ss:$16 sps:$4 sm:$0xff]  }
 0x1b2   :  { %3699 = vmatprep.subr.bf16.mxu0 %v5679_v61  ;;  %3871 = vmatprep.subr.bf16.mxu1 %v5682_v62  ;;  %v5745_v46 = vld [vmem:[#allocation4 + $0x384] ss:$16 sps:$4 sm:$0xff]   ;;  %v5748_v47 = vld [vmem:[#allocation4 + $0x38c] ss:$16 sps:$4 sm:$0xff]   ;;  %v5743_v48 = vld [vmem:[#allocation4 + $0x380] ss:$16 sps:$4 sm:$0xff]  }
 0x1b3   :  { %v5746_v49 = vld [vmem:[#allocation4 + $0x388] ss:$16 sps:$4 sm:$0xff]   ;;  %v5751_v50 = vld [vmem:[#allocation4 + $0x3a4] ss:$16 sps:$4 sm:$0xff]   ;;  %v5754_v51 = vld [vmem:[#allocation4 + $0x3ac] ss:$16 sps:$4 sm:$0xff]  }
 0x1b4   :  { %3700 = vmatpush1.bf16.msra.mxu0 %v5677_v63  ;;  %3872 = vmatpush1.bf16.msra.mxu1 %v5680_v0  ;;  %v5749_v53 = vld [vmem:[#allocation4 + $0x3a0] ss:$16 sps:$4 sm:$0xff]   ;;  %v5752_v54 = vld [vmem:[#allocation4 + $0x3a8] ss:$16 sps:$4 sm:$0xff]   ;;  %v5757_v55 = vld [vmem:[#allocation4 + $0x3c4] ss:$16 sps:$4 sm:$0xff]  }
 0x1b5   :  { %3701 = vmatprep.subr.bf16.mxu0 %v5685_v1  ;;  %3873 = vmatprep.subr.bf16.mxu1 %v5688_v2  ;;  %v5760_v57 = vld [vmem:[#allocation4 + $0x3cc] ss:$16 sps:$4 sm:$0xff]   ;;  %v5755_v58 = vld [vmem:[#allocation4 + $0x3c0] ss:$16 sps:$4 sm:$0xff]   ;;  %v5758_v59 = vld [vmem:[#allocation4 + $0x3c8] ss:$16 sps:$4 sm:$0xff]  }
 0x1b6   :  { %v5763_v60 = vld [vmem:[#allocation4 + $0x3e4] ss:$16 sps:$4 sm:$0xff]   ;;  %v5766_v61 = vld [vmem:[#allocation4 + $0x3ec] ss:$16 sps:$4 sm:$0xff]   ;;  %v5761_v62 = vld [vmem:[#allocation4 + $0x3e0] ss:$16 sps:$4 sm:$0xff]  }
 0x1b7   :  { %v5764_v63 = vld [vmem:[#allocation4 + $0x3e8] ss:$16 sps:$4 sm:$0xff]   ;;  %v5769_v0 = vld [vmem:[#allocation4 + $0x404] ss:$16 sps:$4 sm:$0xff]   ;;  %v5772_v1 = vld [vmem:[#allocation4 + $0x40c] ss:$16 sps:$4 sm:$0xff]  }
 0x1b8   :  { %3702 = vmatpush1.bf16.msra.mxu0 %v5683_v3  ;;  %3874 = vmatpush1.bf16.msra.mxu1 %v5686_v4  ;;  %v5767_v2 = vld [vmem:[#allocation4 + $0x400] ss:$16 sps:$4 sm:$0xff]   ;;  %v5770_v3 = vld [vmem:[#allocation4 + $0x408] ss:$16 sps:$4 sm:$0xff]   ;;  %v5775_v4 = vld [vmem:[#allocation4 + $0x424] ss:$16 sps:$4 sm:$0xff]  }
 0x1b9   :  { %3703 = vmatprep.subr.bf16.mxu0 %v5691_v5  ;;  %3875 = vmatprep.subr.bf16.mxu1 %v5694_v6  ;;  %v5778_v5 = vld [vmem:[#allocation4 + $0x42c] ss:$16 sps:$4 sm:$0xff]   ;;  %v5773_v6 = vld [vmem:[#allocation4 + $0x420] ss:$16 sps:$4 sm:$0xff]  }
 0x1bc   :  { %3704 = vmatpush1.bf16.msra.mxu0 %v5689_v7  ;;  %3876 = vmatpush1.bf16.msra.mxu1 %v5692_v8  ;;  %v5776_v7 = vld [vmem:[#allocation4 + $0x428] ss:$16 sps:$4 sm:$0xff]   ;;  %v5781_v8 = vld [vmem:[#allocation4 + $0x444] ss:$16 sps:$4 sm:$0xff]  }
 0x1bd   :  { %3705 = vmatprep.subr.bf16.mxu0 %v5697_v9  ;;  %3877 = vmatprep.subr.bf16.mxu1 %v5700_v10  ;;  %v5784_v9 = vld [vmem:[#allocation4 + $0x44c] ss:$16 sps:$4 sm:$0xff]   ;;  %v5779_v10 = vld [vmem:[#allocation4 + $0x440] ss:$16 sps:$4 sm:$0xff]  }
 0x1c0   :  { %3706 = vmatpush1.bf16.msra.mxu0 %v5695_v11  ;;  %3878 = vmatpush1.bf16.msra.mxu1 %v5698_v12  ;;  %v5782_v11 = vld [vmem:[#allocation4 + $0x448] ss:$16 sps:$4 sm:$0xff]   ;;  %v5787_v12 = vld [vmem:[#allocation4 + $0x464] ss:$16 sps:$4 sm:$0xff]  }
 0x1c1   :  { %3707 = vmatprep.subr.bf16.mxu0 %v5703_v19  ;;  %3879 = vmatprep.subr.bf16.mxu1 %v5706_v20  ;;  %v5790_v19 = vld [vmem:[#allocation4 + $0x46c] ss:$16 sps:$4 sm:$0xff]   ;;  %v5785_v20 = vld [vmem:[#allocation4 + $0x460] ss:$16 sps:$4 sm:$0xff]  }
 0x1c4   :  { %3708 = vmatpush1.bf16.msra.mxu0 %v5701_v21  ;;  %3880 = vmatpush1.bf16.msra.mxu1 %v5704_v22  ;;  %v5793_v21 = vld [vmem:[#allocation4 + $0x484] ss:$16 sps:$4 sm:$0xff]   ;;  %v5796_v22 = vld [vmem:[#allocation4 + $0x48c] ss:$16 sps:$4 sm:$0xff]  }
 0x1c5   :  { %3709 = vmatprep.subr.bf16.mxu0 %v5709_v23  ;;  %3881 = vmatprep.subr.bf16.mxu1 %v5712_v24  ;;  %v5791_v23 = vld [vmem:[#allocation4 + $0x480] ss:$16 sps:$4 sm:$0xff]   ;;  %v5794_v24 = vld [vmem:[#allocation4 + $0x488] ss:$16 sps:$4 sm:$0xff]  }
 0x1c8   :  { %3710 = vmatpush1.bf16.msra.mxu0 %v5707_v25  ;;  %3882 = vmatpush1.bf16.msra.mxu1 %v5710_v26  ;;  %v5799_v25 = vld [vmem:[#allocation4 + $0x4a4] ss:$16 sps:$4 sm:$0xff]   ;;  %v5802_v26 = vld [vmem:[#allocation4 + $0x4ac] ss:$16 sps:$4 sm:$0xff]  }
 0x1c9   :  { %3711 = vmatprep.subr.bf16.mxu0 %v5715_v27  ;;  %3883 = vmatprep.subr.bf16.mxu1 %v5718_v28  ;;  %v5797_v27 = vld [vmem:[#allocation4 + $0x4a0] ss:$16 sps:$4 sm:$0xff]   ;;  %v5800_v28 = vld [vmem:[#allocation4 + $0x4a8] ss:$16 sps:$4 sm:$0xff]  }
 0x1cc   :  { %3712 = vmatpush1.bf16.msra.mxu0 %v5713_v29  ;;  %3884 = vmatpush1.bf16.msra.mxu1 %v5716_v30  ;;  %v5805_v29 = vld [vmem:[#allocation4 + $0x4c4] ss:$16 sps:$4 sm:$0xff]   ;;  %v5808_v30 = vld [vmem:[#allocation4 + $0x4cc] ss:$16 sps:$4 sm:$0xff]  }
 0x1cd   :  { %3713 = vmatprep.subr.bf16.mxu0 %v5721_v31  ;;  %3885 = vmatprep.subr.bf16.mxu1 %v5724_v32  ;;  %v5803_v31 = vld [vmem:[#allocation4 + $0x4c0] ss:$16 sps:$4 sm:$0xff]   ;;  %v5806_v32 = vld [vmem:[#allocation4 + $0x4c8] ss:$16 sps:$4 sm:$0xff]  }
 0x1d0   :  { %3714 = vmatpush1.bf16.msra.mxu0 %v5719_v33  ;;  %3886 = vmatpush1.bf16.msra.mxu1 %v5722_v34  ;;  %v5811_v33 = vld [vmem:[#allocation4 + $0x4e4] ss:$16 sps:$4 sm:$0xff]   ;;  %v5814_v34 = vld [vmem:[#allocation4 + $0x4ec] ss:$16 sps:$4 sm:$0xff]  }
 0x1d1   :  { %3715 = vmatprep.subr.bf16.mxu0 %v5727_v35  ;;  %3887 = vmatprep.subr.bf16.mxu1 %v5730_v36  ;;  %v5809_v35 = vld [vmem:[#allocation4 + $0x4e0] ss:$16 sps:$4 sm:$0xff]   ;;  %v5812_v36 = vld [vmem:[#allocation4 + $0x4e8] ss:$16 sps:$4 sm:$0xff]  }
 0x1d4   :  { %3716 = vmatpush1.bf16.msra.mxu0 %v5725_v37  ;;  %3888 = vmatpush1.bf16.msra.mxu1 %v5728_v38  ;;  %v5817_v37 = vld [vmem:[#allocation4 + $0x504] ss:$16 sps:$4 sm:$0xff]   ;;  %v5820_v38 = vld [vmem:[#allocation4 + $0x50c] ss:$16 sps:$4 sm:$0xff]  }
 0x1d5   :  { %3717 = vmatprep.subr.bf16.mxu0 %v5733_v39  ;;  %3889 = vmatprep.subr.bf16.mxu1 %v5736_v40  ;;  %v5815_v39 = vld [vmem:[#allocation4 + $0x500] ss:$16 sps:$4 sm:$0xff]   ;;  %v5818_v40 = vld [vmem:[#allocation4 + $0x508] ss:$16 sps:$4 sm:$0xff]  }
 0x1d8   :  { %3718 = vmatpush1.bf16.msra.mxu0 %v5731_v41  ;;  %3890 = vmatpush1.bf16.msra.mxu1 %v5734_v42  ;;  %v5823_v41 = vld [vmem:[#allocation4 + $0x524] ss:$16 sps:$4 sm:$0xff]   ;;  %v5826_v42 = vld [vmem:[#allocation4 + $0x52c] ss:$16 sps:$4 sm:$0xff]  }
 0x1d9   :  { %3719 = vmatprep.subr.bf16.mxu0 %v5739_v43  ;;  %3891 = vmatprep.subr.bf16.mxu1 %v5742_v44  ;;  %v5821_v43 = vld [vmem:[#allocation4 + $0x520] ss:$16 sps:$4 sm:$0xff]   ;;  %v5824_v44 = vld [vmem:[#allocation4 + $0x528] ss:$16 sps:$4 sm:$0xff]  }
 0x1dc   :  { %3720 = vmatpush1.bf16.msra.mxu0 %v5737_v56  ;;  %3892 = vmatpush1.bf16.msra.mxu1 %v5740_v45  ;;  %v5829_v56 = vld [vmem:[#allocation4 + $0x544] ss:$16 sps:$4 sm:$0xff]   ;;  %v5832_v45 = vld [vmem:[#allocation4 + $0x54c] ss:$16 sps:$4 sm:$0xff]  }
 0x1dd   :  { %3721 = vmatprep.subr.bf16.mxu0 %v5745_v46  ;;  %3893 = vmatprep.subr.bf16.mxu1 %v5748_v47  ;;  %v5827_v46 = vld [vmem:[#allocation4 + $0x540] ss:$16 sps:$4 sm:$0xff]   ;;  %v5830_v47 = vld [vmem:[#allocation4 + $0x548] ss:$16 sps:$4 sm:$0xff]  }
 0x1e0   :  { %3722 = vmatpush1.bf16.msra.mxu0 %v5743_v48  ;;  %3894 = vmatpush1.bf16.msra.mxu1 %v5746_v49  ;;  %v5835_v48 = vld [vmem:[#allocation4 + $0x564] ss:$16 sps:$4 sm:$0xff]   ;;  %v5838_v49 = vld [vmem:[#allocation4 + $0x56c] ss:$16 sps:$4 sm:$0xff]  }
 0x1e1   :  { %3723 = vmatprep.subr.bf16.mxu0 %v5751_v50  ;;  %3895 = vmatprep.subr.bf16.mxu1 %v5754_v51  ;;  %v5833_v50 = vld [vmem:[#allocation4 + $0x560] ss:$16 sps:$4 sm:$0xff]   ;;  %v5836_v51 = vld [vmem:[#allocation4 + $0x568] ss:$16 sps:$4 sm:$0xff]  }
 0x1e4   :  { %3724 = vmatpush1.bf16.msra.mxu0 %v5749_v53  ;;  %3896 = vmatpush1.bf16.msra.mxu1 %v5752_v54  ;;  %v5841_v53 = vld [vmem:[#allocation4 + $0x584] ss:$16 sps:$4 sm:$0xff]   ;;  %v5844_v54 = vld [vmem:[#allocation4 + $0x58c] ss:$16 sps:$4 sm:$0xff]  }
 0x1e5   :  { %3725 = vmatprep.subr.bf16.mxu0 %v5757_v55  ;;  %3897 = vmatprep.subr.bf16.mxu1 %v5760_v57  ;;  %v374_v55 = vsub.s32 4, %v6325_v13  ;;  %v382_v57 = vsub.s32 6, %v6325_v13 }
 0x1e8   :  { %3726 = vmatpush1.bf16.msra.mxu0 %v5755_v58  ;;  %3898 = vmatpush1.bf16.msra.mxu1 %v5758_v59  ;;  %v378_v58 = vsub.s32 5, %v6325_v13  ;;  %v386_v59 = vsub.s32 7, %v6325_v13 }
 0x1e9   :  { %3727 = vmatprep.subr.bf16.mxu0 %v5763_v60  ;;  %3899 = vmatprep.subr.bf16.mxu1 %v5766_v61  ;;  %v5839_v60 = vld [vmem:[#allocation4 + $0x580] ss:$16 sps:$4 sm:$0xff]   ;;  %v5842_v61 = vld [vmem:[#allocation4 + $0x588] ss:$16 sps:$4 sm:$0xff]  }
 0x1ec   :  { %3728 = vmatpush1.bf16.msra.mxu0 %v5761_v62  ;;  %3900 = vmatpush1.bf16.msra.mxu1 %v5764_v63  ;;  %v5847_v62 = vld [vmem:[#allocation4 + $0x5a4] ss:$16 sps:$4 sm:$0xff]   ;;  %v5850_v63 = vld [vmem:[#allocation4 + $0x5ac] ss:$16 sps:$4 sm:$0xff]  }
 0x1ed   :  { %3740 = vmatprep.subr.bf16.mxu0 %v5769_v0  ;;  %3912 = vmatprep.subr.bf16.mxu1 %v5772_v1  ;;  %v375_v0 = vrot.slane %v6333_v15, %v374_v55  ;;  %v383_v1 = vrot.slane %v6333_v15, %v382_v57  ;;  %v5863_v55 = vld [vmem:[#allocation4 + $0x600] ss:$16 sps:$4 sm:$0xff]   ;;  %v5866_v57 = vld [vmem:[#allocation4 + $0x608] ss:$16 sps:$4 sm:$0xff]  }
 0x1ef   :  { %3730 = vmatmul.mubr.bf16.vlgmr.msra.gmra.mrb[8].mxu0 %v6352_v52  ;;  %3902 = vmatmul.mubr.bf16.vlgmr.msra.gmra.mrb[8].mxu1 %v6352_v52  ;;  %v5788_v52 = vld [vmem:[#allocation4 + $0x468] ss:$16 sps:$4 sm:$0xff]  }
 0x1f0   :  { %3741 = vmatpush1.bf16.msra.mxu0 %v5767_v2  ;;  %3913 = vmatpush1.bf16.msra.mxu1 %v5770_v3  ;;  %v379_v2 = vrot.slane %v6333_v15, %v378_v58  ;;  %v387_v3 = vrot.slane %v6333_v15, %v386_v59  ;;  %v5871_v59 = vld [vmem:[#allocation4 + $0x624] ss:$16 sps:$4 sm:$0xff]  }
 0x1f1   :  { %3742 = vmatprep.subr.bf16.mxu0 %v5775_v4  ;;  %3914 = vmatprep.subr.bf16.mxu1 %v5778_v5  ;;  %v5845_v4 = vld [vmem:[#allocation4 + $0x5a0] ss:$16 sps:$4 sm:$0xff]   ;;  %v5848_v5 = vld [vmem:[#allocation4 + $0x5a8] ss:$16 sps:$4 sm:$0xff]  }
 0x1f4   :  { %3743 = vmatpush1.bf16.msra.mxu0 %v5773_v6  ;;  %3915 = vmatpush1.bf16.msra.mxu1 %v5776_v7 }
 0x1f5   :  { %3744 = vmatprep.subr.bf16.mxu0 %v5781_v8  ;;  %3916 = vmatprep.subr.bf16.mxu1 %v5784_v9 }
 0x1f8   :  { %3745 = vmatpush1.bf16.msra.mxu0 %v5779_v10  ;;  %3917 = vmatpush1.bf16.msra.mxu1 %v5782_v11  ;;  %v5853_v10 = vld [vmem:[#allocation4 + $0x5c4] ss:$16 sps:$4 sm:$0xff]   ;;  %v5856_v11 = vld [vmem:[#allocation4 + $0x5cc] ss:$16 sps:$4 sm:$0xff]  }
 0x1f9   :  { %3746 = vmatprep.subr.bf16.mxu0 %v5787_v12  ;;  %3918 = vmatprep.subr.bf16.mxu1 %v5790_v19 }
 0x1fc   :  { %3747 = vmatpush1.bf16.msra.mxu0 %v5785_v20  ;;  %3919 = vmatpush1.bf16.msra.mxu1 %v5788_v52 }
 0x1fd   :  { %3748 = vmatprep.subr.bf16.mxu0 %v5793_v21  ;;  %3920 = vmatprep.subr.bf16.mxu1 %v5796_v22  ;;  %v5851_v21 = vld [vmem:[#allocation4 + $0x5c0] ss:$16 sps:$4 sm:$0xff]  }
 0x200   :  { %3749 = vmatpush1.bf16.msra.mxu0 %v5791_v23  ;;  %3921 = vmatpush1.bf16.msra.mxu1 %v5794_v24 }
 0x201   :  { %3750 = vmatprep.subr.bf16.mxu0 %v5799_v25  ;;  %3922 = vmatprep.subr.bf16.mxu1 %v5802_v26  ;;  %v5854_v26 = vld [vmem:[#allocation4 + $0x5c8] ss:$16 sps:$4 sm:$0xff]  }
 0x204   :  { %3751 = vmatpush1.bf16.msra.mxu0 %v5797_v27  ;;  %3923 = vmatpush1.bf16.msra.mxu1 %v5800_v28  ;;  %v5859_v27 = vld [vmem:[#allocation4 + $0x5e4] ss:$16 sps:$4 sm:$0xff]   ;;  %v5862_v28 = vld [vmem:[#allocation4 + $0x5ec] ss:$16 sps:$4 sm:$0xff]  }
 0x205   :  { %3752 = vmatprep.subr.bf16.mxu0 %v5805_v29  ;;  %3924 = vmatprep.subr.bf16.mxu1 %v5808_v30 }
 0x208   :  { %3753 = vmatpush1.bf16.msra.mxu0 %v5803_v31  ;;  %3925 = vmatpush1.bf16.msra.mxu1 %v5806_v32 }
 0x209   :  { %3754 = vmatprep.subr.bf16.mxu0 %v5811_v33  ;;  %3926 = vmatprep.subr.bf16.mxu1 %v5814_v34 }
 0x20c   :  { %3755 = vmatpush1.bf16.msra.mxu0 %v5809_v35  ;;  %3927 = vmatpush1.bf16.msra.mxu1 %v5812_v36  ;;  %v5857_v35 = vld [vmem:[#allocation4 + $0x5e0] ss:$16 sps:$4 sm:$0xff]   ;;  %v5860_v36 = vld [vmem:[#allocation4 + $0x5e8] ss:$16 sps:$4 sm:$0xff]  }
 0x20d   :  { %3756 = vmatprep.subr.bf16.mxu0 %v5817_v37  ;;  %3928 = vmatprep.subr.bf16.mxu1 %v5820_v38 }
 0x210   :  { %3757 = vmatpush1.bf16.msra.mxu0 %v5815_v39  ;;  %3929 = vmatpush1.bf16.msra.mxu1 %v5818_v40  ;;  %v5865_v40 = vld [vmem:[#allocation4 + $0x604] ss:$16 sps:$4 sm:$0xff]  }
 0x211   :  { %3758 = vmatprep.subr.bf16.mxu0 %v5823_v41  ;;  %3930 = vmatprep.subr.bf16.mxu1 %v5826_v42 }
 0x214   :  { %3759 = vmatpush1.bf16.msra.mxu0 %v5821_v43  ;;  %3931 = vmatpush1.bf16.msra.mxu1 %v5824_v44  ;;  %v5868_v43 = vld [vmem:[#allocation4 + $0x60c] ss:$16 sps:$4 sm:$0xff]  }
 0x215   :  { %3760 = vmatprep.subr.bf16.mxu0 %v5829_v56  ;;  %3932 = vmatprep.subr.bf16.mxu1 %v5832_v45 }
 0x218   :  { %3761 = vmatpush1.bf16.msra.mxu0 %v5827_v46  ;;  %3933 = vmatpush1.bf16.msra.mxu1 %v5830_v47 }
 0x219   :  { %3762 = vmatprep.subr.bf16.mxu0 %v5835_v48  ;;  %3934 = vmatprep.subr.bf16.mxu1 %v5838_v49 }
 0x21c   :  { %3763 = vmatpush1.bf16.msra.mxu0 %v5833_v50  ;;  %3935 = vmatpush1.bf16.msra.mxu1 %v5836_v51 }
 0x21d   :  { %3764 = vmatprep.subr.bf16.mxu0 %v5841_v53  ;;  %3936 = vmatprep.subr.bf16.mxu1 %v5844_v54 }
 0x220   :  { %3765 = vmatpush1.bf16.msra.mxu0 %v5839_v60  ;;  %3937 = vmatpush1.bf16.msra.mxu1 %v5842_v61  ;;  %v5874_v60 = vld [vmem:[#allocation4 + $0x62c] ss:$16 sps:$4 sm:$0xff]   ;;  %v5869_v61 = vld [vmem:[#allocation4 + $0x620] ss:$16 sps:$4 sm:$0xff]  }
 0x221   :  { %3766 = vmatprep.subr.bf16.mxu0 %v5847_v62  ;;  %3938 = vmatprep.subr.bf16.mxu1 %v5850_v63  ;;  %v5872_v62 = vld [vmem:[#allocation4 + $0x628] ss:$16 sps:$4 sm:$0xff]   ;;  %v5877_v63 = vld [vmem:[#allocation4 + $0x644] ss:$16 sps:$4 sm:$0xff]  }
 0x222   :  { %v1945_v6 = vpop.f32.mrb[4].mxu0  ;;  %v2031_v8 = vpop.f32.mrb[4].mxu1 }
 0x223   :  { %v5491_v7 = vadd.f32 %v1945_v6, %v375_v0  ;;  %v1947_v9 = vpop.f32.mrb[5].mxu0  ;;  %v5495_v12 = vadd.f32 %v2031_v8, %v383_v1  ;;  %v2033_v20 = vpop.f32.mrb[5].mxu1  ;;  %v5884_v6 = vld [vmem:[#allocation4 + $0x668] ss:$16 sps:$4 sm:$0xff]   ;;  %v5892_v8 = vld [vmem:[#allocation4 + $0x68c] ss:$16 sps:$4 sm:$0xff]  }
 0x224   :  { %v5492_v19 = vadd.f32 %v1947_v9, %v379_v2  ;;  %v1949_v52 = vpop.f32.mrb[6].mxu0  ;;  %v5496_v23 = vadd.f32 %v2033_v20, %v387_v3  ;;  %v2035_v24 = vpop.f32.mrb[6].mxu1  ;;  %3767 = vmatpush1.bf16.msra.mxu0 %v5845_v4  ;;  %3939 = vmatpush1.bf16.msra.mxu1 %v5848_v5  ;;  %v5886_v4 = vld [vmem:[#allocation4 + $0x66c] ss:$16 sps:$4 sm:$0xff]   ;;  %v5881_v5 = vld [vmem:[#allocation4 + $0x660] ss:$16 sps:$4 sm:$0xff]  }
 0x225   :  { %v2060_v22 = vmul.f32 0.01, %v5491_v7  ;;  %v5493_v15 = vadd.f32 %v1949_v52, %v375_v0  ;;  %v1951_v25 = vpop.f32.mrb[7].mxu0  ;;  %vm2044_vm8 = vcmp.gt.f32.partialorder %v5491_v7, 0.0  ;;  %vm2046_vm9 = vcmp.gt.f32.partialorder %v5495_v12, 0.0  ;;  %v2037_v30 = vpop.f32.mrb[7].mxu1  ;;  %3768 = vmatprep.subr.bf16.mxu0 %v5853_v10  ;;  %3940 = vmatprep.subr.bf16.mxu1 %v5856_v11 }
 0x226   :  { %v2062_v29 = vmul.f32 0.01, %v5495_v12  ;;  %vm2045_vm10 = vcmp.gt.f32.partialorder %v5492_v19, 0.0  ;;  %v2061_v31 = vmul.f32 0.01, %v5492_v19  ;;  %v5497_v33 = vadd.f32 %v2035_v24, %v383_v1 }
 0x227   :  { %vm2052_vm11 = vcmp.gt.f32.partialorder %v5493_v15, 0.0  ;;  %v2068_v32 = vmul.f32 0.01, %v5493_v15  ;;  %v5494_v34 = vadd.f32 %v1951_v25, %v379_v2  ;;  %v2076_v37 = vsel %vm2044_vm8, %v5491_v7, %v2060_v22  ;;  %v5880_v0 = vld [vmem:[#allocation4 + $0x64c] ss:$16 sps:$4 sm:$0xff]  }
 0x228   :  { %vm2047_vm12 = vcmp.gt.f32.partialorder %v5496_v23, 0.0  ;;  %v2063_v38 = vmul.f32 0.01, %v5496_v23  ;;  %v5498_v39 = vadd.f32 %v2037_v30, %v387_v3  ;;  %vm2054_vm13 = vcmp.gt.f32.partialorder %v5497_v33, 0.0  ;;  %3769 = vmatpush1.bf16.msra.mxu0 %v5851_v21  ;;  %3941 = vmatpush1.bf16.msra.mxu1 %v5854_v26  ;;  %v5875_v1 = vld [vmem:[#allocation4 + $0x640] ss:$16 sps:$4 sm:$0xff]  }
 0x229   :  { %v2084_v41 = vsel %vm2052_vm11, %v5493_v15, %v2068_v32  ;;  %v2070_v42 = vmul.f32 0.01, %v5497_v33  ;;  %vm2053_vm14 = vcmp.gt.f32.partialorder %v5494_v34, 0.0  ;;  %v2069_v56 = vmul.f32 0.01, %v5494_v34  ;;  %3770 = vmatprep.subr.bf16.mxu0 %v5859_v27  ;;  %3942 = vmatprep.subr.bf16.mxu1 %v5862_v28 }
 0x22a   :  { %v2092_v44 = vpack.c.bf16 %v2084_v41, %v2076_v37  ;;  %vm2055_vm15 = vcmp.gt.f32.partialorder %v5498_v39, 0.0  ;;  %v2071_v45 = vmul.f32 0.01, %v5498_v39  ;;  %v2078_v46 = vsel %vm2046_vm9, %v5495_v12, %v2062_v29  ;;  %v5878_v2 = vld [vmem:[#allocation4 + $0x648] ss:$16 sps:$4 sm:$0xff]  }
 0x22b   :  { %v2086_v47 = vsel %vm2054_vm13, %v5497_v33, %v2070_v42  ;;  %v2077_v48 = vsel %vm2045_vm10, %v5492_v19, %v2061_v31  ;;  %v2085_v50 = vsel %vm2053_vm14, %v5494_v34, %v2069_v56  ;;  %v2079_v51 = vsel %vm2047_vm12, %v5496_v23, %v2063_v38  ;;  %v5883_v3 = vld [vmem:[#allocation4 + $0x664] ss:$16 sps:$4 sm:$0xff]   ;;  %v5887_v9 = vld [vmem:[#allocation4 + $0x680] ss:$16 sps:$4 sm:$0xff]   ;;  %v5890_v10 = vld [vmem:[#allocation4 + $0x688] ss:$16 sps:$4 sm:$0xff]  }
 0x22c   :  { %v6368_v49 = vpack.c.bf16 %v2086_v47, %v2078_v46  ;;  %v2087_v53 = vsel %vm2055_vm15, %v5498_v39, %v2071_v45  ;;  %3771 = vmatpush1.bf16.msra.mxu0 %v5857_v35  ;;  %3943 = vmatpush1.bf16.msra.mxu1 %v5860_v36  ;;  %v2093_v54 = vpack.c.bf16 %v2085_v50, %v2077_v48  ;;  %v5889_v7 = vld [vmem:[#allocation4 + $0x684] ss:$16 sps:$4 sm:$0xff]   ;;  %v5898_v12 = vld [vmem:[#allocation4 + $0x6ac] ss:$16 sps:$4 sm:$0xff]   ;;  %v5893_v19 = vld [vmem:[#allocation4 + $0x6a0] ss:$16 sps:$4 sm:$0xff]  }
 0x22d   :  { %v2095_v58 = vpack.c.bf16 %v2087_v53, %v2079_v51  ;;  %3783 = vmatprep.subr.bf16.mxu0 %v5865_v40  ;;  %3955 = vmatprep.subr.bf16.mxu1 %v5868_v43  ;;  %v5895_v11 = vld [vmem:[#allocation4 + $0x6a4] ss:$16 sps:$4 sm:$0xff]   ;;  %v5896_v20 = vld [vmem:[#allocation4 + $0x6a8] ss:$16 sps:$4 sm:$0xff]   ;;  %v5904_v21 = vld [vmem:[#allocation4 + $0x6cc] ss:$16 sps:$4 sm:$0xff]  }
 0x22e   :  { %3772 = vmatprep.mubr.bf16.mxu0 %v2093_v54  ;;  %3944 = vmatprep.mubr.bf16.mxu1 %v2093_v54  ;;  %v5901_v52 = vld [vmem:[#allocation4 + $0x6c4] ss:$16 sps:$4 sm:$0xff]   ;;  %v5899_v22 = vld [vmem:[#allocation4 + $0x6c0] ss:$16 sps:$4 sm:$0xff]   ;;  %v5902_v23 = vld [vmem:[#allocation4 + $0x6c8] ss:$16 sps:$4 sm:$0xff]  }
 0x22f   :  { %3773 = vmatmul.mubr.bf16.vlgmr.msra.gmra.mrb[8].mxu0 %v2092_v44  ;;  %3945 = vmatmul.mubr.bf16.vlgmr.msra.gmra.mrb[8].mxu1 %v2092_v44  ;;  %v5907_v15 = vld [vmem:[#allocation4 + $0x6e4] ss:$16 sps:$4 sm:$0xff]   ;;  %v5910_v24 = vld [vmem:[#allocation4 + $0x6ec] ss:$16 sps:$4 sm:$0xff]   ;;  %v5905_v25 = vld [vmem:[#allocation4 + $0x6e0] ss:$16 sps:$4 sm:$0xff]  }
 0x230   :  { %3784 = vmatpush1.bf16.msra.mxu0 %v5863_v55  ;;  %3956 = vmatpush1.bf16.msra.mxu1 %v5866_v57  ;;  %v5908_v26 = vld [vmem:[#allocation4 + $0x6e8] ss:$16 sps:$4 sm:$0xff]   ;;  %v5913_v27 = vld [vmem:[#allocation4 + $0x704] ss:$16 sps:$4 sm:$0xff]   ;;  %v5916_v28 = vld [vmem:[#allocation4 + $0x70c] ss:$16 sps:$4 sm:$0xff]  }
 0x231   :  { %3815 = vmatprep.mubr.bf16.mxu0 %v2095_v58  ;;  %3987 = vmatprep.mubr.bf16.mxu1 %v2095_v58  ;;  %v5911_v29 = vld [vmem:[#allocation4 + $0x700] ss:$16 sps:$4 sm:$0xff]   ;;  %v5914_v30 = vld [vmem:[#allocation4 + $0x708] ss:$16 sps:$4 sm:$0xff]   ;;  %v5919_v31 = vld [vmem:[#allocation4 + $0x724] ss:$16 sps:$4 sm:$0xff]  }
 0x232   :  { %3785 = vmatprep.subr.bf16.mxu0 %v5871_v59  ;;  %3957 = vmatprep.subr.bf16.mxu1 %v5874_v60  ;;  %v5922_v32 = vld [vmem:[#allocation4 + $0x72c] ss:$16 sps:$4 sm:$0xff]   ;;  %v5917_v33 = vld [vmem:[#allocation4 + $0x720] ss:$16 sps:$4 sm:$0xff]   ;;  %v5920_v34 = vld [vmem:[#allocation4 + $0x728] ss:$16 sps:$4 sm:$0xff]  }
 0x233   :  { %v5925_v35 = vld [vmem:[#allocation4 + $0x744] ss:$16 sps:$4 sm:$0xff]   ;;  %v5928_v36 = vld [vmem:[#allocation4 + $0x74c] ss:$16 sps:$4 sm:$0xff]   ;;  %v5923_v37 = vld [vmem:[#allocation4 + $0x740] ss:$16 sps:$4 sm:$0xff]  }
 0x234   :  { %3786 = vmatpush1.bf16.msra.mxu0 %v5869_v61  ;;  %3958 = vmatpush1.bf16.msra.mxu1 %v5872_v62  ;;  %v5926_v38 = vld [vmem:[#allocation4 + $0x748] ss:$16 sps:$4 sm:$0xff]   ;;  %v5931_v39 = vld [vmem:[#allocation4 + $0x764] ss:$16 sps:$4 sm:$0xff]   ;;  %v5934_v40 = vld [vmem:[#allocation4 + $0x76c] ss:$16 sps:$4 sm:$0xff]  }
 0x235   :  { %3787 = vmatprep.subr.bf16.mxu0 %v5877_v63  ;;  %3959 = vmatprep.subr.bf16.mxu1 %v5880_v0  ;;  %v5929_v41 = vld [vmem:[#allocation4 + $0x760] ss:$16 sps:$4 sm:$0xff]   ;;  %v5932_v42 = vld [vmem:[#allocation4 + $0x768] ss:$16 sps:$4 sm:$0xff]   ;;  %v5937_v43 = vld [vmem:[#allocation4 + $0x784] ss:$16 sps:$4 sm:$0xff]  }
 0x236   :  { %v5940_v44 = vld [vmem:[#allocation4 + $0x78c] ss:$16 sps:$4 sm:$0xff]   ;;  %v5935_v56 = vld [vmem:[#allocation4 + $0x780] ss:$16 sps:$4 sm:$0xff]   ;;  %v5938_v45 = vld [vmem:[#allocation4 + $0x788] ss:$16 sps:$4 sm:$0xff]  }
 0x237   :  { %v5943_v46 = vld [vmem:[#allocation4 + $0x7a4] ss:$16 sps:$4 sm:$0xff]   ;;  %v5946_v47 = vld [vmem:[#allocation4 + $0x7ac] ss:$16 sps:$4 sm:$0xff]   ;;  %v5941_v48 = vld [vmem:[#allocation4 + $0x7a0] ss:$16 sps:$4 sm:$0xff]  }
 0x238   :  { %3788 = vmatpush1.bf16.msra.mxu0 %v5875_v1  ;;  %3960 = vmatpush1.bf16.msra.mxu1 %v5878_v2  ;;  %v5944_v50 = vld [vmem:[#allocation4 + $0x7a8] ss:$16 sps:$4 sm:$0xff]   ;;  %v5949_v51 = vld [vmem:[#allocation4 + $0x7c4] ss:$16 sps:$4 sm:$0xff]   ;;  %v5952_v53 = vld [vmem:[#allocation4 + $0x7cc] ss:$16 sps:$4 sm:$0xff]  }
 0x239   :  { %3789 = vmatprep.subr.bf16.mxu0 %v5883_v3  ;;  %3961 = vmatprep.subr.bf16.mxu1 %v5886_v4  ;;  %v5947_v54 = vld [vmem:[#allocation4 + $0x7c0] ss:$16 sps:$4 sm:$0xff]   ;;  %v5950_v55 = vld [vmem:[#allocation4 + $0x7c8] ss:$16 sps:$4 sm:$0xff]   ;;  %v5955_v57 = vld [vmem:[#allocation4 + $0x7e4] ss:$16 sps:$4 sm:$0xff]  }
 0x23a   :  { %v5958_v58 = vld [vmem:[#allocation4 + $0x7ec] ss:$16 sps:$4 sm:$0xff]   ;;  %v5953_v59 = vld [vmem:[#allocation4 + $0x7e0] ss:$16 sps:$4 sm:$0xff]   ;;  %v5956_v60 = vld [vmem:[#allocation4 + $0x7e8] ss:$16 sps:$4 sm:$0xff]  }
 0x23b   :  { %v5961_v61 = vld [vmem:[#allocation6 + $0x4] ss:$8 sps:$4 sm:$0xff]   ;;  %v5959_v62 = vld [vmem:[#allocation6] ss:$8 sps:$4 sm:$0xff]   ;;  %v5964_v63 = vld [vmem:[#allocation6 + $0x14] ss:$8 sps:$4 sm:$0xff]  }
 0x23c   :  { %3790 = vmatpush1.bf16.msra.mxu0 %v5881_v5  ;;  %3962 = vmatpush1.bf16.msra.mxu1 %v5884_v6  ;;  %v5962_v0 = vld [vmem:[#allocation6 + $0x10] ss:$8 sps:$4 sm:$0xff]   ;;  %v5967_v1 = vld [vmem:[#allocation6 + $0x24] ss:$8 sps:$4 sm:$0xff]   ;;  %v5965_v2 = vld [vmem:[#allocation6 + $0x20] ss:$8 sps:$4 sm:$0xff]  }
 0x23d   :  { %3791 = vmatprep.subr.bf16.mxu0 %v5889_v7  ;;  %3963 = vmatprep.subr.bf16.mxu1 %v5892_v8  ;;  %v5970_v3 = vld [vmem:[#allocation6 + $0x34] ss:$8 sps:$4 sm:$0xff]   ;;  %v5968_v4 = vld [vmem:[#allocation6 + $0x30] ss:$8 sps:$4 sm:$0xff]   ;;  %v5973_v5 = vld [vmem:[#allocation6 + $0x44] ss:$8 sps:$4 sm:$0xff]  }
 0x23e   :  { %v5971_v6 = vld [vmem:[#allocation6 + $0x40] ss:$8 sps:$4 sm:$0xff]   ;;  %v5976_v7 = vld [vmem:[#allocation6 + $0x54] ss:$8 sps:$4 sm:$0xff]   ;;  %v5974_v8 = vld [vmem:[#allocation6 + $0x50] ss:$8 sps:$4 sm:$0xff]  }
 0x23f   :  { %vm6189_vm12 = vmmov 0  }
 0x240   :  { %3792 = vmatpush1.bf16.msra.mxu0 %v5887_v9  ;;  %3964 = vmatpush1.bf16.msra.mxu1 %v5890_v10  ;;  %v5977_v9 = vld [vmem:[#allocation6 + $0x60] ss:$8 sps:$4 sm:$0xff]   ;;  %v5982_v10 = vld [vmem:[#allocation6 + $0x74] ss:$8 sps:$4 sm:$0xff]  }
 0x241   :  { %3793 = vmatprep.subr.bf16.mxu0 %v5895_v11  ;;  %3965 = vmatprep.subr.bf16.mxu1 %v5898_v12  ;;  %v5980_v11 = vld [vmem:[#allocation6 + $0x70] ss:$8 sps:$4 sm:$0xff]   ;;  %v5985_v12 = vld [vmem:[#allocation6 + $0x84] ss:$8 sps:$4 sm:$0xff]  }
 0x244   :  { %3794 = vmatpush1.bf16.msra.mxu0 %v5893_v19  ;;  %3966 = vmatpush1.bf16.msra.mxu1 %v5896_v20  ;;  %v5983_v19 = vld [vmem:[#allocation6 + $0x80] ss:$8 sps:$4 sm:$0xff]   ;;  %v5988_v20 = vld [vmem:[#allocation6 + $0x94] ss:$8 sps:$4 sm:$0xff]  }
 0x245   :  { %3795 = vmatprep.subr.bf16.mxu0 %v5901_v52  ;;  %3967 = vmatprep.subr.bf16.mxu1 %v5904_v21  ;;  %v5986_v52 = vld [vmem:[#allocation6 + $0x90] ss:$8 sps:$4 sm:$0xff]   ;;  %v5991_v21 = vld [vmem:[#allocation6 + $0xa4] ss:$8 sps:$4 sm:$0xff]  }
 0x248   :  { %3796 = vmatpush1.bf16.msra.mxu0 %v5899_v22  ;;  %3968 = vmatpush1.bf16.msra.mxu1 %v5902_v23  ;;  %v5989_v22 = vld [vmem:[#allocation6 + $0xa0] ss:$8 sps:$4 sm:$0xff]   ;;  %v5994_v23 = vld [vmem:[#allocation6 + $0xb4] ss:$8 sps:$4 sm:$0xff]  }
 0x249   :  { %3797 = vmatprep.subr.bf16.mxu0 %v5907_v15  ;;  %3969 = vmatprep.subr.bf16.mxu1 %v5910_v24  ;;  %v5992_v15 = vld [vmem:[#allocation6 + $0xb0] ss:$8 sps:$4 sm:$0xff]   ;;  %v5997_v24 = vld [vmem:[#allocation6 + $0xc4] ss:$8 sps:$4 sm:$0xff]  }
 0x24c   :  { %3798 = vmatpush1.bf16.msra.mxu0 %v5905_v25  ;;  %3970 = vmatpush1.bf16.msra.mxu1 %v5908_v26  ;;  %v5995_v25 = vld [vmem:[#allocation6 + $0xc0] ss:$8 sps:$4 sm:$0xff]   ;;  %v6000_v26 = vld [vmem:[#allocation6 + $0xd4] ss:$8 sps:$4 sm:$0xff]  }
 0x24d   :  { %3799 = vmatprep.subr.bf16.mxu0 %v5913_v27  ;;  %3971 = vmatprep.subr.bf16.mxu1 %v5916_v28  ;;  %v5998_v27 = vld [vmem:[#allocation6 + $0xd0] ss:$8 sps:$4 sm:$0xff]   ;;  %v6003_v28 = vld [vmem:[#allocation6 + $0xe4] ss:$8 sps:$4 sm:$0xff]  }
 0x250   :  { %3800 = vmatpush1.bf16.msra.mxu0 %v5911_v29  ;;  %3972 = vmatpush1.bf16.msra.mxu1 %v5914_v30  ;;  %v6001_v29 = vld [vmem:[#allocation6 + $0xe0] ss:$8 sps:$4 sm:$0xff]   ;;  %v6006_v30 = vld [vmem:[#allocation6 + $0xf4] ss:$8 sps:$4 sm:$0xff]  }
 0x251   :  { %3801 = vmatprep.subr.bf16.mxu0 %v5919_v31  ;;  %3973 = vmatprep.subr.bf16.mxu1 %v5922_v32  ;;  %v6004_v31 = vld [vmem:[#allocation6 + $0xf0] ss:$8 sps:$4 sm:$0xff]   ;;  %v6009_v32 = vld [vmem:[#allocation6 + $0x104] ss:$8 sps:$4 sm:$0xff]  }
 0x254   :  { %3802 = vmatpush1.bf16.msra.mxu0 %v5917_v33  ;;  %3974 = vmatpush1.bf16.msra.mxu1 %v5920_v34  ;;  %v6055_v33 = vld [vmem:[#allocation7 + $0x40] sm:$0xff]  }
 0x255   :  { %3803 = vmatprep.subr.bf16.mxu0 %v5925_v35  ;;  %3975 = vmatprep.subr.bf16.mxu1 %v5928_v36  ;;  %v6056_v34 = vld [vmem:[#allocation7] sm:$0xff]   ;;  %v6057_v35 = vld [vmem:[#allocation7 + $0x48] sm:$0xff]  }
 0x256   :  { %v6058_v36 = vld [vmem:[#allocation7 + $0x8] sm:$0xff]  }
 0x258   :  { %3804 = vmatpush1.bf16.msra.mxu0 %v5923_v37  ;;  %3976 = vmatpush1.bf16.msra.mxu1 %v5926_v38  ;;  %v6059_v37 = vld [vmem:[#allocation7 + $0x50] sm:$0xff]  }
 0x259   :  { %3805 = vmatprep.subr.bf16.mxu0 %v5931_v39  ;;  %3977 = vmatprep.subr.bf16.mxu1 %v5934_v40  ;;  %v6060_v38 = vld [vmem:[#allocation7 + $0x10] sm:$0xff]   ;;  %v6061_v39 = vld [vmem:[#allocation7 + $0x58] sm:$0xff]  }
 0x25a   :  { %v6062_v40 = vld [vmem:[#allocation7 + $0x18] sm:$0xff]  }
 0x25c   :  { %3806 = vmatpush1.bf16.msra.mxu0 %v5929_v41  ;;  %3978 = vmatpush1.bf16.msra.mxu1 %v5932_v42  ;;  %v6063_v41 = vld [vmem:[#allocation7 + $0x60] sm:$0xff]  }
 0x25d   :  { %3807 = vmatprep.subr.bf16.mxu0 %v5937_v43  ;;  %3979 = vmatprep.subr.bf16.mxu1 %v5940_v44  ;;  %v6064_v42 = vld [vmem:[#allocation7 + $0x20] sm:$0xff]  }
 0x25e   :  { %v2352_v43 = vld [vmem:[%s6438_s4] sm:$0xf] }
 0x25f   :  { %v2357_v44 = vrot.slane %v2352_v43, %v6328_v14 }
 0x260   :  { %3808 = vmatpush1.bf16.msra.mxu0 %v5935_v56  ;;  %3980 = vmatpush1.bf16.msra.mxu1 %v5938_v45  ;;  %v2365_v56 = vrot.slane %v2352_v43, %v366_v16  ;;  %v2361_v45 = vrot.slane %v2352_v43, %v6337_v17 }
 0x261   :  { %3809 = vmatprep.subr.bf16.mxu0 %v5943_v46  ;;  %3981 = vmatprep.subr.bf16.mxu1 %v5946_v47  ;;  %v2369_v46 = vrot.slane %v2352_v43, %v370_v18  ;;  %v6042_v43 = vld [vmem:[#allocation6 + $0x1b4] ss:$8 sps:$4 sm:$0xff]  }
 0x264   :  { %3810 = vmatpush1.bf16.msra.mxu0 %v5941_v48  ;;  %3982 = vmatpush1.bf16.msra.mxu1 %v5944_v50 }
 0x265   :  { %3811 = vmatprep.subr.bf16.mxu0 %v5949_v51  ;;  %3983 = vmatprep.subr.bf16.mxu1 %v5952_v53 }
 0x268   :  { %3812 = vmatpush1.bf16.msra.mxu0 %v5947_v54  ;;  %3984 = vmatpush1.bf16.msra.mxu1 %v5950_v55 }
 0x269   :  { %3813 = vmatprep.subr.bf16.mxu0 %v5955_v57  ;;  %3985 = vmatprep.subr.bf16.mxu1 %v5958_v58 }
 0x26c   :  { %3814 = vmatpush1.bf16.msra.mxu0 %v5953_v59  ;;  %3986 = vmatpush1.bf16.msra.mxu1 %v5956_v60 }
 0x26d   :  { %4422 = vmatprep.subr.bf16.mxu0 %v5961_v61  ;;  %5432 = vmatprep.subr.bf16.mxu1 %v6055_v33  ;;  %v6027_v33 = vld [vmem:[#allocation6 + $0x164] ss:$8 sps:$4 sm:$0xff]  }
 0x26f   :  { %3816 = vmatmul.mubr.bf16.vlgmr.msra.gmra.mrb[8].mxu0 %v6368_v49  ;;  %3988 = vmatmul.mubr.bf16.vlgmr.msra.gmra.mrb[8].mxu1 %v6368_v49  ;;  %v5979_v49 = vld [vmem:[#allocation6 + $0x64] ss:$8 sps:$4 sm:$0xff]  }
 0x270   :  { %4423 = vmatpush1.bf16.msra.mxu0 %v5959_v62  ;;  %5433 = vmatpush3.bf16.msra.mxu1 %v6056_v34  ;;  %v6025_v34 = vld [vmem:[#allocation6 + $0x160] ss:$8 sps:$4 sm:$0xff]  }
 0x271   :  { %4424 = vmatprep.subr.bf16.mxu0 %v5964_v63  ;;  %5434 = vmatprep.subr.bf16.mxu1 %v6057_v35  ;;  %v6030_v35 = vld [vmem:[#allocation6 + $0x174] ss:$8 sps:$4 sm:$0xff]  }
 0x274   :  { %4425 = vmatpush1.bf16.msra.mxu0 %v5962_v0  ;;  %5435 = vmatpush3.bf16.msra.mxu1 %v6058_v36  ;;  %v6028_v36 = vld [vmem:[#allocation6 + $0x170] ss:$8 sps:$4 sm:$0xff]  }
 0x275   :  { %4426 = vmatprep.subr.bf16.mxu0 %v5967_v1  ;;  %5436 = vmatprep.subr.bf16.mxu1 %v6059_v37  ;;  %v6033_v37 = vld [vmem:[#allocation6 + $0x184] ss:$8 sps:$4 sm:$0xff]  }
 0x278   :  { %4427 = vmatpush1.bf16.msra.mxu0 %v5965_v2  ;;  %5437 = vmatpush3.bf16.msra.mxu1 %v6060_v38  ;;  %v6031_v38 = vld [vmem:[#allocation6 + $0x180] ss:$8 sps:$4 sm:$0xff]  }
 0x279   :  { %4428 = vmatprep.subr.bf16.mxu0 %v5970_v3  ;;  %5438 = vmatprep.subr.bf16.mxu1 %v6061_v39  ;;  %v6036_v39 = vld [vmem:[#allocation6 + $0x194] ss:$8 sps:$4 sm:$0xff]  }
 0x27c   :  { %4429 = vmatpush1.bf16.msra.mxu0 %v5968_v4  ;;  %5439 = vmatpush3.bf16.msra.mxu1 %v6062_v40  ;;  %v6034_v40 = vld [vmem:[#allocation6 + $0x190] ss:$8 sps:$4 sm:$0xff]  }
 0x27d   :  { %4430 = vmatprep.subr.bf16.mxu0 %v5973_v5  ;;  %5440 = vmatprep.subr.bf16.mxu1 %v6063_v41  ;;  %v6039_v41 = vld [vmem:[#allocation6 + $0x1a4] ss:$8 sps:$4 sm:$0xff]  }
 0x280   :  { %4431 = vmatpush1.bf16.msra.mxu0 %v5971_v6  ;;  %5441 = vmatpush3.bf16.msra.mxu1 %v6064_v42  ;;  %v6037_v42 = vld [vmem:[#allocation6 + $0x1a0] ss:$8 sps:$4 sm:$0xff]  }
 0x281   :  { %4432 = vmatprep.subr.bf16.mxu0 %v5976_v7 }
 0x284   :  { %4433 = vmatpush1.bf16.msra.mxu0 %v5974_v8 }
 0x285   :  { %4434 = vmatprep.subr.bf16.mxu0 %v5979_v49 }
 0x288   :  { %4435 = vmatpush1.bf16.msra.mxu0 %v5977_v9 }
 0x289   :  { %4436 = vmatprep.subr.bf16.mxu0 %v5982_v10 }
 0x28c   :  { %4437 = vmatpush1.bf16.msra.mxu0 %v5980_v11 }
 0x28d   :  { %4438 = vmatprep.subr.bf16.mxu0 %v5985_v12 }
 0x290   :  { %4439 = vmatpush1.bf16.msra.mxu0 %v5983_v19 }
 0x291   :  { %4440 = vmatprep.subr.bf16.mxu0 %v5988_v20 }
 0x294   :  { %4441 = vmatpush1.bf16.msra.mxu0 %v5986_v52 }
 0x295   :  { %4442 = vmatprep.subr.bf16.mxu0 %v5991_v21 }
 0x298   :  { %4443 = vmatpush1.bf16.msra.mxu0 %v5989_v22  ;;  %v6007_v22 = vld [vmem:[#allocation6 + $0x100] ss:$8 sps:$4 sm:$0xff]  }
 0x299   :  { %4444 = vmatprep.subr.bf16.mxu0 %v5994_v23 }
 0x29c   :  { %4445 = vmatpush1.bf16.msra.mxu0 %v5992_v15  ;;  %v6012_v15 = vld [vmem:[#allocation6 + $0x114] ss:$8 sps:$4 sm:$0xff]  }
 0x29d   :  { %4446 = vmatprep.subr.bf16.mxu0 %v5997_v24  ;;  %v6010_v24 = vld [vmem:[#allocation6 + $0x110] ss:$8 sps:$4 sm:$0xff]  }
 0x2a0   :  { %4447 = vmatpush1.bf16.msra.mxu0 %v5995_v25  ;;  %v6015_v25 = vld [vmem:[#allocation6 + $0x124] ss:$8 sps:$4 sm:$0xff]  }
 0x2a1   :  { %4448 = vmatprep.subr.bf16.mxu0 %v6000_v26  ;;  %v6013_v26 = vld [vmem:[#allocation6 + $0x120] ss:$8 sps:$4 sm:$0xff]  }
 0x2a4   :  { %4449 = vmatpush1.bf16.msra.mxu0 %v5998_v27  ;;  %v6018_v27 = vld [vmem:[#allocation6 + $0x134] ss:$8 sps:$4 sm:$0xff]  }
 0x2a5   :  { %4450 = vmatprep.subr.bf16.mxu0 %v6003_v28  ;;  %v6016_v28 = vld [vmem:[#allocation6 + $0x130] ss:$8 sps:$4 sm:$0xff]  }
 0x2a8   :  { %4451 = vmatpush1.bf16.msra.mxu0 %v6001_v29  ;;  %v6021_v29 = vld [vmem:[#allocation6 + $0x144] ss:$8 sps:$4 sm:$0xff]  }
 0x2a9   :  { %4452 = vmatprep.subr.bf16.mxu0 %v6006_v30  ;;  %v6019_v30 = vld [vmem:[#allocation6 + $0x140] ss:$8 sps:$4 sm:$0xff]  }
 0x2ac   :  { %4453 = vmatpush1.bf16.msra.mxu0 %v6004_v31  ;;  %v6024_v31 = vld [vmem:[#allocation6 + $0x154] ss:$8 sps:$4 sm:$0xff]  }
 0x2ad   :  { %4465 = vmatprep.subr.bf16.mxu0 %v6009_v32  ;;  %v6022_v32 = vld [vmem:[#allocation6 + $0x150] ss:$8 sps:$4 sm:$0xff]  }
 0x342   :  { %v3817_v47 = vpop.f32.mrb[8].mxu0  ;;  %v3989_v48 = vpop.f32.mrb[8].mxu1 }
 0x343   :  { %v5499_v50 = vadd.f32 %v3817_v47, %v2357_v44  ;;  %v5503_v51 = vadd.f32 %v3989_v48, %v2365_v56  ;;  %v3819_v53 = vpop.f32.mrb[9].mxu0  ;;  %v3991_v54 = vpop.f32.mrb[9].mxu1  ;;  %v6046_v47 = vld [vmem:[#allocation6 + $0x1d0] ss:$8 sps:$4 sm:$0xff]   ;;  %v6051_v48 = vld [vmem:[#allocation6 + $0x1e4] ss:$8 sps:$4 sm:$0xff]  }
 0x344   :  { %v5500_v55 = vadd.f32 %v3819_v53, %v2361_v45  ;;  %v5504_v57 = vadd.f32 %v3991_v54, %v2369_v46  ;;  %v3821_v58 = vpop.f32.mrb[10].mxu0  ;;  %v3993_v59 = vpop.f32.mrb[10].mxu1  ;;  %v6052_v53 = vld [vmem:[#allocation6 + $0x1f0] ss:$8 sps:$4 sm:$0xff]   ;;  %v6065_v54 = vld [vmem:[#allocation7 + $0x68] sm:$0xff]  }
 0x345   :  { %vm3998_vm0 = vcmp.gt.f32.partialorder %v5499_v50, 0.0  ;;  %v4006_v60 = vmul.f32 0.01, %v5499_v50  ;;  %vm4000_vm1 = vcmp.gt.f32.partialorder %v5503_v51, 0.0  ;;  %v4008_v61 = vmul.f32 0.01, %v5503_v51  ;;  %5442 = vmatprep.subr.bf16.mxu1 %v6065_v54 }
 0x346   :  { %vm3999_vm2 = vcmp.gt.f32.partialorder %v5500_v55, 0.0  ;;  %v4007_v16 = vmul.f32 0.01, %v5500_v55  ;;  %vm4001_vm3 = vcmp.gt.f32.partialorder %v5504_v57, 0.0  ;;  %v4009_v62 = vmul.f32 0.01, %v5504_v57 }
 0x347   :  { %v5501_v13 = vadd.f32 %v3821_v58, %v2357_v44  ;;  %v5505_v18 = vadd.f32 %v3993_v59, %v2365_v56  ;;  %v3823_v63 = vpop.f32.mrb[11].mxu0  ;;  %v3995_v0 = vpop.f32.mrb[11].mxu1  ;;  %v4014_v1 = vsel %vm3998_vm0, %v5499_v50, %v4006_v60  ;;  %v6382_v2 = vsel %vm4000_vm1, %v5503_v51, %v4008_v61  ;;  %v6040_v44 = vld [vmem:[#allocation6 + $0x1b0] ss:$8 sps:$4 sm:$0xff]   ;;  %v6045_v56 = vld [vmem:[#allocation6 + $0x1c4] ss:$8 sps:$4 sm:$0xff]  }
 0x348   :  { %v5502_v3 = vadd.f32 %v3823_v63, %v2361_v45  ;;  %v5506_v4 = vadd.f32 %v3995_v0, %v2369_v46  ;;  %v4015_v10 = vsel %vm3999_vm2, %v5500_v55, %v4007_v16  ;;  %v4017_v11 = vsel %vm4001_vm3, %v5504_v57, %v4009_v62  ;;  %v6043_v45 = vld [vmem:[#allocation6 + $0x1c0] ss:$8 sps:$4 sm:$0xff]   ;;  %v6048_v46 = vld [vmem:[#allocation6 + $0x1d4] ss:$8 sps:$4 sm:$0xff]  }
 0x349   :  { %vm4002_vm4 = vcmp.gt.f32.partialorder %v5501_v13, 0.0  ;;  %v4010_v5 = vmul.f32 0.01, %v5501_v13  ;;  %vm4004_vm5 = vcmp.gt.f32.partialorder %v5505_v18, 0.0  ;;  %v4012_v6 = vmul.f32 0.01, %v5505_v18 }
 0x34a   :  { %vm4003_vm6 = vcmp.gt.f32.partialorder %v5502_v3, 0.0  ;;  %v4011_v7 = vmul.f32 0.01, %v5502_v3  ;;  %vm4005_vm7 = vcmp.gt.f32.partialorder %v5506_v4, 0.0  ;;  %v4013_v8 = vmul.f32 0.01, %v5506_v4 }
 0x34b   :  { %v4018_v49 = vsel %vm4002_vm4, %v5501_v13, %v4010_v5  ;;  %v6384_v9 = vsel %vm4004_vm5, %v5505_v18, %v4012_v6  ;;  %v6049_v50 = vld [vmem:[#allocation6 + $0x1e0] ss:$8 sps:$4 sm:$0xff]   ;;  %v6054_v51 = vld [vmem:[#allocation6 + $0x1f4] ss:$8 sps:$4 sm:$0xff]   ;;  %v6188_v61 = vmov 0.0  }
 0x34c   :  { %v4022_v12 = vpack.c.bf16 %v4018_v49, %v4014_v1  ;;  %v4024_v19 = vpack.c.bf16 %v6384_v9, %v6382_v2  ;;  %v4019_v20 = vsel %vm4003_vm6, %v5502_v3, %v4011_v7  ;;  %v4021_v52 = vsel %vm4005_vm7, %v5506_v4, %v4013_v8  ;;  %v6066_v55 = vld [vmem:[#allocation7 + $0x28] sm:$0xff]   ;;  %v6067_v57 = vld [vmem:[#allocation7 + $0x70] sm:$0xff]   ;;  %v6069_v59 = vld [vmem:[#allocation7 + $0x78] sm:$0xff]  }
 0x34d   :  { %v4023_v21 = vpack.c.bf16 %v4019_v20, %v4015_v10  ;;  %v4025_v23 = vpack.c.bf16 %v4021_v52, %v4017_v11  ;;  %5443 = vmatpush3.bf16.msra.mxu1 %v6066_v55  ;;  %v6068_v58 = vld [vmem:[#allocation7 + $0x30] sm:$0xff]   ;;  %v6070_v60 = vld [vmem:[#allocation7 + $0x38] sm:$0xff]   ;;  %v4090_v16 = vld [vmem:[%s6440_s6] sm:$0x3] }
 0x34e   :  { %5444 = vmatprep.subr.bf16.mxu1 %v6067_v57  ;;  %v4095_v62 = vrot.slane %v4090_v16, %v6328_v14  ;;  %v4099_v13 = vrot.slane %v4090_v16, %v6337_v17  ;;  %v6072_v20 = vld [vmem:[%s6443_s9 + $0x8] sm:$0xff]   ;;  %v6073_v52 = vld [vmem:[%s6443_s9 + $0x10] sm:$0xff]  }
 0x34f   :  { %4454 = vmatprep.mubr.bf16.mxu0 %v4023_v21  ;;  %v6074_v21 = vld [vmem:[%s6443_s9 + $0x18] sm:$0xff]  }
 0x350   :  { %4455 = vmatmul.mubr.bf16.vlgmr.msra.gmra.mrb[12].mxu0 %v4022_v12 }
 0x351   :  { %4466 = vmatpush1.bf16.msra.mxu0 %v6007_v22  ;;  %4497 = vmatprep.mubr.bf16.mxu0 %v4025_v23  ;;  %v6075_v22 = vld [vmem:[%s6443_s9 + $0x20] sm:$0xff]   ;;  %v6076_v23 = vld [vmem:[%s6443_s9 + $0x28] sm:$0xff]  }
 0x352   :  { %4467 = vmatprep.subr.bf16.mxu0 %v6012_v15  ;;  %5445 = vmatpush3.bf16.msra.mxu1 %v6068_v58  ;;  %v6077_v15 = vld [vmem:[%s6443_s9 + $0x30] sm:$0xff]  }
 0x353   :  { %5446 = vmatprep.subr.bf16.mxu1 %v6069_v59 }
 0x355   :  { %4468 = vmatpush1.bf16.msra.mxu0 %v6010_v24  ;;  %v6078_v24 = vld [vmem:[%s6443_s9 + $0x38] sm:$0xff]  }
 0x356   :  { %4469 = vmatprep.subr.bf16.mxu0 %v6015_v25  ;;  %5447 = vmatpush3.bf16.msra.mxu1 %v6070_v60 }
 0x357   :  { %5463 = vmatprep.subr.bf16.mxu1 %v6188_v61 }
 0x359   :  { %4470 = vmatpush1.bf16.msra.mxu0 %v6013_v26  ;;  %v5406_v26 = vld [vmem:[%s6442_s8] ss:$0 sm:$0xff] }
 0x35a   :  { %4471 = vmatprep.subr.bf16.mxu0 %v6018_v27 }
 0x35d   :  { %4472 = vmatpush1.bf16.msra.mxu0 %v6016_v28 }
 0x35e   :  { %4473 = vmatprep.subr.bf16.mxu0 %v6021_v29 }
 0x361   :  { %4474 = vmatpush1.bf16.msra.mxu0 %v6019_v30 }
 0x362   :  { %4475 = vmatprep.subr.bf16.mxu0 %v6024_v31 }
 0x365   :  { %4476 = vmatpush1.bf16.msra.mxu0 %v6022_v32 }
 0x366   :  { %4477 = vmatprep.subr.bf16.mxu0 %v6027_v33 }
 0x369   :  { %4478 = vmatpush1.bf16.msra.mxu0 %v6025_v34 }
 0x36a   :  { %4479 = vmatprep.subr.bf16.mxu0 %v6030_v35 }
 0x36d   :  { %4480 = vmatpush1.bf16.msra.mxu0 %v6028_v36 }
 0x36e   :  { %4481 = vmatprep.subr.bf16.mxu0 %v6033_v37 }
 0x371   :  { %4482 = vmatpush1.bf16.msra.mxu0 %v6031_v38 }
 0x372   :  { %4483 = vmatprep.subr.bf16.mxu0 %v6036_v39  ;;  %v5423_v39 = vld [vmem:[%s6444_s10] ss:$0 sm:$0xff] }
 0x375   :  { %4484 = vmatpush1.bf16.msra.mxu0 %v6034_v40 }
 0x376   :  { %4485 = vmatprep.subr.bf16.mxu0 %v6039_v41 }
 0x379   :  { %4486 = vmatpush1.bf16.msra.mxu0 %v6037_v42 }
 0x37a   :  { %4487 = vmatprep.subr.bf16.mxu0 %v6042_v43 }
 0x37d   :  { %4488 = vmatpush1.bf16.msra.mxu0 %v6040_v44 }
 0x37e   :  { %4489 = vmatprep.subr.bf16.mxu0 %v6045_v56 }
 0x381   :  { %4490 = vmatpush1.bf16.msra.mxu0 %v6043_v45 }
 0x382   :  { %4491 = vmatprep.subr.bf16.mxu0 %v6048_v46 }
 0x385   :  { %4492 = vmatpush1.bf16.msra.mxu0 %v6046_v47 }
 0x386   :  { %4493 = vmatprep.subr.bf16.mxu0 %v6051_v48 }
 0x389   :  { %4494 = vmatpush1.bf16.msra.mxu0 %v6049_v50 }
 0x38a   :  { %4495 = vmatprep.subr.bf16.mxu0 %v6054_v51 }
 0x38d   :  { %4496 = vmatpush1.bf16.msra.mxu0 %v6052_v53 }
 0x390   :  { %4498 = vmatmul.mubr.bf16.vlgmr.msra.gmra.mrb[12].mxu0 %v4024_v19  ;;  %v6071_v19 = vld [vmem:[%s6443_s9] sm:$0xff]  }
 0x463   :  { %v4499_v18 = vpop.f32.mrb[12].mxu0 }
 0x464   :  { %v5507_v63 = vadd.f32 %v4499_v18, %v4095_v62  ;;  %v4501_v0 = vpop.f32.mrb[13].mxu0 }
 0x465   :  { %v5508_v1 = vadd.f32 %v4501_v0, %v4099_v13  ;;  %v4503_v2 = vpop.f32.mrb[14].mxu0 }
 0x466   :  { %v4512_v3 = vmul.f32 0.01, %v5507_v63  ;;  %v5509_v4 = vadd.f32 %v4503_v2, %v4095_v62  ;;  %v4505_v5 = vpop.f32.mrb[15].mxu0  ;;  %vm4508_vm8 = vcmp.gt.f32.partialorder %v5507_v63, 0.0 }
 0x467   :  { %v4513_v6 = vmul.f32 0.01, %v5508_v1  ;;  %v5510_v7 = vadd.f32 %v4505_v5, %v4099_v13  ;;  %vm4509_vm9 = vcmp.gt.f32.partialorder %v5508_v1, 0.0 }
 0x468   :  { %vm4510_vm10 = vcmp.gt.f32.partialorder %v5509_v4, 0.0  ;;  %v4514_v8 = vmul.f32 0.01, %v5509_v4  ;;  %v4516_v9 = vsel %vm4508_vm8, %v5507_v63, %v4512_v3 }
 0x469   :  { %vm4511_vm11 = vcmp.gt.f32.partialorder %v5510_v7, 0.0  ;;  %v4515_v49 = vmul.f32 0.01, %v5510_v7  ;;  %v4517_v17 = vsel %vm4509_vm9, %v5508_v1, %v4513_v6 }
 0x46a   :  { %v4518_v14 = vsel %vm4510_vm10, %v5509_v4, %v4514_v8 }
 0x46b   :  { %v4520_v10 = vpack.c.bf16 %v4518_v14, %v4516_v9  ;;  %v4519_v11 = vsel %vm4511_vm11, %v5510_v7, %v4515_v49 }
 0x46c   :  { %v4521_v12 = vpack.c.bf16 %v4519_v11, %v4517_v17 }
 0x46e   :  { %4689 = vmatprep.mubr.bf16.mxu1 %v4521_v12 }
 0x46f   :  { %4690 = vmatmul.mubr.bf16.vlgmr.msra.gmra.mrb[12].mxu1 %v4520_v10 }
 0x470   :  { %5464 = vmatpush3.bf16.msra.mxu1 %v6071_v19  ;;  %5479 = vmatprep.mubr.msk.bf16.mxu1 %vm6189_vm12, %v6188_v61 }
 0x471   :  { %5465 = vmatprep.subr.bf16.mxu1 %v6188_v61 }
 0x474   :  { %5466 = vmatpush3.bf16.msra.mxu1 %v6072_v20 }
 0x475   :  { %5467 = vmatprep.subr.bf16.mxu1 %v6188_v61 }
 0x478   :  { %5468 = vmatpush3.bf16.msra.mxu1 %v6073_v52 }
 0x479   :  { %5469 = vmatprep.subr.bf16.mxu1 %v6188_v61 }
 0x47c   :  { %5470 = vmatpush3.bf16.msra.mxu1 %v6074_v21 }
 0x47d   :  { %5471 = vmatprep.subr.bf16.mxu1 %v6188_v61 }
 0x480   :  { %5472 = vmatpush3.bf16.msra.mxu1 %v6075_v22 }
 0x481   :  { %5473 = vmatprep.subr.bf16.mxu1 %v6188_v61 }
 0x484   :  { %5474 = vmatpush3.bf16.msra.mxu1 %v6076_v23 }
 0x485   :  { %5475 = vmatprep.subr.bf16.mxu1 %v6188_v61 }
 0x488   :  { %5476 = vmatpush3.bf16.msra.mxu1 %v6077_v15 }
 0x489   :  { %5477 = vmatprep.subr.bf16.mxu1 %v6188_v61 }
 0x48c   :  { %5478 = vmatpush3.bf16.msra.mxu1 %v6078_v24 }
 0x542   :  { %v5448_v25 = vpop.f32.mrb[12].mxu1 }
 0x543   :  { %v5449_v27 = vpop.f32.mrb[13].mxu1 }
 0x544   :  { %v5450_v28 = vadd.f32 %v5449_v27, %v5448_v25  ;;  %v5451_v29 = vpop.f32.mrb[14].mxu1 }
 0x545   :  { %v5452_v30 = vpop.f32.mrb[15].mxu1 }
 0x546   :  { %v4692_v31 = vadd.f32 %v5450_v28, %v5406_v26  ;;  %v5453_v32 = vadd.f32 %v5452_v30, %v5451_v29 }
 0x548   :  { %v4700_v33 = vmul.f32 0.01, %v4692_v31  ;;  %v4695_v34 = vadd.f32 %v5453_v32, %v5406_v26  ;;  %vm4698_vm13 = vcmp.gt.f32.partialorder %v4692_v31, 0.0 }
 0x54a   :  { %vm4699_vm14 = vcmp.gt.f32.partialorder %v4695_v34, 0.0  ;;  %v4701_v35 = vmul.f32 0.01, %v4695_v34  ;;  %v4702_v36 = vsel %vm4698_vm13, %v4692_v31, %v4700_v33 }
 0x54c   :  { %v4703_v37 = vsel %vm4699_vm14, %v4695_v34, %v4701_v35 }
 0x54d   :  { %v4704_v38 = vpack.c.bf16 %v4703_v37, %v4702_v36 }
 0x54f   :  { %5480 = vmatmul.mubr.bf16.vlgmr.msra.gmra.mrb[16].mxu1 %v4704_v38 }
 0x622   :  { %v4810_v40 = vpop.f32.mrb[16].mxu1 }
 0x623   :  { %v4811_v41 = vadd.f32 %v5423_v39, %v4810_v40  ;;  %v5481_v42 = vpop.f32.mrb[17].mxu1 }
 0x624   :  { %v4813_v43 = vpop.f32.mrb[18].mxu1 }
 0x625   :  { %4817 = vst [vmem:[%s6445_s11] sm:$0xff] %v4811_v41  ;;  %v4814_v44 = vadd.f32 %v5423_v39, %v4813_v43  ;;  %v5482_v56 = vpop.f32.mrb[19].mxu1 }
 0x627   :  { %4818 = vst [vmem:[%s6445_s11 + $0x8] sm:$0xff] %v4814_v44 }
 0x628   :  { %4823 = vsyncpa [#allocation3], 1 }
 0x629   :  { %4824 = vsyncpa [#allocation5], 1 }
 0x62a   :  { %4825 = vsyncpa [#allocation8], 1 }

</bundles_post_ra>
